<compile_context>
chip_gen: v7x
topology: tpu7x:2x2x1
jax: 0.10.0
libtpu: 0.0.40
codegen_flags: <defaults>
</compile_context>

<pallas_src>
import functools

import jax
import jax.numpy as jnp
from jax.experimental import pallas as pl
from jax.experimental.pallas import tpu as pltpu

# ----------------------------- synthetic config ------------------------------
NUM_JOINTS = 17
VOLUME_SIZE = 8                 # V  -> Nvox = 512
CUBOID_SIDE = 2500.0
VOLUME_MULTIPLIER = 1.0
VOLUME_SOFTMAX = True
VOLUME_AGGREGATION = "sum"      # aggregation over views in unproject_heatmaps
KIND = "coco"                   # rotation axis [0,1,0]; theta==0 in eval -> identity
BACKBONE_CHANNELS = 48
BACKBONE_STRIDE = 4             # backbone stand-in downsamples by 4 (512x512 -> 128x128 analogue)


def _pick_tile(n, max_tile, unit=128):
    """Largest multiple of `unit` <= max_tile that divides n; else full extent n."""
    t = (min(n, max_tile) // unit) * unit
    while t >= unit:
        if n % t == 0:
            return t
        t -= unit
    return n


# =============================================================================
# Kernel 1: fused backbone(3->48) + keypoint head(48->J) pointwise convs.
#   Channels on sublanes, positions on lanes:
#     out(J, T) = Wh(J,48) @ ( Wb(48,3) @ X(3,T) + bb ) + bh
#   The 48-wide intermediate never touches HBM.
# =============================================================================
def _fused_conv_kernel(x_ref, wb_ref, bb_ref, wh_ref, bh_ref, o_ref):
    x = x_ref[0]                                                        # (Cin, T)
    h = jnp.dot(wb_ref[...], x, preferred_element_type=jnp.float32) + bb_ref[...]
    f = jnp.dot(wh_ref[...], h, preferred_element_type=jnp.float32) + bh_ref[...]
    o_ref[0] = f.astype(o_ref.dtype)


def fused_backbone_head(x_chw, w_backbone, b_backbone, w_head, b_head, max_tile=2048):
    """x_chw: (BV, Cin, HW) -> (BV, J, HW)."""
    bv, cin, hw = x_chw.shape
    cmid = w_backbone.shape[0]
    j = w_head.shape[0]
    tile = _pick_tile(hw, max_tile)
    return pl.pallas_call(
        _fused_conv_kernel,
        out_shape=jax.ShapeDtypeStruct((bv, j, hw), jnp.float32),
        grid_spec=pltpu.PrefetchScalarGridSpec(
            num_scalar_prefetch=0,
            grid=(bv, hw // tile),
            in_specs=[
                pl.BlockSpec((1, cin, tile), lambda i, t: (i, 0, t)),
                pl.BlockSpec((cmid, cin), lambda i, t: (0, 0)),
                pl.BlockSpec((cmid, 1), lambda i, t: (0, 0)),
                pl.BlockSpec((j, cmid), lambda i, t: (0, 0)),
                pl.BlockSpec((j, 1), lambda i, t: (0, 0)),
            ],
            out_specs=pl.BlockSpec((1, j, tile), lambda i, t: (i, 0, t)),
        ),
        compiler_params=pltpu.CompilerParams(
            dimension_semantics=("parallel", "parallel")
        ),
    )(x_chw, w_backbone, b_backbone.reshape(cmid, 1), w_head, b_head.reshape(j, 1))


# =============================================================================
# Kernel 2: unproject heatmaps into the 3D coordinate volume ('sum' aggregation).
#   grid = (batch, voxel-chunk, view); the view axis accumulates into (J, Nc).
#   F.grid_sample(align_corners=True, zeros padding) is evaluated with a
#   separable bilinear factorization:
#     kx(c,n) = (c==x0)*wx0 + (c==x0+1)*wx1        -> (w, Nc)
#     ky(r,n) = (r==y0)*wy0 + (r==y0+1)*wy1        -> (J*h, Nc) via per-row ids
#     contrib(J, Nc) = S(J, J*h) @ [ (hm(J*h,w) @ kx) * ky ]
#   Out-of-image corners never match the iota -> zeros padding is automatic.
# =============================================================================
def _unproject_kernel(coord_ref, proj_ref, feat_ref, rowid_ref, sel_ref, out_ref,
                      *, hm_h, hm_w):
    view = pl.program_id(2)

    @pl.when(view == 0)
    def _init():
        out_ref[...] = jnp.zeros_like(out_ref)

    coords = coord_ref[0]                # (3, Nc)
    P = proj_ref[0, 0]                   # (3, 4)
    hm = feat_ref[0, 0]                  # (J*h, w)
    rid = rowid_ref[...]                 # (J*h, 1) int32: row index within each joint map
    S = sel_ref[...]                     # (J, J*h) f32: per-joint row-sum selector
    nc = coords.shape[1]

    # project: (3, Nc) homogeneous = P[:, :3] @ coords + P[:, 3]
    proj = jnp.dot(P[:, :3], coords, preferred_element_type=jnp.float32) + P[:, 3:4]
    x = proj[0:1, :]
    y = proj[1:2, :]
    z = proj[2:3, :]
    valid = (z > 0.0).astype(jnp.float32)            # depth must be > 0
    z_safe = jnp.where(z == 0.0, 1.0, z)
    inv_z = pl.reciprocal(z_safe, approx=True)       # EUP slot, free vs. VPU divide
    x = x * inv_z
    y = y * inv_z

    # grid_sample(align_corners=True) pixel coords
    # (keeps the reference code's H/W normalization quirk; exact for Hf == Wf)
    ix = x * ((hm_w - 1.0) / hm_h)
    iy = y * ((hm_h - 1.0) / hm_w)
    # clip into a 1-pixel out-of-image band so the int32 conversion is safe;
    # clipped-away samples get zero weight below regardless.
    ix = jnp.clip(ix, -2.0, hm_w + 1.0)
    iy = jnp.clip(iy, -2.0, hm_h + 1.0)

    x0f = jnp.floor(ix)
    y0f = jnp.floor(iy)
    wx1 = ix - x0f
    wx0 = 1.0 - wx1
    wy1 = iy - y0f
    wy0 = 1.0 - wy1
    x0 = x0f.astype(jnp.int32)                       # (1, Nc)
    y0 = y0f.astype(jnp.int32)                       # (1, Nc)

    col = jax.lax.broadcasted_iota(jnp.int32, (hm_w, nc), 0)          # (w, Nc)
    kx = ((col == x0).astype(jnp.float32) * wx0
          + (col == (x0 + 1)).astype(jnp.float32) * wx1)              # (w, Nc)

    ky = ((rid == y0).astype(jnp.float32) * wy0
          + (rid == (y0 + 1)).astype(jnp.float32) * wy1) * valid      # (J*h, Nc)

    t = jnp.dot(hm, kx, preferred_element_type=jnp.float32) * ky      # (J*h, Nc)
    out_ref[0] += jnp.dot(S, t, preferred_element_type=jnp.float32)   # (J, Nc)


def unproject_heatmaps(coords_3n, proj, feats_rows, hm_h, hm_w, n_joints,
                       max_vox_chunk=256):
    """coords_3n (B,3,Nvox); proj (B,V,3,4); feats_rows (B,V,J*hm_h,hm_w) -> (B,J,Nvox)."""
    B, _, nvox = coords_3n.shape
    n_views = proj.shape[1]
    jh = n_joints * hm_h
    nc = _pick_tile(nvox, max_vox_chunk)
    n_chunks = nvox // nc

    # small static helpers: row-id within each joint's heatmap, per-joint row-sum selector
    rowid = jnp.tile(jnp.arange(hm_h, dtype=jnp.int32), n_joints).reshape(jh, 1)
    sel = (jnp.arange(n_joints, dtype=jnp.int32)[:, None]
           == (jnp.arange(jh, dtype=jnp.int32)[None, :] // hm_h)).astype(jnp.float32)

    kernel = functools.partial(_unproject_kernel, hm_h=hm_h, hm_w=hm_w)
    return pl.pallas_call(
        kernel,
        out_shape=jax.ShapeDtypeStruct((B, n_joints, nvox), jnp.float32),
        grid_spec=pltpu.PrefetchScalarGridSpec(
            num_scalar_prefetch=0,
            grid=(B, n_chunks, n_views),
            in_specs=[
                pl.BlockSpec((1, 3, nc), lambda b, c, v: (b, 0, c)),
                pl.BlockSpec((1, 1, 3, 4), lambda b, c, v: (b, v, 0, 0)),
                pl.BlockSpec((1, 1, jh, hm_w), lambda b, c, v: (b, v, 0, 0)),
                pl.BlockSpec((jh, 1), lambda b, c, v: (0, 0)),
                pl.BlockSpec((n_joints, jh), lambda b, c, v: (0, 0)),
            ],
            out_specs=pl.BlockSpec((1, n_joints, nc), lambda b, c, v: (b, 0, c)),
        ),
        compiler_params=pltpu.CompilerParams(
            dimension_semantics=("parallel", "parallel", "arbitrary")
        ),
    )(coords_3n, proj, feats_rows, rowid, sel)


# =============================================================================
# Kernel 3: fused V2V stand-in (1x1x1 conv J->J) + integrate_tensor_3d_with_coordinates
#   per batch, everything stays in VMEM:
#     v = Wv2v(J,J) @ vol(J,Nvox) + b ;  p = softmax(v * mult, axis=voxels)
#     kp(J,3) = p(J,Nvox) . coords(3,Nvox)^T   (contraction over the lane axis)
# =============================================================================
def _v2v_integrate_kernel(vol_ref, w_ref, b_ref, coord_ref, kp_ref, voln_ref,
                          *, multiplier, use_softmax):
    vol = vol_ref[0]                                                   # (J, Nvox)
    v = jnp.dot(w_ref[...], vol, preferred_element_type=jnp.float32) + b_ref[...]
    v = v * multiplier
    if use_softmax:
        m = jnp.max(v, axis=1, keepdims=True)
        e = jnp.exp(v - m)
        s = jnp.sum(e, axis=1, keepdims=True)
        p = e * pl.reciprocal(s, approx=True)
    else:
        p = jnp.maximum(v, 0.0)           # reference relu branch (unused: softmax=True)
    voln_ref[0] = p
    coords = coord_ref[0]                                              # (3, Nvox)
    kp_ref[0] = jax.lax.dot_general(
        p, coords, (((1,), (1,)), ((), ())), preferred_element_type=jnp.float32
    )                                                                  # (J, 3)


def v2v_integrate(volumes_jn, w_v2v, b_v2v, coords_3n, multiplier, use_softmax):
    B, J, nvox = volumes_jn.shape
    kernel = functools.partial(
        _v2v_integrate_kernel, multiplier=float(multiplier), use_softmax=bool(use_softmax)
    )
    return pl.pallas_call(
        kernel,
        out_shape=(
            jax.ShapeDtypeStruct((B, J, 3), jnp.float32),
            jax.ShapeDtypeStruct((B, J, nvox), jnp.float32),
        ),
        grid_spec=pltpu.PrefetchScalarGridSpec(
            num_scalar_prefetch=0,
            grid=(B,),
            in_specs=[
                pl.BlockSpec((1, J, nvox), lambda b: (b, 0, 0)),
                pl.BlockSpec((J, J), lambda b: (0, 0)),
                pl.BlockSpec((J, 1), lambda b: (0, 0)),
                pl.BlockSpec((1, 3, nvox), lambda b: (b, 0, 0)),
            ],
            out_specs=(
                pl.BlockSpec((1, J, 3), lambda b: (b, 0, 0)),
                pl.BlockSpec((1, J, nvox), lambda b: (b, 0, 0)),
            ),
        ),
        compiler_params=pltpu.CompilerParams(dimension_semantics=("parallel",)),
    )(volumes_jn, w_v2v, b_v2v.reshape(J, 1), coords_3n)


# =============================================================================
# Plain-JAX glue
# =============================================================================
def triangulate_point(projs, pts, confs):
    """DLT triangulation of one point from multiple views (torch.svd path)."""
    # projs (nv,3,4), pts (nv,2), confs (nv,)
    A = projs[:, 2:3, :] * pts[:, :, None] - projs[:, :2, :]           # (nv, 2, 4)
    A = A * confs[:, None, None]
    A = A.reshape(-1, 4)
    _, _, vh = jnp.linalg.svd(A, full_matrices=True)                   # no Pallas SVD
    h = vh[-1]
    return h[:3] / h[3]


def forward(images, orig_proj, detections, params):
    """images (B,V,3,H,W); orig_proj (B,V,3,4); detections (B,V,>=4)."""
    B, n_views, C, H, W = images.shape
    J, V = NUM_JOINTS, VOLUME_SIZE
    nvox = V * V * V

    # ---- backbone + keypoint head (fused Pallas kernel) ----
    # TODO(synk): HRNet whole-body backbone (pose_body.get_pose_net().backbone) is an
    # external module; stand-in = stride-4 subsample + 1x1 conv 3->48, fused with the
    # real head's 1x1 conv 48->J in a single pallas_call (NCHW = channels-on-sublane).
    sub = images.reshape(B * n_views, C, H, W)[:, :, ::BACKBONE_STRIDE, ::BACKBONE_STRIDE]
    Hf, Wf = int(sub.shape[2]), int(sub.shape[3])
    x_chw = sub.reshape(B * n_views, C, Hf * Wf)                       # (BV, 3, Hf*Wf)
    feats_jhw = fused_backbone_head(
        x_chw, params["w_backbone"], params["b_backbone"],
        params["w_head"], params["b_head"])                            # (BV, J, Hf*Wf)
    features = feats_jhw.reshape(B, n_views, J, Hf, Wf)                # pure reshape

    # ---- bbox-center triangulation (alg_confidences = 1) ----
    centers = jnp.stack(
        [(detections[..., 0] + detections[..., 2]) * 0.5,
         (detections[..., 1] + detections[..., 3]) * 0.5], axis=-1)    # (B,V,2)
    alg_conf = jnp.ones((B, n_views), jnp.float32)
    base_points = jax.vmap(triangulate_point)(orig_proj, centers, alg_conf)  # (B,3)

    # ---- coordinate volumes (theta == 0 in eval => rotation is identity) ----
    sides = jnp.array([CUBOID_SIDE * 0.75, CUBOID_SIDE * 0.75, CUBOID_SIDE], jnp.float32)
    position = base_points - sides[None, :] / 2.0
    ar = jnp.arange(V, dtype=jnp.float32)
    gx, gy, gz = jnp.meshgrid(ar, ar, ar, indexing="ij")
    grid = jnp.stack([gx, gy, gz], axis=-1)                            # (V,V,V,3)
    coord_volumes = (
        position[:, None, None, None, :]
        + (sides / (V - 1))[None, None, None, None, :] * grid[None]
    )                                                                  # (B,V,V,V,3)
    coords_3n = jnp.transpose(coord_volumes.reshape(B, nvox, 3), (0, 2, 1))  # (B,3,Nvox)

    # ---- camera.update_after_resize(image_shape -> features_shape) ----
    scale = jnp.array([[Wf / W, 0.0, 0.0], [0.0, Hf / H, 0.0], [0.0, 0.0, 1.0]], jnp.float32)
    proj_resized = jnp.einsum("ij,bvjk->bvik", scale, orig_proj)       # (B,V,3,4)

    # ---- op.unproject_heatmaps (aggregation = 'sum') ----
    feats_rows = feats_jhw.reshape(B, n_views, J * Hf, Wf)             # pure reshape
    volumes_jn = unproject_heatmaps(coords_3n, proj_resized, feats_rows, Hf, Wf, J)

    # ---- volume_net + op.integrate_tensor_3d_with_coordinates (fused) ----
    # TODO(synk): V2VModel (3D hourglass) is an external module; stand-in = 1x1x1 conv J->J.
    vol_keypoints_3d, volumes_norm = v2v_integrate(
        volumes_jn, params["w_v2v"], params["b_v2v"], coords_3n,
        VOLUME_MULTIPLIER, VOLUME_SOFTMAX)
    volumes_out = volumes_norm.reshape(B, J, V, V, V)                  # pure reshape

    cuboids = [{"position": position[b], "sides": sides} for b in range(B)]
    vol_confidences = None
    return (vol_keypoints_3d, features, volumes_out, vol_confidences,
            cuboids, coord_volumes, base_points)


# =============================================================================
# Synthetic inputs / parameters
# =============================================================================
def _look_at_projection(cam_center, fx, fy, cx, cy):
    target = jnp.zeros(3, jnp.float32)
    f = target - cam_center
    f = f / jnp.linalg.norm(f)
    up0 = jnp.array([0.0, 0.0, 1.0], jnp.float32)
    r = jnp.cross(f, up0)
    r = r / jnp.linalg.norm(r)
    u = jnp.cross(r, f)
    R = jnp.stack([r, u, f], axis=0)                     # rows: right, up, forward
    t = -R @ cam_center
    K = jnp.array([[fx, 0.0, cx], [0.0, fy, cy], [0.0, 0.0, 1.0]], jnp.float32)
    return K @ jnp.concatenate([R, t[:, None]], axis=1)  # (3,4)


if __name__ == "__main__":
    B, n_views, H, W = 2, 4, 32, 32
    key = jax.random.PRNGKey(0)
    k1, k2, k3, k4, k5, k6, k7 = jax.random.split(key, 7)

    # weights stored PyTorch-style as (Cout, Cin)
    params = {
        "w_backbone": 0.05 * jax.random.normal(k1, (BACKBONE_CHANNELS, 3), jnp.float32),
        "b_backbone": 0.05 * jax.random.normal(k2, (BACKBONE_CHANNELS,), jnp.float32),
        "w_head": 0.05 * jax.random.normal(k3, (NUM_JOINTS, BACKBONE_CHANNELS), jnp.float32),
        "b_head": 0.05 * jax.random.normal(k4, (NUM_JOINTS,), jnp.float32),
        "w_v2v": 0.05 * jax.random.normal(k5, (NUM_JOINTS, NUM_JOINTS), jnp.float32),
        "b_v2v": 0.05 * jax.random.normal(k6, (NUM_JOINTS,), jnp.float32),
    }

    images = jax.random.normal(k7, (B, n_views, 3, H, W), jnp.float32)

    # deterministic synthetic cameras on a ring, looking at the origin
    fx = fy = 40.0
    cx = cy = 16.0
    radius = 4000.0
    proj_rows = []
    for b in range(B):
        row = []
        for v in range(n_views):
            a = 2.0 * jnp.pi * v / n_views + 0.1 * b
            cam_c = (radius + 100.0 * b) * jnp.array(
                [jnp.cos(a), jnp.sin(a), 0.25], jnp.float32
            )
            row.append(_look_at_projection(cam_c, fx, fy, cx, cy))
        proj_rows.append(jnp.stack(row, 0))
    orig_proj = jnp.stack(proj_rows, 0)                  # (B, n_views, 3, 4)

    # synthetic detections: bbox centered on the projection of a per-batch 3D point
    X0 = jnp.stack(
        [jnp.array([100.0 + 20.0 * b, -50.0 - 10.0 * b, 40.0], jnp.float32) for b in range(B)], 0
    )                                                    # (B,3)
    X0h = jnp.concatenate([X0, jnp.ones((B, 1), jnp.float32)], axis=1)   # (B,4)
    ph = jnp.einsum("bvij,bj->bvi", orig_proj, X0h)
    uv = ph[..., :2] / ph[..., 2:3]                      # (B,V,2)
    detections = jnp.concatenate(
        [uv[..., 0:1] - 6.0, uv[..., 1:2] - 6.0,
         uv[..., 0:1] + 6.0, uv[..., 1:2] + 6.0,
         jnp.ones((B, n_views, 1), jnp.float32)], axis=-1)               # (B,V,5)

    forward_jit = jax.jit(forward)
    out = forward_jit(images, orig_proj, detections, params)
    vol_kp3d, features, volumes, vol_conf, cuboids, coord_volumes, base_points = out
    jax.block_until_ready(vol_kp3d)
    jax.block_until_ready(features)
    jax.block_until_ready(volumes)
    jax.block_until_ready(coord_volumes)
    jax.block_until_ready(base_points)
    print("KERNEL_OK")
</pallas_src>

<mosaic_0001>
module attributes {stable_mosaic.version = 11 : i64} {
  func.func @_fused_conv_kernel(%arg0: i32, %arg1: i32, %arg2: memref<1x3x64xf32, #tpu.memory_space<vmem>>, %arg3: memref<48x3xf32, #tpu.memory_space<vmem>>, %arg4: memref<48x1xf32, #tpu.memory_space<vmem>>, %arg5: memref<17x48xf32, #tpu.memory_space<vmem>>, %arg6: memref<17x1xf32, #tpu.memory_space<vmem>>, %arg7: memref<1x17x64xf32, #tpu.memory_space<vmem>>) attributes {dimension_semantics = [#tpu.dimension_semantics<parallel>, #tpu.dimension_semantics<parallel>], iteration_bounds = array<i64: 8, 1>, scalar_prefetch = 0 : i64, scratch_operands = 0 : i64, tpu.core_type = #tpu.core_type<tc>, window_params = [{transform_indices = @transform_0, window_bounds = array<i64: 1, 3, 64>}, {pipeline_mode = #tpu.pipeline_mode<synchronous>, transform_indices = @transform_1, window_bounds = array<i64: 48, 3>}, {pipeline_mode = #tpu.pipeline_mode<synchronous>, transform_indices = @transform_2, window_bounds = array<i64: 48, 1>}, {pipeline_mode = #tpu.pipeline_mode<synchronous>, transform_indices = @transform_3, window_bounds = array<i64: 17, 48>}, {pipeline_mode = #tpu.pipeline_mode<synchronous>, transform_indices = @transform_4, window_bounds = array<i64: 17, 1>}, {transform_indices = @transform_5, window_bounds = array<i64: 1, 17, 64>}]} {
    %c0 = arith.constant 0 : index
    %c0_0 = arith.constant 0 : index
    %c0_1 = arith.constant 0 : index
    %0 = vector.load %arg2[%c0, %c0_0, %c0_1] : memref<1x3x64xf32, #tpu.memory_space<vmem>>, vector<1x3x64xf32>
    %1 = vector.shape_cast %0 : vector<1x3x64xf32> to vector<3x64xf32>
    %c0_2 = arith.constant 0 : index
    %c0_3 = arith.constant 0 : index
    %2 = vector.load %arg3[%c0_2, %c0_3] : memref<48x3xf32, #tpu.memory_space<vmem>>, vector<48x3xf32>
    %cst = arith.constant dense<0.000000e+00> : vector<48x64xf32>
    %3 = tpu.matmul %2, %1, %cst {dimension_numbers = #tpu.dot_dimension_numbers<[1], [0], [0], [1], [0, 0, 1, 1], [], []>} : vector<48x3xf32>, vector<3x64xf32>, vector<48x64xf32> -> vector<48x64xf32>
    %c0_4 = arith.constant 0 : index
    %c0_5 = arith.constant 0 : index
    %4 = vector.load %arg4[%c0_4, %c0_5] : memref<48x1xf32, #tpu.memory_space<vmem>>, vector<48x1xf32>
    %5 = vector.broadcast %4 : vector<48x1xf32> to vector<48x64xf32>
    %6 = arith.addf %3, %5 : vector<48x64xf32>
    %c0_6 = arith.constant 0 : index
    %c0_7 = arith.constant 0 : index
    %7 = vector.load %arg5[%c0_6, %c0_7] : memref<17x48xf32, #tpu.memory_space<vmem>>, vector<17x48xf32>
    %cst_8 = arith.constant dense<0.000000e+00> : vector<17x64xf32>
    %8 = tpu.matmul %7, %6, %cst_8 {dimension_numbers = #tpu.dot_dimension_numbers<[1], [0], [0], [1], [0, 0, 1, 1], [], []>} : vector<17x48xf32>, vector<48x64xf32>, vector<17x64xf32> -> vector<17x64xf32>
    %c0_9 = arith.constant 0 : index
    %c0_10 = arith.constant 0 : index
    %9 = vector.load %arg6[%c0_9, %c0_10] : memref<17x1xf32, #tpu.memory_space<vmem>>, vector<17x1xf32>
    %10 = vector.broadcast %9 : vector<17x1xf32> to vector<17x64xf32>
    %11 = arith.addf %8, %10 : vector<17x64xf32>
    %c0_11 = arith.constant 0 : index
    %c0_12 = arith.constant 0 : index
    %c0_13 = arith.constant 0 : index
    %12 = vector.load %arg7[%c0_11, %c0_12, %c0_13] : memref<1x17x64xf32, #tpu.memory_space<vmem>>, vector<1x17x64xf32>
    %13 = vector.shape_cast %12 : vector<1x17x64xf32> to vector<17x64xf32>
    %14 = vector.shape_cast %11 : vector<17x64xf32> to vector<1x17x64xf32>
    tpu.vector_store %arg7[%c0_11, %c0_12, %c0_13], %14 {strides = array<i32>} : memref<1x17x64xf32, #tpu.memory_space<vmem>>, vector<1x17x64xf32>,
    return
  }
  func.func @transform_0(%arg0: i32, %arg1: i32) -> (i32, i32, i32) {
    %c0_i32 = arith.constant 0 : i32
    %c0_i32_0 = arith.constant 0 : i32
    return %arg0, %c0_i32, %arg1 : i32, i32, i32
  }
  func.func @transform_1(%arg0: i32, %arg1: i32) -> (i32, i32) {
    %c0_i32 = arith.constant 0 : i32
    %c0_i32_0 = arith.constant 0 : i32
    %c0_i32_1 = arith.constant 0 : i32
    return %c0_i32, %c0_i32_0 : i32, i32
  }
  func.func @transform_2(%arg0: i32, %arg1: i32) -> (i32, i32) {
    %c0_i32 = arith.constant 0 : i32
    %c0_i32_0 = arith.constant 0 : i32
    %c0_i32_1 = arith.constant 0 : i32
    return %c0_i32, %c0_i32_0 : i32, i32
  }
  func.func @transform_3(%arg0: i32, %arg1: i32) -> (i32, i32) {
    %c0_i32 = arith.constant 0 : i32
    %c0_i32_0 = arith.constant 0 : i32
    %c0_i32_1 = arith.constant 0 : i32
    return %c0_i32, %c0_i32_0 : i32, i32
  }
  func.func @transform_4(%arg0: i32, %arg1: i32) -> (i32, i32) {
    %c0_i32 = arith.constant 0 : i32
    %c0_i32_0 = arith.constant 0 : i32
    %c0_i32_1 = arith.constant 0 : i32
    return %c0_i32, %c0_i32_0 : i32, i32
  }
  func.func @transform_5(%arg0: i32, %arg1: i32) -> (i32, i32, i32) {
    %c0_i32 = arith.constant 0 : i32
    %c0_i32_0 = arith.constant 0 : i32
    return %arg0, %c0_i32, %arg1 : i32, i32, i32
  }
}

module attributes {stable_mosaic.version = 11 : i64} {
  func.func @_unproject_kernel(%arg0: i32, %arg1: i32, %arg2: i32, %arg3: memref<1x3x256xf32, #tpu.memory_space<vmem>>, %arg4: memref<1x1x3x4xf32, #tpu.memory_space<vmem>>, %arg5: memref<1x1x136x8xf32, #tpu.memory_space<vmem>>, %arg6: memref<136x1xi32, #tpu.memory_space<vmem>>, %arg7: memref<17x136xf32, #tpu.memory_space<vmem>>, %arg8: memref<1x17x256xf32, #tpu.memory_space<vmem>>) attributes {dimension_semantics = [#tpu.dimension_semantics<parallel>, #tpu.dimension_semantics<parallel>, #tpu.dimension_semantics<arbitrary>], iteration_bounds = array<i64: 2, 2, 4>, scalar_prefetch = 0 : i64, scratch_operands = 0 : i64, tpu.core_type = #tpu.core_type<tc>, window_params = [{transform_indices = @transform_0, window_bounds = array<i64: 1, 3, 256>}, {transform_indices = @transform_1, window_bounds = array<i64: 1, 1, 3, 4>}, {transform_indices = @transform_2, window_bounds = array<i64: 1, 1, 136, 8>}, {pipeline_mode = #tpu.pipeline_mode<synchronous>, transform_indices = @transform_3, window_bounds = array<i64: 136, 1>}, {pipeline_mode = #tpu.pipeline_mode<synchronous>, transform_indices = @transform_4, window_bounds = array<i64: 17, 136>}, {transform_indices = @transform_5, window_bounds = array<i64: 1, 17, 256>}]} {
    %c0_i32 = arith.constant 0 : i32
    %0 = arith.cmpi eq, %arg2, %c0_i32 : i32
    %1 = arith.extui %0 : i1 to i32
    %c0_i32_0 = arith.constant 0 : i32
    %2 = arith.cmpi ne, %1, %c0_i32_0 : i32
    scf.if %2 {
      %cst_35 = arith.constant 0.000000e+00 : f32
      %96 = vector.broadcast %cst_35 : f32 to vector<1x17x256xf32>
      %c0_36 = arith.constant 0 : index
      %c0_37 = arith.constant 0 : index
      %c0_38 = arith.constant 0 : index
      %97 = vector.load %arg8[%c0_36, %c0_37, %c0_38] : memref<1x17x256xf32, #tpu.memory_space<vmem>>, vector<1x17x256xf32>
      tpu.vector_store %arg8[%c0_36, %c0_37, %c0_38], %96 {strides = array<i32>} : memref<1x17x256xf32, #tpu.memory_space<vmem>>, vector<1x17x256xf32>,
    } else {
    }
    %c0 = arith.constant 0 : index
    %c0_1 = arith.constant 0 : index
    %c0_2 = arith.constant 0 : index
    %3 = vector.load %arg3[%c0, %c0_1, %c0_2] : memref<1x3x256xf32, #tpu.memory_space<vmem>>, vector<1x3x256xf32>
    %4 = vector.shape_cast %3 : vector<1x3x256xf32> to vector<3x256xf32>
    %c0_3 = arith.constant 0 : index
    %c0_4 = arith.constant 0 : index
    %c0_5 = arith.constant 0 : index
    %c0_6 = arith.constant 0 : index
    %5 = vector.load %arg4[%c0_3, %c0_4, %c0_5, %c0_6] : memref<1x1x3x4xf32, #tpu.memory_space<vmem>>, vector<1x1x3x4xf32>
    %6 = vector.shape_cast %5 : vector<1x1x3x4xf32> to vector<3x4xf32>
    %c0_7 = arith.constant 0 : index
    %c0_8 = arith.constant 0 : index
    %c0_9 = arith.constant 0 : index
    %c0_10 = arith.constant 0 : index
    %7 = vector.load %arg5[%c0_7, %c0_8, %c0_9, %c0_10] : memref<1x1x136x8xf32, #tpu.memory_space<vmem>>, vector<1x1x136x8xf32>
    %8 = vector.shape_cast %7 : vector<1x1x136x8xf32> to vector<136x8xf32>
    %c0_11 = arith.constant 0 : index
    %c0_12 = arith.constant 0 : index
    %9 = vector.load %arg6[%c0_11, %c0_12] : memref<136x1xi32, #tpu.memory_space<vmem>>, vector<136x1xi32>
    %c0_13 = arith.constant 0 : index
    %c0_14 = arith.constant 0 : index
    %10 = vector.load %arg7[%c0_13, %c0_14] : memref<17x136xf32, #tpu.memory_space<vmem>>, vector<17x136xf32>
    %11 = vector.extract_strided_slice %6 {offsets = [0, 0], sizes = [3, 3], strides = [1, 1]} : vector<3x4xf32> to vector<3x3xf32>
    %cst = arith.constant dense<0.000000e+00> : vector<3x256xf32>
    %12 = tpu.matmul %11, %4, %cst {dimension_numbers = #tpu.dot_dimension_numbers<[1], [0], [0], [1], [0, 0, 1, 1], [], []>} : vector<3x3xf32>, vector<3x256xf32>, vector<3x256xf32> -> vector<3x256xf32>
    %13 = vector.extract_strided_slice %6 {offsets = [0, 3], sizes = [3, 1], strides = [1, 1]} : vector<3x4xf32> to vector<3x1xf32>
    %14 = vector.broadcast %13 : vector<3x1xf32> to vector<3x256xf32>
    %15 = arith.addf %12, %14 : vector<3x256xf32>
    %16 = vector.extract_strided_slice %15 {offsets = [0, 0], sizes = [1, 256], strides = [1, 1]} : vector<3x256xf32> to vector<1x256xf32>
    %17 = vector.extract_strided_slice %15 {offsets = [1, 0], sizes = [1, 256], strides = [1, 1]} : vector<3x256xf32> to vector<1x256xf32>
    %18 = vector.extract_strided_slice %15 {offsets = [2, 0], sizes = [1, 256], strides = [1, 1]} : vector<3x256xf32> to vector<1x256xf32>
    %cst_15 = arith.constant 0.000000e+00 : f32
    %19 = vector.broadcast %cst_15 : f32 to vector<1x256xf32>
    %20 = arith.cmpf ogt, %18, %19 : vector<1x256xf32>
    %21 = arith.extui %20 : vector<1x256xi1> to vector<1x256xi32>
    %22 = arith.sitofp %21 : vector<1x256xi32> to vector<1x256xf32>
    %cst_16 = arith.constant 0.000000e+00 : f32
    %23 = vector.broadcast %cst_16 : f32 to vector<1x256xf32>
    %24 = arith.cmpf oeq, %18, %23 : vector<1x256xf32>
    %cst_17 = arith.constant 1.000000e+00 : f32
    %25 = vector.broadcast %cst_17 : f32 to vector<1x256xf32>
    %26 = arith.select %24, %25, %18 : vector<1x256xi1>, vector<1x256xf32>
    %27 = tpu.reciprocal %26 {approx = true} : vector<1x256xf32> -> vector<1x256xf32>
    %28 = arith.mulf %16, %27 : vector<1x256xf32>
    %29 = arith.mulf %17, %27 : vector<1x256xf32>
    %cst_18 = arith.constant 8.750000e-01 : f32
    %30 = vector.broadcast %cst_18 : f32 to vector<1x256xf32>
    %31 = arith.mulf %28, %30 : vector<1x256xf32>
    %cst_19 = arith.constant 8.750000e-01 : f32
    %32 = vector.broadcast %cst_19 : f32 to vector<1x256xf32>
    %33 = arith.mulf %29, %32 : vector<1x256xf32>
    %cst_20 = arith.constant -2.000000e+00 : f32
    %cst_21 = arith.constant 9.000000e+00 : f32
    %34 = vector.broadcast %cst_20 : f32 to vector<1x256xf32>
    %35 = arith.maximumf %34, %31 : vector<1x256xf32>
    %36 = vector.broadcast %cst_21 : f32 to vector<1x256xf32>
    %37 = arith.minimumf %36, %35 : vector<1x256xf32>
    %cst_22 = arith.constant -2.000000e+00 : f32
    %cst_23 = arith.constant 9.000000e+00 : f32
    %38 = vector.broadcast %cst_22 : f32 to vector<1x256xf32>
    %39 = arith.maximumf %38, %33 : vector<1x256xf32>
    %40 = vector.broadcast %cst_23 : f32 to vector<1x256xf32>
    %41 = arith.minimumf %40, %39 : vector<1x256xf32>
    %42 = math.floor %37 : vector<1x256xf32>
    %43 = math.floor %41 : vector<1x256xf32>
    %44 = arith.subf %37, %42 : vector<1x256xf32>
    %cst_24 = arith.constant 1.000000e+00 : f32
    %45 = vector.broadcast %cst_24 : f32 to vector<1x256xf32>
    %46 = arith.subf %45, %44 : vector<1x256xf32>
    %47 = arith.subf %41, %43 : vector<1x256xf32>
    %cst_25 = arith.constant 1.000000e+00 : f32
    %48 = vector.broadcast %cst_25 : f32 to vector<1x256xf32>
    %49 = arith.subf %48, %47 : vector<1x256xf32>
    %50 = arith.fptosi %42 : vector<1x256xf32> to vector<1x256xi32>
    %51 = arith.fptosi %43 : vector<1x256xf32> to vector<1x256xi32>
    %52 = tpu.iota {dimensions = array<i32: 0>} : vector<8x256xi32>
    %53 = vector.broadcast %50 : vector<1x256xi32> to vector<8x256xi32>
    %54 = arith.cmpi eq, %52, %53 : vector<8x256xi32>
    %55 = arith.extui %54 : vector<8x256xi1> to vector<8x256xi32>
    %56 = arith.sitofp %55 : vector<8x256xi32> to vector<8x256xf32>
    %57 = vector.broadcast %46 : vector<1x256xf32> to vector<8x256xf32>
    %58 = arith.mulf %56, %57 : vector<8x256xf32>
    %c1_i32 = arith.constant 1 : i32
    %59 = vector.broadcast %c1_i32 : i32 to vector<1x256xi32>
    %60 = arith.addi %50, %59 : vector<1x256xi32>
    %61 = vector.broadcast %60 : vector<1x256xi32> to vector<8x256xi32>
    %62 = arith.cmpi eq, %52, %61 : vector<8x256xi32>
    %63 = arith.extui %62 : vector<8x256xi1> to vector<8x256xi32>
    %64 = arith.sitofp %63 : vector<8x256xi32> to vector<8x256xf32>
    %65 = vector.broadcast %44 : vector<1x256xf32> to vector<8x256xf32>
    %66 = arith.mulf %64, %65 : vector<8x256xf32>
    %67 = arith.addf %58, %66 : vector<8x256xf32>
    %68 = vector.broadcast %9 : vector<136x1xi32> to vector<136x256xi32>
    %69 = vector.broadcast %51 : vector<1x256xi32> to vector<136x256xi32>
    %70 = arith.cmpi eq, %68, %69 : vector<136x256xi32>
    %71 = arith.extui %70 : vector<136x256xi1> to vector<136x256xi32>
    %72 = arith.sitofp %71 : vector<136x256xi32> to vector<136x256xf32>
    %73 = vector.broadcast %49 : vector<1x256xf32> to vector<136x256xf32>
    %74 = arith.mulf %72, %73 : vector<136x256xf32>
    %c1_i32_26 = arith.constant 1 : i32
    %75 = vector.broadcast %c1_i32_26 : i32 to vector<1x256xi32>
    %76 = arith.addi %51, %75 : vector<1x256xi32>
    %77 = vector.broadcast %9 : vector<136x1xi32> to vector<136x256xi32>
    %78 = vector.broadcast %76 : vector<1x256xi32> to vector<136x256xi32>
    %79 = arith.cmpi eq, %77, %78 : vector<136x256xi32>
    %80 = arith.extui %79 : vector<136x256xi1> to vector<136x256xi32>
    %81 = arith.sitofp %80 : vector<136x256xi32> to vector<136x256xf32>
    %82 = vector.broadcast %47 : vector<1x256xf32> to vector<136x256xf32>
    %83 = arith.mulf %81, %82 : vector<136x256xf32>
    %84 = arith.addf %74, %83 : vector<136x256xf32>
    %85 = vector.broadcast %22 : vector<1x256xf32> to vector<136x256xf32>
    %86 = arith.mulf %84, %85 : vector<136x256xf32>
    %cst_27 = arith.constant dense<0.000000e+00> : vector<136x256xf32>
    %87 = tpu.matmul %8, %67, %cst_27 {dimension_numbers = #tpu.dot_dimension_numbers<[1], [0], [0], [1], [0, 0, 1, 1], [], []>} : vector<136x8xf32>, vector<8x256xf32>, vector<136x256xf32> -> vector<136x256xf32>
    %88 = arith.mulf %87, %86 : vector<136x256xf32>
    %c0_28 = arith.constant 0 : index
    %c0_29 = arith.constant 0 : index
    %c0_30 = arith.constant 0 : index
    %89 = vector.load %arg8[%c0_28, %c0_29, %c0_30] : memref<1x17x256xf32, #tpu.memory_space<vmem>>, vector<1x17x256xf32>
    %90 = vector.shape_cast %89 : vector<1x17x256xf32> to vector<17x256xf32>
    %cst_31 = arith.constant dense<0.000000e+00> : vector<17x256xf32>
    %91 = tpu.matmul %10, %88, %cst_31 {dimension_numbers = #tpu.dot_dimension_numbers<[1], [0], [0], [1], [0, 0, 1, 1], [], []>} : vector<17x136xf32>, vector<136x256xf32>, vector<17x256xf32> -> vector<17x256xf32>
    %92 = arith.addf %90, %91 : vector<17x256xf32>
    %c0_32 = arith.constant 0 : index
    %c0_33 = arith.constant 0 : index
    %c0_34 = arith.constant 0 : index
    %93 = vector.load %arg8[%c0_32, %c0_33, %c0_34] : memref<1x17x256xf32, #tpu.memory_space<vmem>>, vector<1x17x256xf32>
    %94 = vector.shape_cast %93 : vector<1x17x256xf32> to vector<17x256xf32>
    %95 = vector.shape_cast %92 : vector<17x256xf32> to vector<1x17x256xf32>
    tpu.vector_store %arg8[%c0_32, %c0_33, %c0_34], %95 {strides = array<i32>} : memref<1x17x256xf32, #tpu.memory_space<vmem>>, vector<1x17x256xf32>,
    return
  }
  func.func @transform_0(%arg0: i32, %arg1: i32, %arg2: i32) -> (i32, i32, i32) {
    %c0_i32 = arith.constant 0 : i32
    %c0_i32_0 = arith.constant 0 : i32
    return %arg0, %c0_i32, %arg1 : i32, i32, i32
  }
  func.func @transform_1(%arg0: i32, %arg1: i32, %arg2: i32) -> (i32, i32, i32, i32) {
    %c0_i32 = arith.constant 0 : i32
    %c0_i32_0 = arith.constant 0 : i32
    %c0_i32_1 = arith.constant 0 : i32
    return %arg0, %arg2, %c0_i32, %c0_i32_0 : i32, i32, i32, i32
  }
  func.func @transform_2(%arg0: i32, %arg1: i32, %arg2: i32) -> (i32, i32, i32, i32) {
    %c0_i32 = arith.constant 0 : i32
    %c0_i32_0 = arith.constant 0 : i32
    %c0_i32_1 = arith.constant 0 : i32
    return %arg0, %arg2, %c0_i32, %c0_i32_0 : i32, i32, i32, i32
  }
  func.func @transform_3(%arg0: i32, %arg1: i32, %arg2: i32) -> (i32, i32) {
    %c0_i32 = arith.constant 0 : i32
    %c0_i32_0 = arith.constant 0 : i32
    %c0_i32_1 = arith.constant 0 : i32
    return %c0_i32, %c0_i32_0 : i32, i32
  }
  func.func @transform_4(%arg0: i32, %arg1: i32, %arg2: i32) -> (i32, i32) {
    %c0_i32 = arith.constant 0 : i32
    %c0_i32_0 = arith.constant 0 : i32
    %c0_i32_1 = arith.constant 0 : i32
    return %c0_i32, %c0_i32_0 : i32, i32
  }
  func.func @transform_5(%arg0: i32, %arg1: i32, %arg2: i32) -> (i32, i32, i32) {
    %c0_i32 = arith.constant 0 : i32
    %c0_i32_0 = arith.constant 0 : i32
    return %arg0, %c0_i32, %arg1 : i32, i32, i32
  }
}

module attributes {stable_mosaic.version = 11 : i64} {
  func.func @_v2v_integrate_kernel(%arg0: i32, %arg1: memref<1x17x512xf32, #tpu.memory_space<vmem>>, %arg2: memref<17x17xf32, #tpu.memory_space<vmem>>, %arg3: memref<17x1xf32, #tpu.memory_space<vmem>>, %arg4: memref<1x3x512xf32, #tpu.memory_space<vmem>>, %arg5: memref<1x17x3xf32, #tpu.memory_space<vmem>>, %arg6: memref<1x17x512xf32, #tpu.memory_space<vmem>>) attributes {dimension_semantics = [#tpu.dimension_semantics<parallel>], iteration_bounds = array<i64: 2>, scalar_prefetch = 0 : i64, scratch_operands = 0 : i64, tpu.core_type = #tpu.core_type<tc>, window_params = [{transform_indices = @transform_0, window_bounds = array<i64: 1, 17, 512>}, {pipeline_mode = #tpu.pipeline_mode<synchronous>, transform_indices = @transform_1, window_bounds = array<i64: 17, 17>}, {pipeline_mode = #tpu.pipeline_mode<synchronous>, transform_indices = @transform_2, window_bounds = array<i64: 17, 1>}, {transform_indices = @transform_3, window_bounds = array<i64: 1, 3, 512>}, {transform_indices = @transform_4, window_bounds = array<i64: 1, 17, 3>}, {transform_indices = @transform_5, window_bounds = array<i64: 1, 17, 512>}]} {
    %c0 = arith.constant 0 : index
    %c0_0 = arith.constant 0 : index
    %c0_1 = arith.constant 0 : index
    %0 = vector.load %arg1[%c0, %c0_0, %c0_1] : memref<1x17x512xf32, #tpu.memory_space<vmem>>, vector<1x17x512xf32>
    %1 = vector.shape_cast %0 : vector<1x17x512xf32> to vector<17x512xf32>
    %c0_2 = arith.constant 0 : index
    %c0_3 = arith.constant 0 : index
    %2 = vector.load %arg2[%c0_2, %c0_3] : memref<17x17xf32, #tpu.memory_space<vmem>>, vector<17x17xf32>
    %cst = arith.constant dense<0.000000e+00> : vector<17x512xf32>
    %3 = tpu.matmul %2, %1, %cst {dimension_numbers = #tpu.dot_dimension_numbers<[1], [0], [0], [1], [0, 0, 1, 1], [], []>} : vector<17x17xf32>, vector<17x512xf32>, vector<17x512xf32> -> vector<17x512xf32>
    %c0_4 = arith.constant 0 : index
    %c0_5 = arith.constant 0 : index
    %4 = vector.load %arg3[%c0_4, %c0_5] : memref<17x1xf32, #tpu.memory_space<vmem>>, vector<17x1xf32>
    %5 = vector.broadcast %4 : vector<17x1xf32> to vector<17x512xf32>
    %6 = arith.addf %3, %5 : vector<17x512xf32>
    %cst_6 = arith.constant 1.000000e+00 : f32
    %7 = vector.broadcast %cst_6 : f32 to vector<17x512xf32>
    %8 = arith.mulf %6, %7 : vector<17x512xf32>
    %cst_7 = arith.constant dense<0xFF800000> : vector<17xf32>
    %9 = vector.multi_reduction <maximumf>, %8, %cst_7 [1] : vector<17x512xf32> to vector<17xf32>
    %10 = vector.shape_cast %9 : vector<17xf32> to vector<17x1xf32>
    %11 = vector.broadcast %10 : vector<17x1xf32> to vector<17x512xf32>
    %12 = arith.subf %8, %11 : vector<17x512xf32>
    %13 = math.exp %12 : vector<17x512xf32>
    %cst_8 = arith.constant dense<0.000000e+00> : vector<17xf32>
    %14 = vector.multi_reduction <add>, %13, %cst_8 [1] : vector<17x512xf32> to vector<17xf32>
    %15 = vector.shape_cast %14 : vector<17xf32> to vector<17x1xf32>
    %16 = tpu.reciprocal %15 {approx = true} : vector<17x1xf32> -> vector<17x1xf32>
    %17 = vector.broadcast %16 : vector<17x1xf32> to vector<17x512xf32>
    %18 = arith.mulf %13, %17 : vector<17x512xf32>
    %c0_9 = arith.constant 0 : index
    %c0_10 = arith.constant 0 : index
    %c0_11 = arith.constant 0 : index
    %19 = vector.load %arg6[%c0_9, %c0_10, %c0_11] : memref<1x17x512xf32, #tpu.memory_space<vmem>>, vector<1x17x512xf32>
    %20 = vector.shape_cast %19 : vector<1x17x512xf32> to vector<17x512xf32>
    %21 = vector.shape_cast %18 : vector<17x512xf32> to vector<1x17x512xf32>
    tpu.vector_store %arg6[%c0_9, %c0_10, %c0_11], %21 {strides = array<i32>} : memref<1x17x512xf32, #tpu.memory_space<vmem>>, vector<1x17x512xf32>,
    %c0_12 = arith.constant 0 : index
    %c0_13 = arith.constant 0 : index
    %c0_14 = arith.constant 0 : index
    %22 = vector.load %arg4[%c0_12, %c0_13, %c0_14] : memref<1x3x512xf32, #tpu.memory_space<vmem>>, vector<1x3x512xf32>
    %23 = vector.shape_cast %22 : vector<1x3x512xf32> to vector<3x512xf32>
    %cst_15 = arith.constant dense<0.000000e+00> : vector<17x3xf32>
    %24 = tpu.matmul %18, %23, %cst_15 {dimension_numbers = #tpu.dot_dimension_numbers<[1], [1], [0], [0], [0, 0, 1, 0], [], []>} : vector<17x512xf32>, vector<3x512xf32>, vector<17x3xf32> -> vector<17x3xf32>
    %c0_16 = arith.constant 0 : index
    %c0_17 = arith.constant 0 : index
    %c0_18 = arith.constant 0 : index
    %25 = vector.load %arg5[%c0_16, %c0_17, %c0_18] : memref<1x17x3xf32, #tpu.memory_space<vmem>>, vector<1x17x3xf32>
    %26 = vector.shape_cast %25 : vector<1x17x3xf32> to vector<17x3xf32>
    %27 = vector.shape_cast %24 : vector<17x3xf32> to vector<1x17x3xf32>
    tpu.vector_store %arg5[%c0_16, %c0_17, %c0_18], %27 {strides = array<i32>} : memref<1x17x3xf32, #tpu.memory_space<vmem>>, vector<1x17x3xf32>,
    return
  }
  func.func @transform_0(%arg0: i32) -> (i32, i32, i32) {
    %c0_i32 = arith.constant 0 : i32
    %c0_i32_0 = arith.constant 0 : i32
    %c0_i32_1 = arith.constant 0 : i32
    return %arg0, %c0_i32, %c0_i32_0 : i32, i32, i32
  }
  func.func @transform_1(%arg0: i32) -> (i32, i32) {
    %c0_i32 = arith.constant 0 : i32
    %c0_i32_0 = arith.constant 0 : i32
    %c0_i32_1 = arith.constant 0 : i32
    return %c0_i32, %c0_i32_0 : i32, i32
  }
  func.func @transform_2(%arg0: i32) -> (i32, i32) {
    %c0_i32 = arith.constant 0 : i32
    %c0_i32_0 = arith.constant 0 : i32
    %c0_i32_1 = arith.constant 0 : i32
    return %c0_i32, %c0_i32_0 : i32, i32
  }
  func.func @transform_3(%arg0: i32) -> (i32, i32, i32) {
    %c0_i32 = arith.constant 0 : i32
    %c0_i32_0 = arith.constant 0 : i32
    %c0_i32_1 = arith.constant 0 : i32
    return %arg0, %c0_i32, %c0_i32_0 : i32, i32, i32
  }
  func.func @transform_4(%arg0: i32) -> (i32, i32, i32) {
    %c0_i32 = arith.constant 0 : i32
    %c0_i32_0 = arith.constant 0 : i32
    %c0_i32_1 = arith.constant 0 : i32
    return %arg0, %c0_i32, %c0_i32_0 : i32, i32, i32
  }
  func.func @transform_5(%arg0: i32) -> (i32, i32, i32) {
    %c0_i32 = arith.constant 0 : i32
    %c0_i32_0 = arith.constant 0 : i32
    %c0_i32_1 = arith.constant 0 : i32
    return %arg0, %c0_i32, %c0_i32_0 : i32, i32, i32
  }
}

</mosaic_0001>

<bundles_post_ra>
// kernel: custom-call.42
= control target key start
LH: loop header
LB: loop body
LE: loop exit
PB: predicated region body
PF: predicated region fallthrough
CT: control target
= control target key end

     0   :  { %4 = vsyncpa [#allocation4], 0  ;;  %s880_s0 = inlined_call_operand.vmem [shape: f32[2,8,4], index: 0, kind: input, shape index: {}]   ;;  %s881_s1 = inlined_call_operand.vmem [shape: f32[2,8,4], index: 1, kind: output, shape index: {0}]   ;;  %s882_s2 = inlined_call_operand.hbm [shape: f32[2,4], index: 2, kind: output, shape index: {1}]  }
   0x1   :  { %6 = vsyncpa [#allocation4 + $0x1], 0  ;;  %s687_s9 = smov 0   ;;  %s689_s10 = smov 0  }
   0x2   :  { %s691_s11 = smov 0   ;;  %s693_s12 = smov 0  }
   0x3   :  { %s695_s13 = smov 0   ;;  %s697_s14 = smov 0  }
   0x4 LB: > { %s486_s15 = sadd.s32 4294967295, %s663_s14   ;;  %s487_s16 = sadd.s32 4294967294, %s663_s14   ;;  %s663_s14 = sphi %s697_s14, %s12_s14   ;;  %s659_s13 = sphi %s695_s13, %s893_s13   ;;  %s655_s12 = sphi %s693_s12, %s892_s12   ;;  %s651_s11 = sphi %s691_s11, %s891_s11   ;;  %s647_s10 = sphi %s689_s10, %s890_s10   ;;  %s643_s9 = sphi %s687_s9, %s889_s9  }
   0x5   : > { %s31_s17 = sadd.s32 1, %s659_s13  ;;  %s36_s18 = ssub.s32 0, %s659_s13 }
   0x6   : > { %p33_p0 = scmp.ge.s32.totalorder %s31_s17, 2  ;;  %s488_s19 = smin.u32 %s659_s13, %s36_s18 }
   0x7   : > { %s38_s20 = sshrl.u32 %s488_s19, 3  ;;  %p60_p1 = scmp.ne.s32.totalorder %s651_s11, %s647_s10 }
   0x8   : > { %s895_s17 = smov (%p33_p0, %s31_s17), 0  ;;  %p61_p2 = scmp.eq.s32.totalorder %s486_s15, 1 }
   0x9   : > { %s42_s21 = ssub.s32 0, %s895_s17  ;;  %p66_p3 = scmp.ne.s32.totalorder %s647_s10, %s643_s9 }
   0xa   : > { %s489_s22 = smin.u32 %s42_s21, %s895_s17  ;;  %p732_p4 = por %p61_p2, %p60_p1 }
   0xb   : > { %s44_s23 = sshrl.u32 %s489_s22, 3  ;;  %p67_p5 = scmp.eq.s32.totalorder %s487_s16, 1 }
   0xc   : > { %s47_s26 = ssub.s32 %s38_s20, %s44_s23  ;;  %s50_s27 = sadd.s32 1, %s651_s11 }
   0xd   : > { %p736_p6 = por %p67_p5, %p66_p3  ;;  %p48_p7 = scmp.eq.s32.totalorder %s47_s26, 0 }
   0xe   : > { %p883_p8 = scmp.ge.s32.totalorder %s663_s14, 2 }
   0xf   : > { %s742_s28 = scalar_select %p48_p7, %s651_s11, %s50_s27  }
  0x10   : > { %83 = sbr.rel (%p883_p8) target bundleno = 23 (0x17), region = 16  ;;  %s85_s29 = sand.u32 (!%p883_p8), 1, %s663_s14  }
  0x11   : > { %s493_s30 = sshll.u32 (!%p883_p8), %s659_s13, 3  ;;  %s492_s3 = sshll.u32 (!%p883_p8), %s85_s29, 3 }
  0x12   : > { %s91_s6 = scalar_lea.vmem (!%p883_p8), %s880_s0, %s493_s30  ;;  %s87_s7 = scalar_lea.vmem (!%p883_p8), [#allocation0], %s492_s3 }
  0x13   : > { %v119_v0 = vld [vmem:[%s91_s6] sm:$0xff] (!%p883_p8) }
  0x14   : > { %120 = vst [vmem:[%s87_s7] sm:$0xff] (!%p883_p8), %v119_v0 }
  0x17 PF: > { %p494_p9 = scmp.ge.s32.totalorder %s663_s14, 1  ;;  %p125_p10 = scmp.lt.s32.totalorder %s663_s14, 3 }
  0x19   : > { %p126_p11 = pnand %p494_p9, %p125_p10 }
  0x1b   : > { %129 = sbr.rel (%p126_p11) target bundleno = 343 (0x157), region = 54 }
  0x22   : > { %s132_s8 = sand.u32 1, %s486_s15   ;;  %s147_s16 = sand.u32 1, %s647_s10   ;;  %v669_v2 = vmov 0.0  }
  0x23   : > { %s495_s18 = sshll.u32 %s132_s8, 3  ;;  %s759_s19 = sshll.u32 %s147_s16, 1 }
  0x24   : > { %s156_s20 = sand.u32 7, %s655_s12   ;;  %s134_s21 = scalar_lea.vmem [#allocation0], %s495_s18 }
  0x25   : > { %v158_v1 = vld [vmem:[%s134_s21] sm:$0xff]  ;;  %s762_s22 = scalar_lea.vmem [#allocation1], %s495_s18  ;;  %s765_s23 = scalar_lea.vmem [#allocation2], %s156_s20 }
  0x26   : > { %159 = vst [vmem:[%s762_s22] sm:$0xff] %v158_v1  ;;  %160 = vst [vmem:[%s765_s23] sm:$0x1] %v669_v2  ;;  %s149_s26 = scalar_lea.vmem [#allocation3], %s759_s19  ;;  %s769_s15 = smov 0  }
  0x27 LB: >> { %v168_v3 = vlaneseq  ;;  %v778_v6 = vstv %s667_s15  ;;  %s195_s27 = scalar_lea.vmem %s762_s22, %s667_s15 [#allocation1]  ;;  %s253_s29 = scalar_lea.vmem [#allocation5], %s667_s15  ;;  %v670_v59 = vmov 1.0   ;;  %s667_s15 = sphi %s769_s15, %s166_s15  }
  0x28   : >> { %s270_s30 = smov [#allocation5] }
  0x29   : >> { %v775_v5 = vshrl.u32 %v168_v3, 7  ;;  %v247_v48 = vand.u32 127, %v168_v3 }
  0x2b   : >> { %vm172_vm0 = vcmp.gt.s32.totalorder %v775_v5, %v778_v6  ;;  %v234_v5 = vmov %v775_v5  ;;  %vm793_vm10 = vcmp.eq.s32.totalorder %v247_v48, %v778_v6  ;;  %vm299_vm13 = vcmp.gt.s32.totalorder %v247_v48, %v778_v6 }
  0x2c   : >> { %vm238_vm7 = vcmp.gt.s32.totalorder %v234_v5, %v778_v6  ;;  %vm239_vm8 = vcmp.lt.s32.totalorder %v234_v5, 8  ;;  %v273_v5 = vmov %v775_v5 }
  0x2d   : >> { %v167_v4 = vld [vmem:[%s762_s22] sm:$0xff]  ;;  %v196_v15 = vld [vmem:[%s195_s27] ss:$0 sm:$0xff]  ;;  %s231_s22 = smov %s762_s22  ;;  %vm240_vm9 = vmand %vm238_vm7, %vm239_vm8  ;;  %vm278_vm11 = vcmp.lt.s32.totalorder %v273_v5, 8  ;;  %v290_v5 = vmov %v775_v5 }
  0x2e   : >> { %v175_v7 = vsel %vm172_vm0, %v167_v4, 0.0  ;;  %v197_v16 = vand.u32 2147483647, %v196_v15  ;;  %vm222_vm6 = vcmp.lt.f32.partialorder %v196_v15, 0.0  ;;  %v235_v45 = vld [vmem:[%s231_s22] sm:$0xff]  ;;  %s269_s22 = smov %s762_s22  ;;  %vm307_vm12 = vcmp.ge.s32.totalorder %v290_v5, %v778_v6 }
  0x2f   : >> { %v176_v8 = vmul.f32 %v175_v7, %v175_v7  ;;  %v241_v49 = vsel %vm240_vm9, %v235_v45, 0.0  ;;  %v266_v60 = vld [vmem:[%s765_s23] ss:$0 sm:$0xff]  ;;  %vm308_vm14 = vmand %vm793_vm10, %vm307_vm12 }
  0x30   : >> { %v198_v21 = vmax.f32 %v197_v16, 0.0  ;;  %v276_v63 = vld [vmem:[%s269_s22] sm:$0xff]  ;;  %s286_s22 = smov %s269_s22 }
  0x31   : >> { %v177_v9 = vrot.slane %v176_v8, 4  ;;  %s311_s3 = scalar_lea.vmem %s286_s22, %s667_s15  ;;  %s166_s15 = sadd.s32 1, %s667_s15  }
  0x32   : >> { %p163_p12 = scmp.ge.s32.totalorder %s166_s15, 4  }
  0x33   : >> { %v178_v10 = vadd.f32 %v177_v9, %v176_v8  ;;  %s501_s4 = sshll.u32 (%p163_p12), %s655_s12, 3  ;;  %p373_p13 = scmp.lt.s32.totalorder (%p163_p12), %s655_s12, 0 }
  0x34   : > { %s337_s7 = scalar_lea.vmem (%p163_p12), %s881_s1, %s501_s4  ;;  %s374_s8 = ssub.s32 (%p163_p12), 0, %s655_s12 }
  0x35   : >> { %v179_v11 = vrot.slane %v178_v10, 2  ;;  %s502_s18 = smin.u32 (%p163_p12), %s655_s12, %s374_s8  ;;  %s385_s21 = sshll.u32 (%p163_p12), %s149_s26, 4  ;;  %s834_s21 = int_to_ptr.vmem [resolvable:$true] %s385_s21 }
  0x36   : > { %s376_s20 = sshrl.u32 (%p163_p12), %s502_s18, 3  ;;  %s671_s12 = smov (%p163_p12), [#allocation3]  }
  0x37   : >> { %v180_v12 = vadd.f32 %v179_v11, %v178_v10  ;;  %s585_s19 = sshll.u32 (%p163_p12), %s671_s12, 4  ;;  %s586_s19 = int_to_ptr.vmem [resolvable:$false] %s585_s19 }
  0x38   : > { %p588_p3 = scmp.lt.s32.totalorder (%p163_p12), %s834_s21, %s586_s19 }
  0x39   : >> { %v181_v13 = vrot.slane %v180_v12, 1 }
  0x3b   : >> { %v182_v14 = vadd.f32 %v181_v13, %v180_v12  ;;  %v297_v13 = vld [vmem:[%s286_s22] sm:$0xff] }
  0x3d   : >> { %571 = vrsqrt.f32 %v182_v14  ;;  %vm185_vm1 = vcmp.eq.f32.partialorder %v182_v14, inf  ;;  %v188_v18 = vand.u32 2147483648, %v182_v14  ;;  %vm187_vm2 = vcmp.eq.f32.partialorder %v182_v14, 0.0 }
  0x47   : >> { %v572_v17 = vpop.eup %571 }
  0x48   : >> { %v184_v19 = vmul.f32 %v572_v17, %v182_v14 }
  0x4a   : >> { %v186_v20 = vsel %vm185_vm1, %v182_v14, %v184_v19 }
  0x4b   : >> { %v189_v22 = vsel %vm187_vm2, %v188_v18, %v186_v20 }
  0x4c   : >> { %v199_v23 = vand.u32 2147483647, %v189_v22 }
  0x4e   : >> { %v200_v24 = vmax.f32 %v198_v21, %v199_v23 }
  0x50   : >> { %573 = vrcp.f32 %v200_v24  ;;  %vm212_vm5 = vcmp.eq.f32.partialorder %v200_v24, 0.0 }
  0x5a   : >> { %v574_v25 = vpop.eup %573 }
  0x5b   : >> { %v202_v26 = vmul.f32 %v574_v25, %v197_v16  ;;  %v205_v27 = vmul.f32 0.0, %v574_v25  ;;  %v209_v28 = vmul.f32 %v574_v25, %v199_v23 }
  0x5d   : >> { %v203_v29 = vmul.f32 %v202_v26, %v202_v26  ;;  %v206_v30 = vmul.f32 %v205_v27, %v205_v27  ;;  %v210_v31 = vmul.f32 %v209_v28, %v209_v28 }
  0x5f   : >> { %v207_v32 = vadd.f32 %v206_v30, %v203_v29 }
  0x61   : >> { %v211_v33 = vadd.f32 %v210_v31, %v207_v32 }
  0x63   : >> { %575 = vrsqrt.f32 %v211_v33  ;;  %vm215_vm3 = vcmp.eq.f32.partialorder %v211_v33, inf  ;;  %v218_v35 = vand.u32 2147483648, %v211_v33  ;;  %vm217_vm4 = vcmp.eq.f32.partialorder %v211_v33, 0.0 }
  0x6d   : >> { %v576_v34 = vpop.eup %575 }
  0x6e   : >> { %v214_v36 = vmul.f32 %v576_v34, %v211_v33 }
  0x70   : >> { %v216_v37 = vsel %vm215_vm3, %v211_v33, %v214_v36 }
  0x71   : >> { %v219_v38 = vsel %vm217_vm4, %v218_v35, %v216_v37 }
  0x72   : >> { %v220_v39 = vmul.f32 %v219_v38, %v200_v24 }
  0x74   : >> { %v221_v40 = vsel %vm212_vm5, 0.0, %v220_v39 }
  0x75   : >> { %v223_v41 = vxor.u32 2147483648, %v221_v40 }
  0x77   : >> { %v224_v42 = vsel %vm222_vm6, %v221_v40, %v223_v41 }
  0x78   : >> { %v786_v43 = vsel %vm187_vm2, %v196_v15, %v224_v42  ;;  %577 = vrcp.f32 %v224_v42  ;;  %v225_v46 = vsub.f32 %v224_v42, %v196_v15 }
  0x79   : >> { %v230_v44 = vsub.f32 %v196_v15, %v786_v43 }
  0x7b   : >> { %579 = vrcp.f32 %v230_v44 }
  0x82   : >> { %v578_v47 = vpop.eup %577 }
  0x83   : >> { %v227_v50 = vmul.f32 %v578_v47, %v225_v46 }
  0x85   : >> { %v580_v51 = vpop.eup %579  ;;  %v229_v55 = vsel %vm187_vm2, 0.0, %v227_v50 }
  0x86   : >> { %v243_v52 = vmul.f32 %v580_v51, %v241_v49  ;;  %v259_v57 = vsel %vm793_vm10, %v229_v55, 0.0 }
  0x88   : >> { %v244_v54 = vsel %vm187_vm2, 0.0, %v243_v52 }
  0x89   : >> { %v249_v56 = vsel %vm793_vm10, %v244_v54, 0.0 }
  0x8a   : >> { %250 = vadd.xlane.f32.xlu0 %v249_v56 }
  0x8e   : >> { %260 = vadd.xlane.f32.xlu0 %v259_v57 }
 0x117   : >> { %v251_v58 = vpop.xlane.xlu0 %250 }
 0x118   : >> { %252 = vst [vmem:[#allocation5] sm:$0xff] %v251_v58 }
 0x119   : >> { %254 = vst [vmem:[%s253_s29] sm:$0x1] %v670_v59 }
 0x11b   : >> { %v261_v61 = vpop.xlane.xlu0 %260 }
 0x11c   : >> { %v267_v62 = vsel %vm793_vm10, %v261_v61, %v266_v60 }
 0x11d   : >> { %268 = vst [vmem:[%s765_s23] sm:$0x1] %v267_v62  ;;  %s377_s23 = ssub.s32 (%p163_p12), 0, %s376_s20 }
 0x120   : >> { %v275_v0 = vld [vmem:[%s270_s30] sm:$0xff]  ;;  %s287_s30 = smov %s270_s30 }
 0x121   : >> { %v277_v1 = vmul.f32 %v276_v63, %v275_v0  ;;  %v295_v12 = vld [vmem:[%s287_s30] sm:$0xff]  ;;  %s330_s30 = scalar_lea.sflag (%p163_p12), [#allocation4], %s147_s16 }
 0x123   : >> { %v279_v2 = vsel %vm278_vm11, %v277_v1, 0.0 }
 0x124   : >> { %v280_v3 = vrot.slane %v279_v2, 4  ;;  %v322_v5 = vld [vmem:[#allocation2] sm:$0x3] (%p163_p12) }
 0x125   : > { %324 = vst [vmem:[%s149_s26] sm:$0x3] (%p163_p12), %v322_v5  ;;  %s587_s26 = scalar_lea.vmem (%p163_p12), %s586_s19, 64 }
 0x126   : >> { %v281_v4 = vadd.f32 %v280_v3, %v279_v2 }
 0x128   : >> { %v282_v7 = vrot.slane %v281_v4, 2 }
 0x12a   : >> { %v283_v8 = vadd.f32 %v282_v7, %v281_v4 }
 0x12c   : >> { %v284_v9 = vrot.slane %v283_v8, 1 }
 0x12e   : >> { %v285_v10 = vadd.f32 %v284_v9, %v283_v8 }
 0x130   : >> { %v291_v11 = vmul.f32 %v285_v10, %v261_v61 }
 0x132   : >> { %v296_v14 = vmul.f32 %v295_v12, %v291_v11 }
 0x134   : >> { %v300_v15 = vsub.f32 %v297_v13, %v296_v14 }
 0x136   : >> { %v301_v16 = vsel %vm299_vm13, %v300_v15, %v297_v13 }
 0x137   : >> { %v309_v17 = vsel %vm308_vm14, %v295_v12, %v301_v16 }
 0x138   : >> { %310 = vst [vmem:[%s286_s22] sm:$0xff] %v309_v17 }
 0x13b   : > { %165 = sbr.rel (!%p163_p12) target bundleno = 39 (0x27), region = 146 }
 0x13f   : >> { %v312_v18 = vld [vmem:[%s311_s3] ss:$0 sm:$0xff] }
 0x140   : >> { %v317_v19 = vsel %vm793_vm10, %v786_v43, %v312_v18 }
 0x141   : >> { %318 = vst [vmem:[%s311_s3] sm:$0x1] %v317_v19  ;;  %s581_s3 = scalar_lea.vmem (%p163_p12), %s834_s21, 32 }
 0x142   : > { %s897_s23 = smov (!%p373_p13, %s377_s23), %s376_s20  ;;  %p582_p0 = scmp.ne.s32.totalorder %s834_s21, %s581_s3 }
 0x143   : > { %p589_p5 = scmp.lt.s32.totalorder %s587_s26, %s581_s3 }
 0x144   : > { %p583_p1 = pnand %p582_p0, %p732_p4 }
 0x145   : > { %p590_p7 = por %p589_p5, %p588_p3 }
 0x146   : > { %p584_p2 = pneg %p583_p1 }
 0x148   : > { %v365_v6 = vld [vmem:[%s762_s22] sm:$0xff]  ;;  %s503_s22 = sshll.u32 %s897_s23, 5  ;;  %p591_p9 = pnand %p590_p7, %p584_p2 }
 0x149   : > { %366 = vst [vmem:[%s337_s7] sm:$0xff] %v365_v6  ;;  %s383_s29 = scalar_lea.hbm %s882_s2, %s503_s22 }
 0x14a   : > { %594 = shalt.err (!%p591_p9)
}
 0x14b   : > { %s595_s4 = scalar_lea.hbm %s383_s29, 32  ;;  %s599_s6 = scalar_lea.hbm %s882_s2, 32 }
 0x14c   : > { %p596_p10 = scmp.ne.s32.totalorder %s383_s29, %s595_s4  ;;  %p600_p13 = scmp.lt.u32.totalorder %s383_s29, %s882_s2 }
 0x14d   : > { %p601_p0 = scmp.lt.u32.totalorder %s599_s6, %s595_s4  ;;  %p603_p8 = scmp.lt.u32.totalorder %s595_s4, %s383_s29 }
 0x14e   : > { %p597_p11 = pnand %p596_p10, %p732_p4 }
 0x14f   : > { %p602_p1 = por %p601_p0, %p600_p13 }
 0x150   : > { %p598_p12 = pneg %p597_p11 }
 0x151   : > { %p604_p3 = por %p603_p8, %p602_p1 }
 0x153   : > { %p605_p2 = pnand %p604_p3, %p598_p12 }
 0x155   : > { %608 = shalt.err (!%p605_p2)
}
 0x156   : > { %506 = dma.vmem_to_hbm [thread:$0]  (%p732_p4), %s834_s21, 32, %s383_s29, %s330_s30  }
 0x157 PF: > { %s401_s18 = sand.u32 1, %s643_s9   ;;  %p888_p5 = scmp.ge.s32.totalorder %s663_s14, 2 }
 0x158   : > { %s402_s20 = scalar_lea.sflag [#allocation4], %s401_s18 }
 0x159   : > { %p509_p7 = pnand %p888_p5, %p736_p6 }
 0x15b   : > { %638 = dma.done.wait (!%p509_p7), %s402_s20, 32  }
 0x15c   : > { %640 = vsyncadd (!%p509_p7), %s402_s20, 4294967264  ;;  %s12_s14 = sadd.s32 1, %s663_s14   ;;  %s889_s9 = smov %s647_s10 }
 0x15d   : > { %p9_p8 = scmp.ge.s32.totalorder %s12_s14, 4   ;;  %s890_s10 = smov %s651_s11 }
 0x15e   : > { %s891_s11 = smov %s742_s28  ;;  %s892_s12 = smov %s659_s13 }
 0x15f   : > { %s893_s13 = smov %s895_s17  ;;  %11 = sbr.rel (!%p9_p8) target bundleno = 4 (0x4), region = 157 }
 0x166   :  { %407 = vsyncpa [#allocation4], 1 }
 0x167   :  { %409 = vsyncpa [#allocation4 + $0x1], 1 }

// kernel: custom-call.50
= control target key start
LH: loop header
LB: loop body
LE: loop exit
PB: predicated region body
PF: predicated region fallthrough
CT: control target
= control target key end

     0   :  { %s645_s9 = smov 0   ;;  %s647_s10 = smov 0   ;;  %s792_s0 = inlined_call_operand.vmem [shape: f32[2,8,4], index: 0, kind: input, shape index: {}]   ;;  %s793_s1 = inlined_call_operand.vmem [shape: f32[2,8,4], index: 1, kind: output, shape index: {0}]   ;;  %s794_s2 = inlined_call_operand.vmem [shape: f32[2,4], index: 2, kind: output, shape index: {1}]  }
   0x1   :  { %s649_s11 = smov 0   ;;  %s651_s12 = smov 0  }
   0x2   :  { %s653_s13 = smov 0  }
   0x3 LB: > { %s28_s14 = sadd.s32 1, %s618_s12  ;;  %s500_s15 = sadd.s32 4294967295, %s622_s13   ;;  %s622_s13 = sphi %s653_s13, %s9_s13   ;;  %s618_s12 = sphi %s651_s12, %s801_s12   ;;  %s614_s11 = sphi %s649_s11, %s800_s11   ;;  %s610_s10 = sphi %s647_s10, %s799_s10   ;;  %s606_s9 = sphi %s645_s9, %s798_s9  }
   0x4   : > { %p30_p0 = scmp.ge.s32.totalorder %s28_s14, 2  ;;  %s33_s16 = ssub.s32 0, %s618_s12 }
   0x5   : > { %s502_s17 = smin.u32 %s618_s12, %s33_s16  ;;  %p57_p1 = scmp.ne.s32.totalorder %s610_s10, %s606_s9 }
   0x6   : > { %s803_s14 = smov (%p30_p0, %s28_s14), 0  ;;  %s35_s18 = sshrl.u32 %s502_s17, 3 }
   0x7   : > { %s39_s19 = ssub.s32 0, %s803_s14  ;;  %p58_p2 = scmp.eq.s32.totalorder %s500_s15, 1 }
   0x8   : > { %s503_s20 = smin.u32 %s39_s19, %s803_s14  ;;  %s47_s24 = sadd.s32 1, %s610_s10 }
   0x9   : > { %s41_s21 = sshrl.u32 %s503_s20, 3  ;;  %p680_p3 = por %p58_p2, %p57_p1 }
   0xa   : > { %s44_s23 = ssub.s32 %s35_s18, %s41_s21  ;;  %p505_p5 = scmp.ge.s32.totalorder %s622_s13, 2 }
   0xb   : > { %p45_p4 = scmp.eq.s32.totalorder %s44_s23, 0  ;;  %s82_s26 = sand.u32 (!%p505_p5), 1, %s622_s13  }
   0xc   : > { %80 = sbr.rel (%p505_p5) target bundleno = 19 (0x13), region = 16  ;;  %s507_s27 = sshll.u32 (!%p505_p5), %s618_s12, 3 }
   0xd   : > { %s686_s25 = scalar_select %p45_p4, %s610_s10, %s47_s24  }
   0xe   : > { %s506_s28 = sshll.u32 (!%p505_p5), %s82_s26, 3  ;;  %s88_s3 = scalar_lea.vmem (!%p505_p5), %s792_s0, %s507_s27 }
   0xf   : > { %v116_v0 = vld [vmem:[%s88_s3] sm:$0xff] (!%p505_p5)  ;;  %s84_s4 = scalar_lea.vmem (!%p505_p5), [#allocation0], %s506_s28 }
  0x10   : > { %117 = vst [vmem:[%s84_s4] sm:$0xff] (!%p505_p5), %v116_v0 }
  0x13 PF: > { %p508_p6 = scmp.ge.s32.totalorder %s622_s13, 1  ;;  %p122_p7 = scmp.lt.s32.totalorder %s622_s13, 3 }
  0x15   : > { %p123_p8 = pnand %p508_p6, %p122_p7 }
  0x17   : > { %126 = sbr.rel (%p123_p8) target bundleno = 330 (0x14a), region = 54 }
  0x1e   : > { %s129_s5 = sand.u32 1, %s500_s15   ;;  %s143_s6 = sand.u32 1, %s606_s9   ;;  %v628_v2 = vmov 0.0  }
  0x1f   : > { %s509_s7 = sshll.u32 %s129_s5, 3  ;;  %s697_s8 = sshll.u32 %s143_s6, 1 }
  0x20   : > { %s152_s16 = sand.u32 7, %s614_s11   ;;  %s131_s17 = scalar_lea.vmem [#allocation0], %s509_s7 }
  0x21   : > { %v154_v1 = vld [vmem:[%s131_s17] sm:$0xff]  ;;  %s700_s18 = scalar_lea.vmem [#allocation1], %s509_s7  ;;  %s703_s19 = scalar_lea.vmem [#allocation2], %s152_s16 }
  0x22   : > { %155 = vst [vmem:[%s700_s18] sm:$0xff] %v154_v1  ;;  %156 = vst [vmem:[%s703_s19] sm:$0x1] %v628_v2  ;;  %s145_s15 = scalar_lea.vmem [#allocation3], %s697_s8  ;;  %s707_s20 = smov 0  }
  0x23 LB: >> { %v164_v3 = vlaneseq  ;;  %v716_v6 = vstv %s626_s20  ;;  %s191_s9 = scalar_lea.vmem %s700_s18, %s626_s20 [#allocation1]  ;;  %s249_s21 = scalar_lea.vmem [#allocation4], %s626_s20  ;;  %v629_v59 = vmov 1.0   ;;  %s626_s20 = sphi %s707_s20, %s162_s20  }
  0x24   : >> { %s266_s23 = smov [#allocation4] }
  0x25   : >> { %v713_v5 = vshrl.u32 %v164_v3, 7  ;;  %v243_v48 = vand.u32 127, %v164_v3 }
  0x27   : >> { %vm168_vm0 = vcmp.gt.s32.totalorder %v713_v5, %v716_v6  ;;  %v230_v5 = vmov %v713_v5  ;;  %vm731_vm10 = vcmp.eq.s32.totalorder %v243_v48, %v716_v6  ;;  %vm295_vm13 = vcmp.gt.s32.totalorder %v243_v48, %v716_v6 }
  0x28   : >> { %vm234_vm7 = vcmp.gt.s32.totalorder %v230_v5, %v716_v6  ;;  %vm235_vm8 = vcmp.lt.s32.totalorder %v230_v5, 8  ;;  %v269_v5 = vmov %v713_v5 }
  0x29   : >> { %v163_v4 = vld [vmem:[%s700_s18] sm:$0xff]  ;;  %v192_v15 = vld [vmem:[%s191_s9] ss:$0 sm:$0xff]  ;;  %s227_s18 = smov %s700_s18  ;;  %vm236_vm9 = vmand %vm234_vm7, %vm235_vm8  ;;  %vm274_vm11 = vcmp.lt.s32.totalorder %v269_v5, 8  ;;  %v286_v5 = vmov %v713_v5 }
  0x2a   : >> { %v171_v7 = vsel %vm168_vm0, %v163_v4, 0.0  ;;  %v193_v16 = vand.u32 2147483647, %v192_v15  ;;  %vm218_vm6 = vcmp.lt.f32.partialorder %v192_v15, 0.0  ;;  %v231_v45 = vld [vmem:[%s227_s18] sm:$0xff]  ;;  %s265_s18 = smov %s700_s18  ;;  %vm303_vm12 = vcmp.ge.s32.totalorder %v286_v5, %v716_v6 }
  0x2b   : >> { %v172_v8 = vmul.f32 %v171_v7, %v171_v7  ;;  %v237_v49 = vsel %vm236_vm9, %v231_v45, 0.0  ;;  %v262_v60 = vld [vmem:[%s703_s19] ss:$0 sm:$0xff]  ;;  %vm304_vm14 = vmand %vm731_vm10, %vm303_vm12 }
  0x2c   : >> { %v194_v21 = vmax.f32 %v193_v16, 0.0  ;;  %v272_v63 = vld [vmem:[%s265_s18] sm:$0xff]  ;;  %s282_s18 = smov %s265_s18 }
  0x2d   : >> { %v173_v9 = vrot.slane %v172_v8, 4  ;;  %s307_s24 = scalar_lea.vmem %s282_s18, %s626_s20  ;;  %s162_s20 = sadd.s32 1, %s626_s20  }
  0x2e   : >> { %p159_p9 = scmp.ge.s32.totalorder %s162_s20, 4  }
  0x2f   : >> { %v174_v10 = vadd.f32 %v173_v9, %v172_v8  ;;  %s515_s26 = sshll.u32 (%p159_p9), %s614_s11, 3 }
  0x30   : > { %s332_s29 = scalar_lea.vmem (%p159_p9), %s793_s1, %s515_s26 }
  0x31   : >> { %v175_v11 = vrot.slane %v174_v10, 2 }
  0x33   : >> { %v176_v12 = vadd.f32 %v175_v11, %v174_v10 }
  0x35   : >> { %v177_v13 = vrot.slane %v176_v12, 1 }
  0x37   : >> { %v178_v14 = vadd.f32 %v177_v13, %v176_v12  ;;  %v293_v13 = vld [vmem:[%s282_s18] sm:$0xff] }
  0x39   : >> { %570 = vrsqrt.f32 %v178_v14  ;;  %vm181_vm1 = vcmp.eq.f32.partialorder %v178_v14, inf  ;;  %v184_v18 = vand.u32 2147483648, %v178_v14  ;;  %vm183_vm2 = vcmp.eq.f32.partialorder %v178_v14, 0.0 }
  0x43   : >> { %v571_v17 = vpop.eup %570 }
  0x44   : >> { %v180_v19 = vmul.f32 %v571_v17, %v178_v14 }
  0x46   : >> { %v182_v20 = vsel %vm181_vm1, %v178_v14, %v180_v19 }
  0x47   : >> { %v185_v22 = vsel %vm183_vm2, %v184_v18, %v182_v20 }
  0x48   : >> { %v195_v23 = vand.u32 2147483647, %v185_v22 }
  0x4a   : >> { %v196_v24 = vmax.f32 %v194_v21, %v195_v23 }
  0x4c   : >> { %572 = vrcp.f32 %v196_v24  ;;  %vm208_vm5 = vcmp.eq.f32.partialorder %v196_v24, 0.0 }
  0x56   : >> { %v573_v25 = vpop.eup %572 }
  0x57   : >> { %v198_v26 = vmul.f32 %v573_v25, %v193_v16  ;;  %v201_v27 = vmul.f32 0.0, %v573_v25  ;;  %v205_v28 = vmul.f32 %v573_v25, %v195_v23 }
  0x59   : >> { %v199_v29 = vmul.f32 %v198_v26, %v198_v26  ;;  %v202_v30 = vmul.f32 %v201_v27, %v201_v27  ;;  %v206_v31 = vmul.f32 %v205_v28, %v205_v28 }
  0x5b   : >> { %v203_v32 = vadd.f32 %v202_v30, %v199_v29 }
  0x5d   : >> { %v207_v33 = vadd.f32 %v206_v31, %v203_v32 }
  0x5f   : >> { %574 = vrsqrt.f32 %v207_v33  ;;  %vm211_vm3 = vcmp.eq.f32.partialorder %v207_v33, inf  ;;  %v214_v35 = vand.u32 2147483648, %v207_v33  ;;  %vm213_vm4 = vcmp.eq.f32.partialorder %v207_v33, 0.0 }
  0x69   : >> { %v575_v34 = vpop.eup %574 }
  0x6a   : >> { %v210_v36 = vmul.f32 %v575_v34, %v207_v33 }
  0x6c   : >> { %v212_v37 = vsel %vm211_vm3, %v207_v33, %v210_v36 }
  0x6d   : >> { %v215_v38 = vsel %vm213_vm4, %v214_v35, %v212_v37 }
  0x6e   : >> { %v216_v39 = vmul.f32 %v215_v38, %v196_v24 }
  0x70   : >> { %v217_v40 = vsel %vm208_vm5, 0.0, %v216_v39 }
  0x71   : >> { %v219_v41 = vxor.u32 2147483648, %v217_v40 }
  0x73   : >> { %v220_v42 = vsel %vm218_vm6, %v217_v40, %v219_v41 }
  0x74   : >> { %v724_v43 = vsel %vm183_vm2, %v192_v15, %v220_v42  ;;  %576 = vrcp.f32 %v220_v42  ;;  %v221_v46 = vsub.f32 %v220_v42, %v192_v15 }
  0x75   : >> { %v226_v44 = vsub.f32 %v192_v15, %v724_v43 }
  0x77   : >> { %578 = vrcp.f32 %v226_v44 }
  0x7e   : >> { %v577_v47 = vpop.eup %576 }
  0x7f   : >> { %v223_v50 = vmul.f32 %v577_v47, %v221_v46 }
  0x81   : >> { %v579_v51 = vpop.eup %578  ;;  %v225_v55 = vsel %vm183_vm2, 0.0, %v223_v50 }
  0x82   : >> { %v239_v52 = vmul.f32 %v579_v51, %v237_v49  ;;  %v255_v57 = vsel %vm731_vm10, %v225_v55, 0.0 }
  0x84   : >> { %v240_v54 = vsel %vm183_vm2, 0.0, %v239_v52 }
  0x85   : >> { %v245_v56 = vsel %vm731_vm10, %v240_v54, 0.0 }
  0x86   : >> { %246 = vadd.xlane.f32.xlu0 %v245_v56 }
  0x8a   : >> { %256 = vadd.xlane.f32.xlu0 %v255_v57 }
 0x113   : >> { %v247_v58 = vpop.xlane.xlu0 %246 }
 0x114   : >> { %248 = vst [vmem:[#allocation4] sm:$0xff] %v247_v58 }
 0x115   : >> { %250 = vst [vmem:[%s249_s21] sm:$0x1] %v629_v59 }
 0x117   : >> { %v257_v61 = vpop.xlane.xlu0 %256 }
 0x118   : >> { %v263_v62 = vsel %vm731_vm10, %v257_v61, %v262_v60 }
 0x119   : >> { %264 = vst [vmem:[%s703_s19] sm:$0x1] %v263_v62 }
 0x11c   : >> { %v271_v0 = vld [vmem:[%s266_s23] sm:$0xff]  ;;  %s283_s23 = smov %s266_s23 }
 0x11d   : >> { %v273_v1 = vmul.f32 %v272_v63, %v271_v0  ;;  %v291_v12 = vld [vmem:[%s283_s23] sm:$0xff] }
 0x11f   : >> { %v275_v2 = vsel %vm274_vm11, %v273_v1, 0.0 }
 0x120   : >> { %v276_v3 = vrot.slane %v275_v2, 4  ;;  %v318_v5 = vld [vmem:[#allocation2] sm:$0x3] (%p159_p9) }
 0x121   : > { %320 = vst [vmem:[%s145_s15] sm:$0x3] (%p159_p9), %v318_v5 }
 0x122   : >> { %v277_v4 = vadd.f32 %v276_v3, %v275_v2 }
 0x124   : >> { %v278_v7 = vrot.slane %v277_v4, 2 }
 0x126   : >> { %v279_v8 = vadd.f32 %v278_v7, %v277_v4 }
 0x128   : >> { %v280_v9 = vrot.slane %v279_v8, 1 }
 0x12a   : >> { %v281_v10 = vadd.f32 %v280_v9, %v279_v8 }
 0x12c   : >> { %v287_v11 = vmul.f32 %v281_v10, %v257_v61 }
 0x12e   : >> { %v292_v14 = vmul.f32 %v291_v12, %v287_v11 }
 0x130   : >> { %v296_v15 = vsub.f32 %v293_v13, %v292_v14 }
 0x132   : >> { %v297_v16 = vsel %vm295_vm13, %v296_v15, %v293_v13 }
 0x133   : >> { %v305_v17 = vsel %vm304_vm14, %v291_v12, %v297_v16 }
 0x134   : >> { %306 = vst [vmem:[%s282_s18] sm:$0xff] %v305_v17 }
 0x137   : > { %161 = sbr.rel (!%p159_p9) target bundleno = 35 (0x23), region = 175 }
 0x13b   : >> { %v308_v18 = vld [vmem:[%s307_s24] ss:$0 sm:$0xff] }
 0x13c   : >> { %v313_v19 = vsel %vm731_vm10, %v724_v43, %v308_v18 }
 0x13d   : >> { %314 = vst [vmem:[%s307_s24] sm:$0x1] %v313_v19 }
 0x13e   : > { %p368_p10 = scmp.lt.s32.totalorder (%p680_p3), %s614_s11, 0  ;;  %s369_s30 = ssub.s32 (%p680_p3), 0, %s614_s11  ;;  %v391_v20 = vld [vmem:[%s145_s15] sm:$0x3] (%p680_p3) }
 0x13f   : > { %367 = sbr.rel (!%p680_p3) target bundleno = 330 (0x14a), region = 99  ;;  %s516_s3 = smin.u32 (%p680_p3), %s614_s11, %s369_s30 }
 0x140   : > { %s371_s4 = sshrl.u32 (%p680_p3), %s516_s3, 3 }
 0x141   : > { %s372_s5 = ssub.s32 (%p680_p3), 0, %s371_s4 }
 0x144   : > { %v360_v6 = vld [vmem:[%s700_s18] sm:$0xff] }
 0x145   : > { %361 = vst [vmem:[%s332_s29] sm:$0xff] %v360_v6 }
 0x146   : > { %s805_s5 = smov (!%p368_p10, %s372_s5), %s371_s4 }
 0x147   : > { %s517_s6 = sshll.u32 %s805_s5, 1 }
 0x148   : > { %s375_s17 = scalar_lea.vmem %s794_s2, %s517_s6 }
 0x149   : > { %392 = vst [vmem:[%s375_s17] sm:$0x3] %v391_v20 }
 0x14a PF: > { %s9_s13 = sadd.s32 1, %s622_s13   ;;  %s798_s9 = smov %s610_s10 }
 0x14b   : > { %p6_p11 = scmp.ge.s32.totalorder %s9_s13, 4   ;;  %s799_s10 = smov %s686_s25 }
 0x14c   : > { %s800_s11 = smov %s618_s12  ;;  %s801_s12 = smov %s803_s14 }
 0x14d   :  { %8 = sbr.rel (!%p6_p11) target bundleno = 3 (0x3), region = 186 }

// kernel: custom-call.51
= control target key start
LH: loop header
LB: loop body
LE: loop exit
PB: predicated region body
PF: predicated region fallthrough
CT: control target
= control target key end

     0   :  { %s247_s6 = smov 0   ;;  %s281_s0 = inlined_call_operand.vmem [shape: f32[2,4,4], index: 0, kind: input, shape index: {}]   ;;  %s282_s1 = inlined_call_operand.vmem [shape: f32[2,4,4], index: 1, kind: output, shape index: {}]  }
   0x1 LB: > { %s209_s7 = sadd.s32 4294967295, %s235_s6   ;;  %p211_p0 = scmp.ge.s32.totalorder %s235_s6, 2  ;;  %s235_s6 = sphi %s247_s6, %s7_s6  }
   0x2   : > { %s23_s8 = sand.u32 (!%p211_p0), 1, %s235_s6   ;;  %s213_s9 = sshll.u32 (!%p211_p0), %s235_s6, 2 }
   0x3   : > { %21 = sbr.rel (%p211_p0) target bundleno = 10 (0xa), region = 16  ;;  %s212_s10 = sshll.u32 (!%p211_p0), %s23_s8, 2 }
   0x4   : > { %s27_s13 = scalar_lea.vmem (!%p211_p0), %s281_s0, %s213_s9  ;;  %s25_s14 = scalar_lea.vmem (!%p211_p0), [#allocation1], %s212_s10 }
   0x5   : > { %v43_v0 = vld [vmem:[%s27_s13] sm:$0xf] (!%p211_p0) }
   0x6   : > { %44 = vst [vmem:[%s25_s14] sm:$0xf] (!%p211_p0), %v43_v0 }
   0xa PF: > { %p214_p1 = scmp.ge.s32.totalorder %s235_s6, 1  ;;  %p60_p2 = scmp.lt.s32.totalorder %s235_s6, 3 }
   0xc   : > { %p61_p3 = pnand %p214_p1, %p60_p2 }
   0xd   : > { %s263_s15 = sand.u32 (!%p61_p3), 1, %s209_s7   ;;  %v82_v1 = vlaneseq (!%p61_p3)  ;;  %vm96_vm1 = vcmask (!%p61_p3), 31744   ;;  %s218_s19 = sshll.u32 (!%p61_p3), %s209_s7, 2 }
   0xe   : > { %64 = sbr.rel (%p61_p3) target bundleno = 479 (0x1df), region = 50  ;;  %s215_s16 = sshll.u32 (!%p61_p3), %s263_s15, 2 }
   0xf   : > { %s73_s17 = scalar_lea.vmem (!%p61_p3), [#allocation1], %s215_s16  ;;  %v83_v3 = vand.u32 (!%p61_p3), 127, %v82_v1  ;;  %v85_v4 = vshrl.u32 (!%p61_p3), %v82_v1, 7  ;;  %s77_s18 = scalar_lea.vmem (!%p61_p3), [#allocation3], %s215_s16 }
  0x10   : > { %v80_v2 = vld [vmem:[%s73_s17] sm:$0xf] (!%p61_p3)  ;;  %s139_s22 = scalar_lea.vmem (!%p61_p3), %s282_s1, %s218_s19 }
  0x11   : > { %81 = vst [vmem:[#allocation0] sm:$0xf] (!%p61_p3), %v80_v2  ;;  %vm91_vm0 = vcmp.eq.s32.totalorder (!%p61_p3), %v83_v3, 0  ;;  %vm87_vm2 = vcmp.eq.s32.totalorder (!%p61_p3), %v83_v3, %v85_v4  ;;  %vm100_vm3 = vcmp.eq.s32.totalorder (!%p61_p3), %v83_v3, 1  ;;  %vm111_vm4 = vcmp.eq.s32.totalorder (!%p61_p3), %v83_v3, 2 }
  0x12   : > { %vm122_vm5 = vcmp.eq.s32.totalorder (!%p61_p3), %v83_v3, 3 }
  0x18   : > { %v88_v5 = vld [vmem:[#allocation0] sm:$0xff] }
  0x19   : > { %v95_v6 = vld [vmem:[#allocation0 + $0x1] ss:$0 sm:$0xff]  ;;  %v92_v7 = vsel %vm91_vm0, %v88_v5, 1.0  ;;  %v106_v11 = vld [vmem:[#allocation0 + $0x2] ss:$0 sm:$0xff] }
  0x1a   : > { %v97_v8 = vsel %vm96_vm1, %v95_v6, 0.0  ;;  %v93_v9 = vsel %vm87_vm2, %v92_v7, 0.0  ;;  %v108_v12 = vsel %vm96_vm1, %v106_v11, 0.0  ;;  %v117_v16 = vld [vmem:[#allocation0 + $0x3] ss:$0 sm:$0xff] }
  0x1b   : > { %v101_v10 = vmul.f32 %v97_v8, %v93_v9  ;;  %v119_v17 = vsel %vm96_vm1, %v117_v16, 0.0 }
  0x1d   : > { %102 = vadd.xlane.f32.xlu0 %v101_v10 }
  0xaa   : > { %v103_v13 = vpop.xlane.xlu0 %102 }
  0xab   : > { %v104_v14 = vsel %vm100_vm3, %v103_v13, %v93_v9 }
  0xac   : > { %v112_v15 = vmul.f32 %v108_v12, %v104_v14 }
  0xae   : > { %113 = vadd.xlane.f32.xlu0 %v112_v15 }
 0x13b   : > { %v114_v18 = vpop.xlane.xlu0 %113 }
 0x13c   : > { %v115_v19 = vsel %vm111_vm4, %v114_v18, %v104_v14 }
 0x13d   : > { %v123_v20 = vmul.f32 %v119_v17, %v115_v19 }
 0x13f   : > { %124 = vadd.xlane.f32.xlu1 %v123_v20 }
 0x1cc   : > { %v125_v21 = vpop.xlane.xlu1 %124 }
 0x1cd   : > { %v126_v22 = vsel %vm122_vm5, %v125_v21, %v115_v19 }
 0x1ce   : > { %127 = vst [vmem:[#allocation2] sm:$0xff] %v126_v22 }
 0x1d5   : > { %v131_v23 = vld [vmem:[#allocation2] sm:$0xf] }
 0x1d6   : > { %133 = vst [vmem:[%s77_s18] sm:$0xf] %v131_v23 }
 0x1dd   : > { %v155_v24 = vld [vmem:[%s77_s18] sm:$0xf] }
 0x1de   : > { %156 = vst [vmem:[%s139_s22] sm:$0xf] %v155_v24 }
 0x1df PF: > { %s7_s6 = sadd.s32 1, %s235_s6  }
 0x1e0   : > { %p4_p4 = scmp.ge.s32.totalorder %s7_s6, 4  }
 0x1e2   :  { %6 = sbr.rel (!%p4_p4) target bundleno = 1 (0x1), region = 113 }

// kernel: custom-call.43
= control target key start
LH: loop header
LB: loop body
LE: loop exit
PB: predicated region body
PF: predicated region fallthrough
CT: control target
= control target key end

     0   :  { %s6_s0 = inlined_call_operand.hbm [shape: pred[2], index: 0, kind: output, shape index: {}]  }

// kernel: custom-call.48
= control target key start
LH: loop header
LB: loop body
LE: loop exit
PB: predicated region body
PF: predicated region fallthrough
CT: control target
= control target key end

     0   :  { %s367_s6 = smov 0   ;;  %s369_s7 = smov 0   ;;  %s414_s0 = inlined_call_operand.vmem [shape: f32[2,4,4], index: 0, kind: input, shape index: {}]   ;;  %s415_s1 = inlined_call_operand.vmem [shape: f32[2,4,4], index: 1, kind: output, shape index: {}]  }
   0x1   :  { %s371_s8 = smov 0  }
   0x2 LB: > { %s287_s9 = sadd.s32 4294967295, %s354_s8   ;;  %s26_s10 = sadd.s32 1, %s350_s7  ;;  %s354_s8 = sphi %s371_s8, %s7_s8   ;;  %s350_s7 = sphi %s369_s7, %s417_s7   ;;  %s346_s6 = sphi %s367_s6, %s416_s6  }
   0x3   : > { %p28_p0 = scmp.ge.s32.totalorder %s26_s10, 2  ;;  %p289_p1 = scmp.ge.s32.totalorder %s354_s8, 2 }
   0x4   : > { %s42_s11 = sand.u32 (!%p289_p1), 1, %s354_s8   ;;  %s291_s12 = sshll.u32 (!%p289_p1), %s350_s7, 2 }
   0x5   : > { %s419_s10 = smov (%p28_p0, %s26_s10), 0  ;;  %40 = sbr.rel (%p289_p1) target bundleno = 12 (0xc), region = 16 }
   0x6   : > { %s290_s13 = sshll.u32 (!%p289_p1), %s42_s11, 2  ;;  %s48_s16 = scalar_lea.vmem (!%p289_p1), %s414_s0, %s291_s12 }
   0x7   : > { %v64_v0 = vld [vmem:[%s48_s16] sm:$0xf] (!%p289_p1)  ;;  %s44_s17 = scalar_lea.vmem (!%p289_p1), [#allocation1], %s290_s13 }
   0x8   : > { %65 = vst [vmem:[%s44_s17] sm:$0xf] (!%p289_p1), %v64_v0 }
   0xc PF: > { %p292_p2 = scmp.ge.s32.totalorder %s354_s8, 1  ;;  %p81_p3 = scmp.lt.s32.totalorder %s354_s8, 3 }
   0xe   : > { %p82_p4 = pnand %p292_p2, %p81_p3 }
   0xf   : > { %v356_v1 = vmov (!%p82_p4), 0.0   ;;  %s394_s18 = sand.u32 (!%p82_p4), 1, %s287_s9   ;;  %vm104_vm0 = vcmask (!%p82_p4), 7168   ;;  %vm122_vm1 = vcmask (!%p82_p4), 15368   ;;  %vm139_vm2 = vcmask (!%p82_p4), 1047553   ;;  %s296_s22 = sshll.u32 (!%p82_p4), %s346_s6, 2 }
  0x10   : > { %85 = sbr.rel (%p82_p4) target bundleno = 711 (0x2c7), region = 50  ;;  %103 = vst [vmem:[#allocation2] sm:$0xff] (!%p82_p4), %v356_v1  ;;  %s293_s19 = sshll.u32 (!%p82_p4), %s394_s18, 2  ;;  %vm140_vm3 = vmand (!%p82_p4), %vm122_vm1, %vm139_vm2  ;;  %vm144_vm4 = vcmask (!%p82_p4), 23568   ;;  %vm161_vm5 = vcmask (!%p82_p4), 1047554   ;;  %vm166_vm7 = vcmask (!%p82_p4), 31768  }
  0x11   : > { %s94_s20 = scalar_lea.vmem (!%p82_p4), [#allocation1], %s293_s19  ;;  %vm162_vm6 = vmand (!%p82_p4), %vm144_vm4, %vm161_vm5  ;;  %vm183_vm8 = vcmask (!%p82_p4), 1047555   ;;  %s98_s21 = scalar_lea.vmem (!%p82_p4), [#allocation3], %s293_s19 }
  0x12   : > { %v101_v5 = vld [vmem:[%s94_s20] sm:$0xf] (!%p82_p4)  ;;  %vm184_vm9 = vmand (!%p82_p4), %vm166_vm7, %vm183_vm8  ;;  %s201_s25 = scalar_lea.vmem (!%p82_p4), %s415_s1, %s296_s22 }
  0x13   : > { %102 = vst [vmem:[#allocation0] sm:$0xf] (!%p82_p4), %v101_v5 }
  0x17   : > { %v105_v2 = vld [vmem:[#allocation2] ss:$0 sm:$0xff] }
  0x18   : > { %v107_v3 = vmul.f32 %v105_v2, %v105_v2  ;;  %v114_v4 = vmul.f32 0.0, %v105_v2 }
  0x1a   : > { %108 = vadd.xlane.f32.xlu0 %v107_v3  ;;  %v106_v6 = vld [vmem:[#allocation0] ss:$0 sm:$0xff]  ;;  %v126_v18 = vld [vmem:[#allocation0 + $0x1] ss:$0 sm:$0xff]  ;;  %v148_v30 = vld [vmem:[#allocation0 + $0x2] ss:$0 sm:$0xff] }
  0x1b   : > { %v112_v10 = vld [vmem:[#allocation0] sm:$0xff] }
  0x1c   : > { %v170_v42 = vld [vmem:[#allocation0 + $0x3] ss:$0 sm:$0xff] }
  0x1e   : > { %115 = vadd.xlane.f32.xlu0 %v114_v4 }
  0xa7   : > { %v109_v7 = vpop.xlane.xlu0 %108 }
  0xa8   : > { %v110_v8 = vsub.f32 %v106_v6, %v109_v7 }
  0xaa   : > { %324 = vrsqrt.f32 %v110_v8 }
  0xab   : > { %v116_v9 = vpop.xlane.xlu0 %115 }
  0xac   : > { %v117_v11 = vsub.f32 %v112_v10, %v116_v9 }
  0xb4   : > { %v325_v12 = vpop.eup %324 }
  0xb5   : > { %v118_v13 = vmul.f32 %v325_v12, %v117_v11 }
  0xb7   : > { %v119_v14 = vsel %vm104_vm0, %v118_v13, 0.0 }
  0xb8   : > { %121 = vst [vmem:[#allocation2] sm:$0xff] %v119_v14 }
  0xbf   : > { %v124_v15 = vld [vmem:[#allocation2 + $0x1] ss:$0 sm:$0xff] }
  0xc0   : > { %v127_v16 = vmul.f32 %v124_v15, %v124_v15  ;;  %v134_v17 = vmul.f32 %v124_v15, %v119_v14 }
  0xc2   : > { %128 = vadd.xlane.f32.xlu1 %v127_v16 }
  0xc6   : > { %135 = vadd.xlane.f32.xlu1 %v134_v17 }
 0x14f   : > { %v129_v19 = vpop.xlane.xlu1 %128 }
 0x150   : > { %v130_v20 = vsub.f32 %v126_v18, %v129_v19 }
 0x152   : > { %326 = vrsqrt.f32 %v130_v20 }
 0x153   : > { %v136_v21 = vpop.xlane.xlu1 %135 }
 0x154   : > { %v137_v22 = vsub.f32 %v112_v10, %v136_v21 }
 0x15c   : > { %v327_v23 = vpop.eup %326 }
 0x15d   : > { %v138_v24 = vmul.f32 %v327_v23, %v137_v22 }
 0x15f   : > { %v141_v25 = vsel %vm140_vm3, %v138_v24, 0.0 }
 0x160   : > { %v142_v26 = vadd.f32 %v141_v25, %v119_v14 }
 0x162   : > { %143 = vst [vmem:[#allocation2] sm:$0xff] %v142_v26 }
 0x169   : > { %v146_v27 = vld [vmem:[#allocation2 + $0x2] ss:$0 sm:$0xff] }
 0x16a   : > { %v156_v28 = vmul.f32 %v146_v27, %v142_v26  ;;  %v149_v29 = vmul.f32 %v146_v27, %v146_v27 }
 0x16c   : > { %157 = vadd.xlane.f32.xlu1 %v156_v28  ;;  %150 = vadd.xlane.f32.xlu0 %v149_v29 }
 0x1f9   : > { %v151_v31 = vpop.xlane.xlu0 %150  ;;  %v158_v33 = vpop.xlane.xlu1 %157 }
 0x1fa   : > { %v152_v32 = vsub.f32 %v148_v30, %v151_v31  ;;  %v159_v34 = vsub.f32 %v112_v10, %v158_v33 }
 0x1fc   : > { %328 = vrsqrt.f32 %v152_v32 }
 0x206   : > { %v329_v35 = vpop.eup %328 }
 0x207   : > { %v160_v36 = vmul.f32 %v329_v35, %v159_v34 }
 0x209   : > { %v163_v37 = vsel %vm162_vm6, %v160_v36, 0.0 }
 0x20a   : > { %v164_v38 = vadd.f32 %v163_v37, %v142_v26 }
 0x20c   : > { %165 = vst [vmem:[#allocation2] sm:$0xff] %v164_v38 }
 0x213   : > { %v168_v39 = vld [vmem:[#allocation2 + $0x3] ss:$0 sm:$0xff] }
 0x214   : > { %v178_v40 = vmul.f32 %v168_v39, %v164_v38  ;;  %v171_v41 = vmul.f32 %v168_v39, %v168_v39 }
 0x216   : > { %179 = vadd.xlane.f32.xlu1 %v178_v40  ;;  %172 = vadd.xlane.f32.xlu0 %v171_v41 }
 0x2a3   : > { %v173_v43 = vpop.xlane.xlu0 %172  ;;  %v180_v45 = vpop.xlane.xlu1 %179 }
 0x2a4   : > { %v174_v44 = vsub.f32 %v170_v42, %v173_v43  ;;  %v181_v46 = vsub.f32 %v112_v10, %v180_v45 }
 0x2a6   : > { %330 = vrsqrt.f32 %v174_v44 }
 0x2b0   : > { %v331_v47 = vpop.eup %330 }
 0x2b1   : > { %v182_v48 = vmul.f32 %v331_v47, %v181_v46 }
 0x2b3   : > { %v185_v49 = vsel %vm184_vm9, %v182_v48, 0.0 }
 0x2b4   : > { %v186_v50 = vadd.f32 %v185_v49, %v164_v38 }
 0x2b6   : > { %187 = vst [vmem:[#allocation2] sm:$0xff] %v186_v50 }
 0x2bd   : > { %v191_v51 = vld [vmem:[#allocation2] sm:$0xf] }
 0x2be   : > { %193 = vst [vmem:[%s98_s21] sm:$0xf] %v191_v51 }
 0x2c5   : > { %v217_v52 = vld [vmem:[%s98_s21] sm:$0xf] }
 0x2c6   : > { %218 = vst [vmem:[%s201_s25] sm:$0xf] %v217_v52 }
 0x2c7 PF: > { %s7_s8 = sadd.s32 1, %s354_s8   ;;  %s416_s6 = smov %s350_s7 }
 0x2c8   : > { %p4_p5 = scmp.ge.s32.totalorder %s7_s8, 4   ;;  %s417_s7 = smov %s419_s10 }
 0x2ca   :  { %6 = sbr.rel (!%p4_p5) target bundleno = 2 (0x2), region = 116 }

// kernel: custom-call.49
= control target key start
LH: loop header
LB: loop body
LE: loop exit
PB: predicated region body
PF: predicated region fallthrough
CT: control target
= control target key end

     0   :  { %s353_s6 = smov 0   ;;  %s355_s7 = smov 0   ;;  %s400_s0 = inlined_call_operand.vmem [shape: f32[2,1,4,4], index: 0, kind: input, shape index: {}]   ;;  %s401_s1 = inlined_call_operand.vmem [shape: f32[2,1,4,4], index: 1, kind: output, shape index: {}]  }
   0x1   :  { %s357_s8 = smov 0  }
   0x2 LB: > { %s279_s9 = sadd.s32 4294967295, %s340_s8   ;;  %s33_s10 = sadd.s32 1, %s336_s7  ;;  %s340_s8 = sphi %s357_s8, %s7_s8   ;;  %s336_s7 = sphi %s355_s7, %s403_s7   ;;  %s332_s6 = sphi %s353_s6, %s402_s6  }
   0x3   : > { %p35_p0 = scmp.ge.s32.totalorder %s33_s10, 2  ;;  %p281_p1 = scmp.ge.s32.totalorder %s340_s8, 2 }
   0x4   : > { %s49_s11 = sand.u32 (!%p281_p1), 1, %s340_s8   ;;  %s283_s12 = sshll.u32 (!%p281_p1), %s336_s7, 2 }
   0x5   : > { %s405_s10 = smov (%p35_p0, %s33_s10), 0  ;;  %47 = sbr.rel (%p281_p1) target bundleno = 12 (0xc), region = 16 }
   0x6   : > { %s282_s13 = sshll.u32 (!%p281_p1), %s49_s11, 2  ;;  %s56_s16 = scalar_lea.vmem (!%p281_p1), %s400_s0, %s283_s12 }
   0x7   : > { %v72_v0 = vld [vmem:[%s56_s16] sm:$0xf] (!%p281_p1)  ;;  %s51_s17 = scalar_lea.vmem (!%p281_p1), [#allocation1], %s282_s13 }
   0x8   : > { %73 = vst [vmem:[%s51_s17] sm:$0xf] (!%p281_p1), %v72_v0 }
   0xc PF: > { %p284_p2 = scmp.ge.s32.totalorder %s340_s8, 1  ;;  %p89_p3 = scmp.lt.s32.totalorder %s340_s8, 3 }
   0xe   : > { %p90_p4 = pnand %p284_p2, %p89_p3 }
  0x10   : > { %93 = sbr.rel (%p90_p4) target bundleno = 656 (0x290), region = 50 }
  0x17   : > { %s380_s18 = sand.u32 1, %s279_s9   ;;  %v111_v1 = vlaneseq  ;;  %v342_v11 = vmov -1.0   ;;  %s288_s22 = sshll.u32 %s332_s6, 2 }
  0x18   : > { %s285_s19 = sshll.u32 %s380_s18, 2  ;;  %s188_s25 = scalar_lea.vmem %s401_s1, %s288_s22 }
  0x19   : > { %s102_s20 = scalar_lea.vmem [#allocation1], %s285_s19  ;;  %v112_v3 = vand.u32 127, %v111_v1  ;;  %v115_v4 = vshrl.u32 %v111_v1, 7  ;;  %s106_s21 = scalar_lea.vmem [#allocation3], %s285_s19 }
  0x1a   : > { %v109_v2 = vld [vmem:[%s102_s20] sm:$0xf] }
  0x1b   : > { %110 = vst [vmem:[#allocation0] sm:$0xf] %v109_v2  ;;  %vm113_vm0 = vcmp.lt.s32.totalorder %v112_v3, 4  ;;  %vm122_vm1 = vcmp.ge.s32.totalorder %v115_v4, %v112_v3  ;;  %vm117_vm2 = vcmp.eq.s32.totalorder %v115_v4, %v112_v3  ;;  %vm136_vm4 = vcmp.eq.s32.totalorder %v112_v3, 0 }
  0x1c   : > { %vm123_vm3 = vmand %vm122_vm1, %vm113_vm0  ;;  %vm133_vm5 = vcmp.eq.s32.totalorder %v112_v3, %v115_v4  ;;  %v137_v12 = vsel %vm136_vm4, 1.0, %v342_v11  ;;  %vm144_vm6 = vcmp.eq.s32.totalorder %v112_v3, 1  ;;  %vm154_vm7 = vcmp.eq.s32.totalorder %v112_v3, 2 }
  0x1d   : > { %v138_v13 = vsel %vm133_vm5, %v137_v12, 0.0  ;;  %vm164_vm8 = vcmp.eq.s32.totalorder %v112_v3, 3 }
  0x22   : > { %v118_v5 = vld [vmem:[#allocation0] sm:$0xff] }
  0x23   : > { %v119_v6 = vsel %vm117_vm2, %v118_v5, 0.0  ;;  %v124_v7 = vsel %vm123_vm3, %v118_v5, 0.0 }
  0x24   : > { %120 = vadd.xlane.f32.xlu0 %v119_v6 }
  0xb1   : > { %v121_v8 = vpop.xlane.xlu0 %120 }
  0xb2   : > { %316 = vrcp.f32 %v121_v8  ;;  %vm171_vm9 = vweird.f32 %v121_v8 }
  0xbc   : > { %v317_v9 = vpop.eup %316 }
  0xbd   : > { %v126_v10 = vmul.f32 %v317_v9, %v124_v7 }
  0xbf   : > { %127 = vst [vmem:[#allocation4] sm:$0xff] %v126_v10 }
  0xc6   : > { %v140_v14 = vld [vmem:[#allocation4 + $0x1] ss:$0 sm:$0xff]  ;;  %v150_v17 = vld [vmem:[#allocation4 + $0x2] ss:$0 sm:$0xff]  ;;  %v160_v22 = vld [vmem:[#allocation4 + $0x3] ss:$0 sm:$0xff] }
  0xc7   : > { %v141_v15 = vxor.u32 2147483648, %v140_v14  ;;  %v151_v19 = vxor.u32 2147483648, %v150_v17  ;;  %v161_v24 = vxor.u32 2147483648, %v160_v22 }
  0xc9   : > { %v145_v16 = vmul.f32 %v141_v15, %v138_v13 }
  0xcb   : > { %146 = vadd.xlane.f32.xlu0 %v145_v16 }
 0x158   : > { %v147_v18 = vpop.xlane.xlu0 %146 }
 0x159   : > { %v148_v20 = vsel %vm144_vm6, %v147_v18, %v138_v13 }
 0x15a   : > { %v155_v21 = vmul.f32 %v151_v19, %v148_v20 }
 0x15c   : > { %156 = vadd.xlane.f32.xlu1 %v155_v21 }
 0x1e9   : > { %v157_v23 = vpop.xlane.xlu1 %156 }
 0x1ea   : > { %v158_v25 = vsel %vm154_vm7, %v157_v23, %v148_v20 }
 0x1eb   : > { %v165_v26 = vmul.f32 %v161_v24, %v158_v25 }
 0x1ed   : > { %166 = vadd.xlane.f32.xlu1 %v165_v26 }
 0x27a   : > { %v167_v27 = vpop.xlane.xlu1 %166 }
 0x27b   : > { %v168_v28 = vsel %vm164_vm8, %v167_v27, %v158_v25 }
 0x27c   : > { %v170_v29 = vmul.f32 %v317_v9, %v168_v28 }
 0x27e   : > { %v172_v30 = vsel %vm171_vm9, %v168_v28, %v170_v29 }
 0x27f   : > { %173 = vst [vmem:[#allocation2] sm:$0xff] %v172_v30 }
 0x286   : > { %v177_v31 = vld [vmem:[#allocation2] sm:$0xf] }
 0x287   : > { %179 = vst [vmem:[%s106_s21] sm:$0xf] %v177_v31 }
 0x28e   : > { %v204_v32 = vld [vmem:[%s106_s21] sm:$0xf] }
 0x28f   : > { %205 = vst [vmem:[%s188_s25] sm:$0xf] %v204_v32 }
 0x290 PF: > { %s7_s8 = sadd.s32 1, %s340_s8   ;;  %s402_s6 = smov %s336_s7 }
 0x291   : > { %p4_p5 = scmp.ge.s32.totalorder %s7_s8, 4   ;;  %s403_s7 = smov %s405_s10 }
 0x293   :  { %6 = sbr.rel (!%p4_p5) target bundleno = 2 (0x2), region = 113 }

// kernel: custom-call.22
= control target key start
LH: loop header
LB: loop body
LE: loop exit
PB: predicated region body
PF: predicated region fallthrough
CT: control target
= control target key end

     0   :  { %s1704_s30 = smov 0   ;;  %s1706_s10 = smov 0   ;;  %s2030_s0 = inlined_call_operand.vmem [shape: f32[2,2,2], index: 0, kind: input, shape index: {}]   ;;  %s2031_s1 = inlined_call_operand.vmem [shape: f32[2,2,2], index: 1, kind: input, shape index: {}]   ;;  %s2032_s2 = inlined_call_operand.vmem [shape: f32[2,2,2], index: 2, kind: input, shape index: {}]   ;;  %s2033_s3 = inlined_call_operand.vmem [shape: f32[2,2,2], index: 3, kind: input, shape index: {}]   ;;  %s2034_s4 = inlined_call_operand.vmem [shape: f32[2,2], index: 4, kind: output, shape index: {0}]   ;;  %s2035_s5 = inlined_call_operand.vmem [shape: f32[2,2], index: 5, kind: output, shape index: {1}]   ;;  %s2036_s6 = inlined_call_operand.vmem [shape: f32[2,2,2], index: 6, kind: output, shape index: {2}]   ;;  %s2037_s7 = inlined_call_operand.vmem [shape: f32[2,2,2], index: 7, kind: output, shape index: {3}]   ;;  %s2038_s8 = inlined_call_operand.vmem [shape: f32[2,2,2], index: 8, kind: output, shape index: {4}]   ;;  %s2039_s9 = inlined_call_operand.vmem [shape: f32[2,2,2], index: 9, kind: output, shape index: {5}]  }
   0x1   :  { %s1708_s11 = smov 0  }
   0x2 LB: > { %s1720_s12 = sadd.s32 4294967295, %s1641_s11   ;;  %s1723_s13 = sadd.s32 1, %s1641_s11   ;;  %s1641_s11 = sphi %s1708_s11, %s2058_s11   ;;  %s1637_s10 = sphi %s1706_s10, %s2057_s10   ;;  %s1633_s30 = sphi %s1704_s30, %s2056_s30  }
   0x3   : > { %s20_s14 = sshrl.u32 %s1641_s11, 3  ;;  %s21_s15 = sshrl.u32 %s1723_s13, 3 }
   0x4   : > { %s22_s16 = ssub.s32 %s20_s14, %s21_s15  ;;  %s25_s17 = sadd.s32 1, %s1637_s10 }
   0x5   : > { %p23_p0 = scmp.eq.s32.totalorder %s22_s16, 0  ;;  %p35_p1 = scmp.ne.s32.totalorder %s1637_s10, %s1633_s30 }
   0x6   : > { %p36_p2 = scmp.eq.s32.totalorder %s1720_s12, 1  ;;  %p1502_p4 = scmp.ge.s32.totalorder %s1641_s11, 2 }
   0x7   : > { %s1732_s18 = scalar_select %p23_p0, %s1637_s10, %s25_s17  }
   0x8   : > { %p1734_p3 = por %p36_p2, %p35_p1  ;;  %86 = sbr.rel (%p1502_p4) target bundleno = 17 (0x11), region = 16 }
   0x9   : > { %2040 = sst [smem:[#allocation33_spill]] %s1732_s18  ;;  %s88_s20 = sand.u32 (!%p1502_p4), 1, %s1641_s11  }
   0xa   : > { %s1504_s21 = sshll.u32 (!%p1502_p4), %s1641_s11, 1  ;;  %s1503_s22 = sshll.u32 (!%p1502_p4), %s88_s20, 1 }
   0xb   : > { %s92_s25 = scalar_lea.vmem (!%p1502_p4), %s2030_s0, %s1504_s21  ;;  %s90_s26 = scalar_lea.vmem (!%p1502_p4), [#allocation1], %s1503_s22 }
   0xc   : > { %v108_v0 = vld [vmem:[%s92_s25] sm:$0x3] (!%p1502_p4)  ;;  %s129_s29 = scalar_lea.vmem (!%p1502_p4), %s2031_s1, %s1504_s21  ;;  %s166_s16 = scalar_lea.vmem (!%p1502_p4), %s2032_s2, %s1504_s21 }
   0xd   : > { %109 = vst [vmem:[%s90_s26] sm:$0x3] (!%p1502_p4), %v108_v0  ;;  %v145_v1 = vld [vmem:[%s129_s29] sm:$0x3] (!%p1502_p4)  ;;  %s127_s17 = scalar_lea.vmem (!%p1502_p4), [#allocation3], %s1503_s22  ;;  %s203_s23 = scalar_lea.vmem (!%p1502_p4), %s2033_s3, %s1504_s21 }
   0xe   : > { %146 = vst [vmem:[%s127_s17] sm:$0x3] (!%p1502_p4), %v145_v1  ;;  %v182_v2 = vld [vmem:[%s166_s16] sm:$0x3] (!%p1502_p4)  ;;  %s164_s24 = scalar_lea.vmem (!%p1502_p4), [#allocation5], %s1503_s22  ;;  %s201_s25 = scalar_lea.vmem (!%p1502_p4), [#allocation7], %s1503_s22 }
   0xf   : > { %183 = vst [vmem:[%s164_s24] sm:$0x3] %v182_v2  ;;  %v219_v3 = vld [vmem:[%s203_s23] sm:$0x3] }
  0x10   : > { %220 = vst [vmem:[%s201_s25] sm:$0x3] %v219_v3 }
  0x11 PF: > { %p1511_p5 = scmp.ge.s32.totalorder %s1641_s11, 1  ;;  %p236_p6 = scmp.lt.s32.totalorder %s1641_s11, 3 }
  0x13   : > { %p237_p7 = pnand %p1511_p5, %p236_p6 }
  0x15   : > { %240 = sbr.rel (%p237_p7) target bundleno = 999 (0x3e7), region = 140 }
  0x1c   : > { %s259_s26 = sand.u32 1, %s1720_s12   ;;  %s277_s27 = sand.u32 1, %s1633_s30   ;;  %v337_v4 = vlaneseq  ;;  %v1651_v5 = vmov 0.0  }
  0x1d   : > { %s1757_s28 = sshll.u32 %s259_s26, 1  ;;  %s1759_s18 = sshll.u32 %s277_s27, 1  ;;  %332 = vst [vmem:[#allocation12] sm:$0xff] %v1651_v5  ;;  %333 = vst [vmem:[#allocation14] sm:$0xff] %v1651_v5 }
  0x1e   : > { %334 = vst [vmem:[#allocation16] sm:$0xff] %v1651_v5  ;;  %335 = vst [vmem:[#allocation18] sm:$0xff] %v1651_v5  ;;  %v1761_v6 = vand.u32 127, %v337_v4  ;;  %v1763_v7 = vshrl.u32 %v337_v4, 7  ;;  %s261_s11 = scalar_lea.vmem [#allocation1], %s1757_s28  ;;  %s265_s30 = scalar_lea.vmem [#allocation3], %s1757_s28 }
  0x1f   : > { %v304_v8 = vld [vmem:[%s261_s11] sm:$0x3]  ;;  %v308_v9 = vld [vmem:[%s265_s30] sm:$0x3]  ;;  %s269_s21 = scalar_lea.vmem [#allocation5], %s1757_s28  ;;  %s273_s22 = scalar_lea.vmem [#allocation7], %s1757_s28 }
  0x20   : > { %305 = vst [vmem:[#allocation0] sm:$0x3] %v304_v8  ;;  %309 = vst [vmem:[#allocation2] sm:$0x3] %v308_v9  ;;  %v312_v10 = vld [vmem:[%s269_s21] sm:$0x3]  ;;  %v339_v6 = vmov %v1761_v6  ;;  %v342_v7 = vmov %v1763_v7 }
  0x21   : > { %v316_v11 = vld [vmem:[%s273_s22] sm:$0x3]  ;;  %313 = vst [vmem:[#allocation4] sm:$0x3] %v312_v10  ;;  %v352_v6 = vmov %v1761_v6  ;;  %v355_v7 = vmov %v1763_v7  ;;  %s320_s29 = smov [#allocation20]  ;;  %s323_s14 = smov [#allocation21]  ;;  %vm346_vm0 = vcmp.eq.s32.totalorder %v342_v7, %v339_v6 }
  0x22   : > { %317 = vst [vmem:[#allocation6] sm:$0x3] %v316_v11  ;;  %vm359_vm1 = vcmp.eq.s32.totalorder %v355_v7, %v352_v6  ;;  %s336_s15 = smov [#allocation12]  ;;  %s349_s16 = smov [#allocation18]  ;;  %vm1391_vm2 = vcmp.lt.s32.totalorder %v1761_v6, 2  ;;  %v1383_v6 = vmov %v1761_v6  ;;  %v1386_v7 = vmov %v1763_v7 }
  0x23   : > { %s326_s17 = smov [#allocation22]  ;;  %s329_s20 = smov [#allocation23]  ;;  %vm1396_vm3 = vcmp.eq.s32.totalorder %v1386_v7, %v1383_v6  ;;  %v1434_v6 = vmov %v1761_v6  ;;  %v1403_v7 = vmov %v1763_v7 }
  0x24   : > { %v343_v12 = vld [vmem:[%s336_s15] sm:$0x3]  ;;  %s1387_s30 = smov [#allocation20]  ;;  %s1404_s21 = smov [#allocation21]  ;;  %v1400_v6 = vmov %v1761_v6  ;;  %v1437_v7 = vmov %v1763_v7 }
  0x25   : > { %v356_v13 = vld [vmem:[%s349_s16] sm:$0x3]  ;;  %v347_v16 = vsel %vm346_vm0, 1.0, %v343_v12  ;;  %s1421_s22 = smov [#allocation22]  ;;  %v1417_v6 = vmov %v1761_v6  ;;  %v1420_v7 = vmov %v1763_v7  ;;  %vm1447_vm4 = vcmp.eq.s32.totalorder %v1437_v7, %v1434_v6 }
  0x26   : > { %v360_v17 = vsel %vm359_vm1, 1.0, %v356_v13  ;;  %348 = vst [vmem:[%s336_s15] sm:$0x3] %v347_v16 }
  0x27   : > { %v321_v14 = vld [vmem:[#allocation0] sm:$0xff]  ;;  %v324_v15 = vld [vmem:[#allocation2] sm:$0xff]  ;;  %361 = vst [vmem:[%s349_s16] sm:$0x3] %v360_v17 }
  0x28   : > { %322 = vst [vmem:[%s320_s29] sm:$0xff] %v321_v14  ;;  %325 = vst [vmem:[%s323_s14] sm:$0xff] %v324_v15  ;;  %v327_v18 = vld [vmem:[#allocation4] sm:$0xff]  ;;  %s1438_s29 = smov [#allocation23] }
  0x29   : > { %v330_v19 = vld [vmem:[#allocation6] sm:$0xff]  ;;  %328 = vst [vmem:[%s326_s17] sm:$0xff] %v327_v18 }
  0x2a   : > { %331 = vst [vmem:[%s329_s20] sm:$0xff] %v330_v19 }
  0x2f   : > { %v1393_v20 = vld [vmem:[%s1387_s30] sm:$0x3] }
  0x30   : > { %v1410_v21 = vld [vmem:[%s1404_s21] sm:$0x3]  ;;  %v1394_v22 = vsel %vm1391_vm2, %v1393_v20, 0.0 }
  0x31   : > { %v1411_v23 = vsel %vm1391_vm2, %v1410_v21, 0.0  ;;  %v1427_v24 = vld [vmem:[%s1421_s22] sm:$0x3]  ;;  %v1395_v26 = vmul.f32 %v1394_v22, %v1394_v22 }
  0x32   : > { %v1444_v25 = vld [vmem:[%s1438_s29] sm:$0x3]  ;;  %v1412_v27 = vmul.f32 %v1411_v23, %v1411_v23  ;;  %v1428_v28 = vsel %vm1391_vm2, %v1427_v24, 0.0 }
  0x33   : > { %v1445_v29 = vsel %vm1391_vm2, %v1444_v25, 0.0  ;;  %v1429_v30 = vmul.f32 %v1428_v28, %v1428_v28  ;;  %v1397_v33 = vsel %vm1396_vm3, 0.0, %v1395_v26 }
  0x34   : > { %v1414_v31 = vadd.f32 %v1412_v27, %v1395_v26  ;;  %v1446_v32 = vmul.f32 %v1445_v29, %v1445_v29  ;;  %v1413_v34 = vadd.f32 %v1412_v27, %v1397_v33 }
  0x36   : > { %v1431_v35 = vadd.f32 %v1429_v30, %v1414_v31  ;;  %v1430_v36 = vadd.f32 %v1429_v30, %v1413_v34  ;;  %v1448_v37 = vsel %vm1447_vm4, 0.0, %v1446_v32 }
  0x38   : > { %v1450_v38 = vadd.f32 %v1446_v32, %v1431_v35  ;;  %v1449_v39 = vadd.f32 %v1448_v37, %v1430_v36 }
  0x3a   : > { %1451 = vadd.xlane.f32.xlu0 %v1450_v38 }
  0x3e   : > { %1459 = vadd.xlane.f32.xlu0 %v1449_v39 }
  0xc7   : > { %v1452_v40 = vpop.xlane.xlu0 %1451 }
  0xc8   : > { %v1453_v41 = vrot.slane %v1452_v40, 4 }
  0xca   : > { %v1454_v42 = vadd.f32 %v1453_v41, %v1452_v40 }
  0xcb   : > { %v1460_v43 = vpop.xlane.xlu0 %1459 }
  0xcc   : > { %v1455_v44 = vrot.slane %v1454_v42, 2  ;;  %v1461_v45 = vrot.slane %v1460_v43, 4 }
  0xce   : > { %v1462_v46 = vadd.f32 %v1461_v45, %v1460_v43  ;;  %v1456_v47 = vadd.f32 %v1455_v44, %v1454_v42 }
  0xd0   : > { %v1463_v48 = vrot.slane %v1462_v46, 2  ;;  %v1457_v50 = vrot.slane %v1456_v47, 1 }
  0xd2   : > { %v1464_v49 = vadd.f32 %v1463_v48, %v1462_v46  ;;  %v1458_v53 = vadd.f32 %v1457_v50, %v1456_v47 }
  0xd4   : > { %v1465_v51 = vrot.slane %v1464_v49, 1 }
  0xd6   : > { %v1466_v52 = vadd.f32 %v1465_v51, %v1464_v49 }
  0xd8   : > { %1552 = vpush %v1466_v52 }
  0xd9   : > { %1554 = vpush %v1458_v53 }
 0x109   : > { %s1553_s14 = spop %1552 }
 0x10a   : > { %s1555_s15 = spop %1554 }
 0x10b   : > { %s1469_s16 = smul.f32 1e-10, %s1555_s15 }
 0x10d   : > { %p1470_p8 = scmp.le.f32.partialorder %s1553_s14, %s1469_s16 }
 0x10e   : > { %s1797_s17 = smov (!%p1470_p8), 0  }
 0x10f   : > { %1473 = sbr.rel (%p1470_p8) target bundleno = 953 (0x3b9), region = 467 }
 0x116 LB: >> { %s1802_s20 = smov 0   ;;  %s1645_s17 = sphi %s1797_s17, %s2042_s17  }
 0x117 LB: >>> { %s466_s30 = smov [#allocation20]  ;;  %v470_v6 = vmov %v1761_v6  ;;  %v473_v7 = vmov %v1763_v7  ;;  %s486_s21 = smov [#allocation21]  ;;  %vm789_vm14 = vcmp.eq.s32.totalorder %v1763_v7, 0  ;;  %vm801_vm15 = vcmp.eq.s32.totalorder %v1763_v7, 1  ;;  %s1649_s20 = sphi %s1802_s20, %s465_s20  }
 0x118   : >>> { %v490_v6 = vmov %v1761_v6  ;;  %v493_v7 = vmov %v1763_v7  ;;  %v474_v54 = vld [vmem:[%s466_s30] sm:$0x3]  ;;  %vm477_vm5 = vcmp.eq.s32.totalorder %v473_v7, %v470_v6  ;;  %s506_s22 = smov [#allocation23]  ;;  %s467_s29 = smov [#allocation24] }
 0x119   : >>> { %vm497_vm6 = vcmp.eq.s32.totalorder %v493_v7, %v490_v6  ;;  %v510_v6 = vmov %v1761_v6  ;;  %v513_v7 = vmov %v1763_v7  ;;  %v478_v55 = vsel %vm477_vm5, %v474_v54, 0.0  ;;  %v494_v56 = vld [vmem:[%s486_s21] sm:$0x3]  ;;  %s487_s14 = smov [#allocation25]  ;;  %s507_s15 = smov [#allocation26] }
 0x11a   : >>> { %vm517_vm7 = vcmp.eq.s32.totalorder %v513_v7, %v510_v6  ;;  %v479_v57 = vrot.slane %v478_v55, 4  ;;  %v498_v58 = vsel %vm497_vm6, %v494_v56, 0.0  ;;  %v514_v59 = vld [vmem:[%s506_s22] sm:$0x3]  ;;  %s530_s16 = smov [#allocation25]  ;;  %s528_s30 = smov [#allocation24]  ;;  %v579_v6 = vmov %v1761_v6 }
 0x11b   : >>> { %v499_v60 = vrot.slane %v498_v58, 4  ;;  %v518_v61 = vsel %vm517_vm7, %v514_v59, 0.0  ;;  %s532_s21 = smov [#allocation26]  ;;  %s567_s22 = smov [#allocation27]  ;;  %v582_v7 = vmov %v1763_v7  ;;  %v594_v6 = vmov %v1761_v6 }
 0x11c   : >>> { %v480_v62 = vadd.f32 %v479_v57, %v478_v55  ;;  %v519_v63 = vrot.slane %v518_v61, 4  ;;  %v597_v7 = vmov %v1763_v7  ;;  %vm584_vm12 = vcmp.eq.s32.totalorder %v582_v7, %v579_v6  ;;  %s1821_s24 = smov [#allocation22]  ;;  %s1827_s23 = smov [#allocation14] }
 0x11d   : >>> { %v500_v0 = vadd.f32 %v499_v60, %v498_v58  ;;  %vm599_vm13 = vcmp.eq.s32.totalorder %v597_v7, %v594_v6  ;;  %s829_s11 = smov [#allocation31]  ;;  %s1833_s27 = smov [#allocation18]  ;;  %v615_v55 = vld [vmem:[%s1821_s24] sm:$0x3]  ;;  %v692_v6 = vmov %v1761_v6  ;;  %v695_v7 = vmov %v1763_v7 }
 0x11e   : >>> { %v481_v1 = vrot.slane %v480_v62, 2  ;;  %v520_v2 = vadd.f32 %v519_v63, %v518_v61  ;;  %v838_v58 = vld [vmem:[%s1827_s23] sm:$0x3]  ;;  %s607_s26 = smov [#allocation32]  ;;  %s831_s25 = smov [#allocation32]  ;;  %v706_v6 = vmov %v1761_v6  ;;  %v709_v7 = vmov %v1763_v7 }
 0x11f   : >>> { %v501_v3 = vrot.slane %v500_v0, 2  ;;  %v840_v61 = vld [vmem:[%s1833_s27] sm:$0x3]  ;;  %vm699_vm0 = vcmp.eq.s32.totalorder %v695_v7, %v692_v6  ;;  %v665_v6 = vmov %v1761_v6  ;;  %v668_v7 = vmov %v1763_v7  ;;  %s465_s20 = sadd.s32 1, %s1649_s20  }
 0x120   : >>> { %v482_v4 = vadd.f32 %v481_v1, %v480_v62  ;;  %v521_v5 = vrot.slane %v520_v2, 2  ;;  %v679_v6 = vmov %v1761_v6  ;;  %v682_v7 = vmov %v1763_v7  ;;  %p462_p9 = scmp.ge.s32.totalorder %s465_s20, 3  }
 0x121   : >>> { %v502_v8 = vadd.f32 %v501_v3, %v500_v0  ;;  %vm714_vm1 = vcmp.eq.s32.totalorder %v709_v7, %v706_v6  ;;  %vm673_vm3 = vcmp.eq.s32.totalorder %v668_v7, %v665_v6  ;;  %vm686_vm4 = vcmp.eq.s32.totalorder %v682_v7, %v679_v6 }
 0x122   : >>> { %v483_v9 = vrot.slane %v482_v4, 1  ;;  %v522_v10 = vadd.f32 %v521_v5, %v520_v2  ;;  %vm728_vm5 = vcmp.eq.s32.totalorder %v1761_v6, 0  ;;  %vm732_vm6 = vcmp.eq.s32.totalorder %v1761_v6, 1 }
 0x123   : >>> { %v503_v11 = vrot.slane %v502_v8, 1  ;;  %v366_v6 = vmov (%p462_p9), %v1761_v6  ;;  %v369_v7 = vmov (%p462_p9), %v1763_v7 }
 0x124   : >>> { %v484_v12 = vadd.f32 %v483_v9, %v482_v4  ;;  %v523_v13 = vrot.slane %v522_v10, 1  ;;  %v419_v6 = vmov (%p462_p9), %v1761_v6  ;;  %vm381_vm7 = vcmp.eq.s32.totalorder (%p462_p9), %v369_v7, %v366_v6 }
 0x125   : >>> { %v504_v14 = vadd.f32 %v503_v11, %v502_v8  ;;  %v422_v7 = vmov (%p462_p9), %v1763_v7  ;;  %v385_v6 = vmov (%p462_p9), %v1761_v6 }
 0x126   : >>> { %485 = vst [vmem:[%s467_s29] sm:$0x1] %v484_v12  ;;  %v524_v15 = vadd.f32 %v523_v13, %v522_v10  ;;  %s569_s29 = smov [#allocation28]  ;;  %v388_v7 = vmov (%p462_p9), %v1763_v7  ;;  %v402_v6 = vmov (%p462_p9), %v1761_v6 }
 0x127   : >>> { %505 = vst [vmem:[%s487_s14] sm:$0x1] %v504_v14  ;;  %s526_s14 = smov [#allocation29]  ;;  %v405_v7 = vmov (%p462_p9), %v1763_v7 }
 0x128   : >>> { %525 = vst [vmem:[%s507_s15] sm:$0x1] %v524_v15  ;;  %s527_s15 = smov [#allocation30]  ;;  %s571_s14 = smov %s526_s14 }
 0x129   : >>> { %s573_s15 = smov %s527_s15 }
 0x12d   : >>> { %v529_v18 = vld [vmem:[%s528_s30] sm:$0xff]  ;;  %s590_s30 = smov [#allocation30] }
 0x12e   : >>> { %v531_v16 = vld [vmem:[%s530_s16] sm:$0xff]  ;;  %v552_v31 = vand.u32 2147483647, %v529_v18  ;;  %s575_s16 = smov [#allocation29] }
 0x12f   : >>> { %v535_v17 = vmul.f32 2.0, %v531_v16  ;;  %v533_v19 = vld [vmem:[%s532_s21] sm:$0xff]  ;;  %v553_v36 = vand.u32 2147483647, %v531_v16  ;;  %s588_s21 = smov [#allocation31] }
 0x130   : >>> { %v534_v20 = vsub.f32 %v533_v19, %v529_v18  ;;  %v554_v32 = vand.u32 2147483647, %v533_v19 }
 0x131   : >>> { %1603 = vrcp.f32 %v535_v17 }
 0x132   : >>> { %v555_v35 = vmin.f32 %v552_v31, %v554_v32 }
 0x134   : >>> { %v556_v37 = vmul.f32 1.1920929e-08, %v555_v35 }
 0x136   : >>> { %vm557_vm11 = vcmp.le.f32.partialorder %v553_v36, %v556_v37 }
 0x13b   : >>> { %v1604_v21 = vpop.eup %1603 }
 0x13c   : >>> { %v537_v22 = vmul.f32 %v1604_v21, %v534_v20 }
 0x13e   : >>> { %v539_v23 = vmul.f32 %v537_v22, %v537_v22  ;;  %vm538_vm10 = vcmp.ge.f32.partialorder %v537_v22, 0.0 }
 0x140   : >>> { %v540_v24 = vadd.f32 1.0, %v539_v23 }
 0x142   : >>> { %1605 = vrsqrt.f32 %v540_v24  ;;  %vm543_vm8 = vcmp.eq.f32.partialorder %v540_v24, inf  ;;  %v546_v26 = vand.u32 2147483648, %v540_v24  ;;  %vm545_vm9 = vcmp.eq.f32.partialorder %v540_v24, 0.0 }
 0x14c   : >>> { %v1606_v25 = vpop.eup %1605 }
 0x14d   : >>> { %v542_v27 = vmul.f32 %v1606_v25, %v540_v24 }
 0x14f   : >>> { %v544_v28 = vsel %vm543_vm8, %v540_v24, %v542_v27  ;;  %vm434_vm8 = vcmp.eq.s32.totalorder (%p462_p9), %v422_v7, %v419_v6 }
 0x150   : >>> { %v547_v29 = vsel %vm545_vm9, %v546_v26, %v544_v28 }
 0x151   : >>> { %v548_v30 = vxor.u32 2147483648, %v547_v29 }
 0x153   : >>> { %v549_v33 = vsel %vm538_vm10, %v547_v29, %v548_v30 }
 0x154   : >>> { %v550_v34 = vadd.f32 %v549_v33, %v537_v22 }
 0x156   : >>> { %1607 = vrcp.f32 %v550_v34 }
 0x160   : >>> { %v1608_v38 = vpop.eup %1607 }
 0x161   : >>> { %v558_v39 = vsel %vm557_vm11, 0.0, %v1608_v38 }
 0x162   : >>> { %v559_v40 = vmul.f32 %v558_v39, %v558_v39  ;;  %v563_v41 = vmul.f32 %v558_v39, %v531_v16 }
 0x164   : >>> { %v560_v42 = vadd.f32 1.0, %v559_v40  ;;  %v564_v43 = vsub.f32 %v529_v18, %v563_v41  ;;  %v566_v44 = vadd.f32 %v563_v41, %v533_v19 }
 0x166   : >>> { %1609 = vrsqrt.f32 %v560_v42  ;;  %568 = vst [vmem:[%s567_s22] sm:$0xff] %v564_v43  ;;  %570 = vst [vmem:[%s569_s29] sm:$0xff] %v566_v44  ;;  %s605_s22 = smov [#allocation31]  ;;  %s1817_s29 = smov [#allocation20] }
 0x167   : >>> { %v613_v53 = vld [vmem:[%s1817_s29] sm:$0x3] }
 0x170   : >>> { %v1610_v45 = vpop.eup %1609 }
 0x171   : >>> { %572 = vst [vmem:[%s571_s14] sm:$0xff] %v1610_v45  ;;  %v562_v46 = vmul.f32 %v1610_v45, %v558_v39  ;;  %s603_s14 = smov [#allocation32] }
 0x173   : >>> { %574 = vst [vmem:[%s573_s15] sm:$0xff] %v562_v46  ;;  %s1819_s15 = smov [#allocation21] }
 0x174   : >>> { %v614_v54 = vld [vmem:[%s1819_s15] sm:$0x3] }
 0x178   : >>> { %v576_v47 = vld [vmem:[%s575_s16] ss:$0 sm:$0xff]  ;;  %s1823_s16 = smov [#allocation23] }
 0x179   : >>> { %v585_v48 = vsel %vm584_vm12, %v576_v47, 0.0  ;;  %v616_v56 = vld [vmem:[%s1823_s16] sm:$0x3] }
 0x17a   : >>> { %586 = vadd.xlane.f32.xlu0 %v585_v48  ;;  %v591_v49 = vld [vmem:[%s590_s30] ss:$0 sm:$0xff]  ;;  %s1825_s30 = smov [#allocation12] }
 0x17b   : >>> { %v600_v50 = vsel %vm599_vm13, %v591_v49, 0.0  ;;  %v837_v57 = vld [vmem:[%s1825_s30] sm:$0x3] }
 0x17e   : >>> { %601 = vadd.xlane.f32.xlu0 %v600_v50 }
 0x207   : >>> { %v587_v51 = vpop.xlane.xlu0 %586 }
 0x208   : >>> { %589 = vst [vmem:[%s588_s21] sm:$0xff] %v587_v51  ;;  %s1829_s21 = smov [#allocation16] }
 0x209   : >>> { %v839_v59 = vld [vmem:[%s1829_s21] sm:$0x3] }
 0x20b   : >>> { %v602_v52 = vpop.xlane.xlu0 %601 }
 0x20c   : >>> { %604 = vst [vmem:[%s603_s14] sm:$0xff] %v602_v52  ;;  %s1853_s14 = smov [#allocation23] }
 0x20f   : >>> { %v606_v60 = vld [vmem:[%s605_s22] sm:$0xff]  ;;  %s1851_s22 = smov [#allocation22] }
 0x210   : >>> { %v830_v62 = vld [vmem:[%s829_s11] sm:$0xff]  ;;  %v617_v63 = vmul.f32 %v613_v53, %v606_v60  ;;  %v620_v0 = vmul.f32 %v614_v54, %v606_v60  ;;  %v624_v1 = vmul.f32 %v615_v55, %v606_v60  ;;  %v627_v2 = vmul.f32 %v616_v56, %v606_v60  ;;  %s1849_s11 = smov [#allocation12] }
 0x211   : >>> { %v841_v3 = vmul.f32 %v837_v57, %v830_v62  ;;  %v844_v4 = vmul.f32 %v838_v58, %v830_v62  ;;  %v848_v5 = vmul.f32 %v839_v59, %v830_v62  ;;  %v851_v8 = vmul.f32 %v840_v61, %v830_v62 }
 0x213   : >>> { %v608_v9 = vld [vmem:[%s607_s26] sm:$0xff]  ;;  %s635_s26 = smov [#allocation30] }
 0x214   : >>> { %v832_v10 = vld [vmem:[%s831_s25] sm:$0xff]  ;;  %v618_v11 = vmul.f32 %v615_v55, %v608_v9  ;;  %v621_v12 = vmul.f32 %v616_v56, %v608_v9  ;;  %v623_v13 = vmul.f32 %v613_v53, %v608_v9  ;;  %v626_v14 = vmul.f32 %v614_v54, %v608_v9  ;;  %s633_s25 = smov [#allocation29] }
 0x215   : >>> { %v842_v15 = vmul.f32 %v839_v59, %v832_v10  ;;  %v845_v16 = vmul.f32 %v840_v61, %v832_v10  ;;  %v847_v17 = vmul.f32 %v837_v57, %v832_v10  ;;  %v850_v18 = vmul.f32 %v838_v58, %v832_v10  ;;  %v634_v27 = vld [vmem:[%s633_s25] ss:$0 sm:$0xff]  ;;  %s662_s25 = smov [#allocation27] }
 0x216   : >>> { %v619_v19 = vsub.f32 %v617_v63, %v618_v11  ;;  %v622_v20 = vsub.f32 %v620_v0, %v621_v12  ;;  %v625_v21 = vadd.f32 %v624_v1, %v623_v13  ;;  %v628_v22 = vadd.f32 %v627_v2, %v626_v14  ;;  %v636_v28 = vld [vmem:[%s635_s26] ss:$0 sm:$0xff]  ;;  %s661_s26 = smov [#allocation20] }
 0x217   : >>> { %v843_v23 = vsub.f32 %v841_v3, %v842_v15  ;;  %v846_v24 = vsub.f32 %v844_v4, %v845_v16  ;;  %v849_v25 = vadd.f32 %v848_v5, %v847_v17  ;;  %v852_v26 = vadd.f32 %v851_v8, %v850_v18  ;;  %v669_v63 = vld [vmem:[%s662_s25] ss:$0 sm:$0xff]  ;;  %s905_s25 = sadd.s32 (%p462_p9), 1, %s1645_s17  }
 0x218   : >>> { %630 = vst [vmem:[%s1819_s15] sm:$0x3] %v622_v20  ;;  %632 = vst [vmem:[%s1823_s16] sm:$0x3] %v628_v22  ;;  %s1855_s15 = smov [#allocation20]  ;;  %s703_s16 = smov [#allocation28] }
 0x219   : >>> { %629 = vst [vmem:[%s1817_s29] sm:$0x3] %v619_v19  ;;  %631 = vst [vmem:[%s1821_s24] sm:$0x3] %v625_v21  ;;  %s1857_s24 = smov [#allocation16]  ;;  %s1865_s29 = smov [#allocation21]  ;;  %v710_v59 = vld [vmem:[%s703_s16] ss:$0 sm:$0xff] }
 0x21a   : >>> { %853 = vst [vmem:[%s1825_s30] sm:$0x3] %v843_v23  ;;  %854 = vst [vmem:[%s1827_s23] sm:$0x3] %v846_v24  ;;  %s1859_s23 = smov [#allocation14]  ;;  %s689_s30 = smov [#allocation22] }
 0x21b   : >>> { %855 = vst [vmem:[%s1829_s21] sm:$0x3] %v849_v25  ;;  %856 = vst [vmem:[%s1833_s27] sm:$0x3] %v852_v26  ;;  %s1863_s27 = smov [#allocation18]  ;;  %s702_s21 = smov [#allocation23] }
 0x21c   : >>> { %s805_s16 = smov [#allocation21]  ;;  %p458_p10 = scmp.ge.s32.totalorder (%p462_p9), %s905_s25, 15 }
 0x21d   : >> { %s2042_s17 = smov (%p462_p9), %s905_s25 }
 0x21f   : >>> { %v644_v30 = vld [vmem:[%s1853_s14] sm:$0x3] }
 0x220   : >>> { %v643_v29 = vld [vmem:[%s1851_s22] sm:$0x3]  ;;  %v652_v36 = vmul.f32 %v644_v30, %v636_v28  ;;  %v655_v42 = vmul.f32 %v644_v30, %v634_v27 }
 0x221   : >>> { %v641_v31 = vld [vmem:[%s1855_s15] sm:$0x3]  ;;  %v651_v35 = vmul.f32 %v643_v29, %v634_v27  ;;  %v654_v37 = vmul.f32 %v643_v29, %v636_v28 }
 0x222   : >>> { %v859_v32 = vld [vmem:[%s1849_s11] ss:$0 sm:$0xff]  ;;  %v1531_v34 = vld [vmem:[%s1849_s11 + $0x1] ss:$0 sm:$0xff]  ;;  %v645_v48 = vmul.f32 %v641_v31, %v634_v27  ;;  %v648_v49 = vmul.f32 %v641_v31, %v636_v28 }
 0x223   : >>> { %v1530_v33 = vld [vmem:[%s1849_s11 - $0x1] sm:$0x2]  ;;  %v1533_v40 = vld [vmem:[%s1857_s24 + $0x1] sm:$0x1]  ;;  %v653_v47 = vsub.f32 %v651_v35, %v652_v36  ;;  %v656_v53 = vadd.f32 %v655_v42, %v654_v37 }
 0x224   : >>> { %v866_v38 = vsel %vm789_vm14, %v859_v32, %v1530_v33  ;;  %v870_v39 = vld [vmem:[%s1857_s24] ss:$0 sm:$0xff]  ;;  %v878_v43 = vsel %vm801_vm15, %v1531_v34, %v1533_v40  ;;  %v1535_v45 = vld [vmem:[%s1859_s23 + $0x1] ss:$0 sm:$0xff] }
 0x225   : >>> { %v883_v41 = vld [vmem:[%s1859_s23] ss:$0 sm:$0xff]  ;;  %869 = vst [vmem:[%s1849_s11] sm:$0x3] %v866_v38  ;;  %880 = vst [vmem:[%s1857_s24] sm:$0x3] %v878_v43  ;;  %v1537_v51 = vld [vmem:[%s1863_s27 + $0x1] sm:$0x1] }
 0x226   : >>> { %v1534_v44 = vld [vmem:[%s1859_s23 - $0x1] sm:$0x2]  ;;  %1532 = vst [vmem:[%s1849_s11 + $0x1] sm:$0x1] %v870_v39  ;;  %v902_v54 = vsel %vm801_vm15, %v1535_v45, %v1537_v51  ;;  %659 = vst [vmem:[%s1851_s22] sm:$0x3] %v653_v47  ;;  %s676_s11 = smov [#allocation21] }
 0x227   : >>> { %v894_v46 = vld [vmem:[%s1863_s27] ss:$0 sm:$0xff]  ;;  %v890_v50 = vsel %vm789_vm14, %v883_v41, %v1534_v44  ;;  %660 = vst [vmem:[%s1853_s14] sm:$0x3] %v656_v53  ;;  %s1907_s22 = smov [#allocation22]  ;;  %s1652_s14 = smov 1  }
 0x228   : >>> { %v642_v52 = vld [vmem:[%s1865_s29] sm:$0x3]  ;;  %893 = vst [vmem:[%s1859_s23] sm:$0x3] %v890_v50  ;;  %904 = vst [vmem:[%s1863_s27] sm:$0x3] %v902_v54  ;;  %s718_s24 = smov [#allocation21]  ;;  %s1910_s27 = smov [#allocation23] }
 0x229   : >>> { %v646_v55 = vmul.f32 %v642_v52, %v636_v28  ;;  %v649_v56 = vmul.f32 %v642_v52, %v634_v27  ;;  %1536 = vst [vmem:[%s1859_s23 + $0x1] sm:$0x1] %v894_v46  ;;  %s1653_s23 = smov 127  }
 0x22b   : >>> { %v647_v57 = vsub.f32 %v645_v48, %v646_v55  ;;  %v650_v58 = vadd.f32 %v649_v56, %v648_v49 }
 0x22d   : >>> { %657 = vst [vmem:[%s1855_s15] sm:$0x3] %v647_v57  ;;  %658 = vst [vmem:[%s1865_s29] sm:$0x3] %v650_v58  ;;  %v696_v60 = vld [vmem:[%s689_s30] sm:$0x3]  ;;  %s717_s15 = smov [#allocation20]  ;;  %s781_s29 = smov [#allocation20] }
 0x22e   : >>> { %v700_v61 = vsel %vm699_vm0, 0.0, %v696_v60  ;;  %v711_v62 = vld [vmem:[%s702_s21] sm:$0x3] }
 0x22f   : >>> { %701 = vst [vmem:[%s689_s30] sm:$0x3] %v700_v61  ;;  %v715_v0 = vsel %vm714_vm1, %v710_v59, %v711_v62  ;;  %s782_s30 = smov [#allocation22] }
 0x230   : >>> { %716 = vst [vmem:[%s702_s21] sm:$0x3] %v715_v0  ;;  %s806_s21 = smov [#allocation23] }
 0x234   : >>> { %v670_v1 = vld [vmem:[%s661_s26] sm:$0x3] }
 0x235   : >>> { %v683_v2 = vld [vmem:[%s676_s11] sm:$0x3]  ;;  %v674_v3 = vsel %vm673_vm3, %v669_v63, %v670_v1 }
 0x236   : >>> { %v687_v4 = vsel %vm686_vm4, 0.0, %v683_v2  ;;  %675 = vst [vmem:[%s661_s26] sm:$0x3] %v674_v3  ;;  %v755_v5 = vld [vmem:[%s1907_s22] sm:$0x3]  ;;  %s370_s26 = smov (%p462_p9), [#allocation20] }
 0x237   : >>> { %688 = vst [vmem:[%s676_s11] sm:$0x3] %v687_v4  ;;  %756 = vrot.lane.b32.xlu0 %v755_v5, %s1652_s14  ;;  %v751_v11 = vld [vmem:[%s1910_s27] sm:$0x3]  ;;  %s389_s11 = smov (%p462_p9), [#allocation21] }
 0x238   : >>> { %v772_v12 = vld [vmem:[%s1910_s27] sm:$0x3] }
 0x239   : >>> { %v754_v30 = vld [vmem:[%s1907_s22] sm:$0x3] }
 0x23d   : >>> { %v723_v8 = vld [vmem:[%s717_s15] sm:$0x3] }
 0x23e   : >>> { %724 = vrot.lane.b32.xlu1 %v723_v8, %s1652_s14  ;;  %v719_v9 = vld [vmem:[%s718_s24] sm:$0x3] }
 0x23f   : >>> { %v740_v10 = vld [vmem:[%s718_s24] sm:$0x3] }
 0x240   : >>> { %v722_v18 = vld [vmem:[%s717_s15] sm:$0x3] }
 0x242   : >>> { %720 = vrot.lane.b32.xlu1 %v719_v9, %s1652_s14 }
 0x246   : >>> { %741 = vrot.lane.b32.xlu1 %v740_v10, %s1653_s23 }
 0x24a   : >>> { %752 = vrot.lane.b32.xlu1 %v751_v11, %s1652_s14  ;;  %s423_s14 = smov (%p462_p9), [#allocation23] }
 0x24e   : >>> { %773 = vrot.lane.b32.xlu1 %v772_v12, %s1653_s23 }
 0x2a9   : >>> { %v757_v20 = vpop.permute.xlu0 %756 }
 0x2aa   : >>> { %v761_v22 = vsel %vm728_vm5, %v755_v5, %v757_v20 }
 0x2b0   : >>> { %v725_v13 = vpop.permute.xlu1 %724 }
 0x2b1   : >>> { %v729_v14 = vsel %vm728_vm5, %v723_v8, %v725_v13 }
 0x2b4   : >>> { %v721_v15 = vpop.permute.xlu1 %720 }
 0x2b5   : >>> { %v733_v16 = vsel %vm732_vm6, %v721_v15, %v729_v14 }
 0x2b6   : >>> { %v739_v17 = vsel %vm1391_vm2, %v733_v16, 0.0 }
 0x2b7   : >>> { %747 = vst [vmem:[%s717_s15] sm:$0x3] %v739_v17 }
 0x2b8   : >>> { %v742_v19 = vpop.permute.xlu1 %741 }
 0x2b9   : >>> { %v746_v21 = vsel %vm732_vm6, %v722_v18, %v742_v19 }
 0x2ba   : >>> { %748 = vst [vmem:[%s718_s24] sm:$0x3] %v746_v21 }
 0x2bc   : >>> { %v753_v23 = vpop.permute.xlu1 %752 }
 0x2bd   : >>> { %v765_v24 = vsel %vm732_vm6, %v753_v23, %v761_v22 }
 0x2be   : >>> { %v783_v25 = vld [vmem:[%s781_s29] ss:$0 sm:$0xff]  ;;  %v1523_v27 = vld [vmem:[%s781_s29 + $0x1] ss:$0 sm:$0xff]  ;;  %v771_v29 = vsel %vm1391_vm2, %v765_v24, 0.0 }
 0x2bf   : >>> { %v1522_v26 = vld [vmem:[%s781_s29 - $0x1] sm:$0x2]  ;;  %779 = vst [vmem:[%s1907_s22] sm:$0x3] %v771_v29  ;;  %s406_s22 = smov (%p462_p9), [#allocation22] }
 0x2c0   : >>> { %v790_v28 = vsel %vm789_vm14, %v783_v25, %v1522_v26  ;;  %v774_v31 = vpop.permute.xlu1 %773 }
 0x2c1   : >>> { %793 = vst [vmem:[%s781_s29] sm:$0x3] %v790_v28  ;;  %v807_v32 = vld [vmem:[%s805_s16] ss:$0 sm:$0xff]  ;;  %v1527_v34 = vld [vmem:[%s805_s16 + $0x1] ss:$0 sm:$0xff]  ;;  %v778_v35 = vsel %vm732_vm6, %v754_v30, %v774_v31 }
 0x2c2   : >>> { %v1526_v33 = vld [vmem:[%s805_s16 - $0x1] sm:$0x2]  ;;  %780 = vst [vmem:[%s1910_s27] sm:$0x3] %v778_v35 }
 0x2c3   : >>> { %v814_v36 = vsel %vm789_vm14, %v807_v32, %v1526_v33 }
 0x2c4   : >>> { %817 = vst [vmem:[%s805_s16] sm:$0x3] %v814_v36 }
 0x2c6   : >>> { %v794_v37 = vld [vmem:[%s782_s30] ss:$0 sm:$0xff]  ;;  %v1525_v38 = vld [vmem:[%s782_s30 + $0x1] sm:$0x1] }
 0x2c7   : >>> { %1524 = vst [vmem:[%s781_s29 + $0x1] sm:$0x1] %v794_v37  ;;  %v802_v39 = vsel %vm801_vm15, %v1523_v27, %v1525_v38  ;;  %464 = sbr.rel (!%p462_p9) target bundleno = 279 (0x117), region = 462 }
 0x2c8   : >>> { %804 = vst [vmem:[%s782_s30] sm:$0x3] %v802_v39 }
 0x2c9   : >>> { %v818_v40 = vld [vmem:[%s806_s21] ss:$0 sm:$0xff]  ;;  %v1529_v41 = vld [vmem:[%s806_s21 + $0x1] sm:$0x1] }
 0x2ca   : >>> { %1528 = vst [vmem:[%s805_s16 + $0x1] sm:$0x1] %v818_v40  ;;  %v826_v42 = vsel %vm801_vm15, %v1527_v34, %v1529_v41 }
 0x2cb   : >>> { %828 = vst [vmem:[%s806_s21] sm:$0x3] %v826_v42 }
 0x2ce   : >> { %v376_v43 = vld [vmem:[%s370_s26] sm:$0x3] }
 0x2cf   : >> { %v377_v45 = vsel %vm1391_vm2, %v376_v43, 0.0  ;;  %v412_v47 = vld [vmem:[%s406_s22] sm:$0x3] }
 0x2d0   : >> { %v378_v49 = vmul.f32 %v377_v45, %v377_v45  ;;  %v413_v51 = vsel %vm1391_vm2, %v412_v47, 0.0 }
 0x2d1   : >> { %v395_v44 = vld [vmem:[%s389_s11] sm:$0x3]  ;;  %v414_v53 = vmul.f32 %v413_v51, %v413_v51 }
 0x2d2   : >> { %v396_v46 = vsel %vm1391_vm2, %v395_v44, 0.0  ;;  %v429_v48 = vld [vmem:[%s423_s14] sm:$0x3]  ;;  %v382_v56 = vsel %vm381_vm7, 0.0, %v378_v49 }
 0x2d3   : >> { %v397_v50 = vmul.f32 %v396_v46, %v396_v46  ;;  %v430_v52 = vsel %vm1391_vm2, %v429_v48, 0.0 }
 0x2d4   : >> { %v431_v55 = vmul.f32 %v430_v52, %v430_v52 }
 0x2d5   : >> { %v399_v54 = vadd.f32 %v397_v50, %v378_v49  ;;  %v398_v57 = vadd.f32 %v397_v50, %v382_v56 }
 0x2d6   : >> { %v435_v60 = vsel %vm434_vm8, 0.0, %v431_v55 }
 0x2d7   : >> { %v416_v58 = vadd.f32 %v414_v53, %v399_v54  ;;  %v415_v59 = vadd.f32 %v414_v53, %v398_v57 }
 0x2d9   : >> { %v437_v61 = vadd.f32 %v431_v55, %v416_v58  ;;  %v436_v62 = vadd.f32 %v435_v60, %v415_v59 }
 0x2db   : >> { %438 = vadd.xlane.f32.xlu0 %v437_v61 }
 0x2df   : >> { %446 = vadd.xlane.f32.xlu0 %v436_v62 }
 0x368   : >> { %v439_v63 = vpop.xlane.xlu0 %438 }
 0x369   : >> { %v440_v0 = vrot.slane %v439_v63, 4 }
 0x36b   : >> { %v441_v1 = vadd.f32 %v440_v0, %v439_v63 }
 0x36c   : >> { %v447_v2 = vpop.xlane.xlu0 %446 }
 0x36d   : >> { %v442_v3 = vrot.slane %v441_v1, 2  ;;  %v448_v4 = vrot.slane %v447_v2, 4 }
 0x36f   : >> { %v449_v5 = vadd.f32 %v448_v4, %v447_v2  ;;  %v443_v8 = vadd.f32 %v442_v3, %v441_v1 }
 0x371   : >> { %v450_v9 = vrot.slane %v449_v5, 2  ;;  %v444_v11 = vrot.slane %v443_v8, 1 }
 0x373   : >> { %v451_v10 = vadd.f32 %v450_v9, %v449_v5  ;;  %v445_v14 = vadd.f32 %v444_v11, %v443_v8 }
 0x375   : >> { %v452_v12 = vrot.slane %v451_v10, 1 }
 0x377   : >> { %v453_v13 = vadd.f32 %v452_v12, %v451_v10 }
 0x379   : >> { %1556 = vpush %v453_v13 }
 0x37a   : >> { %1558 = vpush %v445_v14 }
 0x3aa   : >> { %s1557_s20 = spop %1556 }
 0x3ab   : >> { %s1559_s15 = spop %1558 }
 0x3ac   : >> { %s456_s24 = smul.f32 1e-10, %s1559_s15 }
 0x3ae   : >> { %p457_p11 = scmp.le.f32.partialorder %s1557_s20, %s456_s24 }
 0x3b0   : >> { %p459_p12 = por %p458_p10, %p457_p11 }
 0x3b2   : > { %907 = sbr.rel (!%p459_p12) target bundleno = 278 (0x116), region = 473 }
 0x3b9 PF: > { %s912_s23 = smov [#allocation20]  ;;  %v916_v6 = vmov %v1761_v6  ;;  %v919_v7 = vmov %v1763_v7  ;;  %v967_v15 = vld [vmem:[#allocation12] sm:$0x3]  ;;  %v973_v16 = vld [vmem:[#allocation14] sm:$0x3]  ;;  %s2043_s17 = scalar_lea.vmem [#allocation13], %s1757_s28 }
 0x3ba   : > { %v936_v6 = vmov %v1761_v6  ;;  %v939_v7 = vmov %v1763_v7  ;;  %v920_v17 = vld [vmem:[%s912_s23] sm:$0x3]  ;;  %vm923_vm9 = vcmp.eq.s32.totalorder %v919_v7, %v916_v6  ;;  %969 = vst [vmem:[%s2043_s17] sm:$0x3] %v967_v15  ;;  %s2044_s27 = scalar_lea.vmem [#allocation15], %s1757_s28  ;;  %s932_s29 = smov [#allocation23] }
 0x3bb   : > { %vm943_vm10 = vcmp.eq.s32.totalorder %v939_v7, %v936_v6  ;;  %975 = vst [vmem:[%s2044_s27] sm:$0x3] %v973_v16  ;;  %v979_v18 = vld [vmem:[#allocation16] sm:$0x3]  ;;  %v924_v19 = vsel %vm923_vm9, %v920_v17, 0.0  ;;  %s2045_s16 = scalar_lea.vmem [#allocation17], %s1757_s28  ;;  %s2046_s30 = scalar_lea.vmem [#allocation19], %s1757_s28 }
 0x3bc   : > { %981 = vst [vmem:[%s2045_s16] sm:$0x3] %v979_v18  ;;  %v985_v20 = vld [vmem:[#allocation18] sm:$0x3]  ;;  %v925_v21 = vrot.slane %v924_v19, 4  ;;  %v940_v22 = vld [vmem:[%s932_s29] sm:$0x3] }
 0x3bd   : > { %987 = vst [vmem:[%s2046_s30] sm:$0x3] %v985_v20  ;;  %v944_v23 = vsel %vm943_vm10, %v940_v22, 0.0  ;;  %s908_s21 = sand.u32 7, %s1720_s12   ;;  %s2047_s11 = scalar_lea.vmem [#allocation9], %s1759_s18 }
 0x3be   : > { %v926_v24 = vadd.f32 %v925_v21, %v924_v19  ;;  %v945_v25 = vrot.slane %v944_v23, 4  ;;  %s909_s25 = scalar_lea.vmem [#allocation8], %s908_s21  ;;  %s911_s26 = scalar_lea.vmem [#allocation10], %s908_s21 }
 0x3bf   : > { %s913_s25 = smov %s909_s25  ;;  %s933_s26 = smov %s911_s26 }
 0x3c0   : > { %v927_v26 = vrot.slane %v926_v24, 2  ;;  %v946_v6 = vadd.f32 %v945_v25, %v944_v23  ;;  %s2048_s22 = scalar_lea.vmem [#allocation11], %s1759_s18  ;;  %s1015_s14 = sshrl.u32 (%p1734_p3), %s1720_s12, 3 }
 0x3c1   : > { %s2049_s20 = scalar_lea.vmem (%p1734_p3), [#allocation9], %s1759_s18  ;;  %s1544_s15 = sshll.u32 (%p1734_p3), %s1015_s14, 1 }
 0x3c2   : > { %v928_v7 = vadd.f32 %v927_v26, %v926_v24  ;;  %v947_v27 = vrot.slane %v946_v6, 2  ;;  %s1017_s17 = scalar_lea.vmem (%p1734_p3), %s2034_s4, %s1544_s15 }
 0x3c4   : > { %v929_v28 = vrot.slane %v928_v7, 1  ;;  %v948_v29 = vadd.f32 %v947_v27, %v946_v6 }
 0x3c6   : > { %v930_v30 = vadd.f32 %v929_v28, %v928_v7  ;;  %v949_v31 = vrot.slane %v948_v29, 1 }
 0x3c8   : > { %931 = vst [vmem:[%s913_s25] sm:$0x1] %v930_v30  ;;  %v950_v32 = vadd.f32 %v949_v31, %v948_v29 }
 0x3ca   : > { %951 = vst [vmem:[%s933_s26] sm:$0x1] %v950_v32 }
 0x3cc   : > { %1014 = sbr.rel (!%p1734_p3) target bundleno = 985 (0x3d9), region = 158 }
 0x3cf   : > { %v955_v33 = vld [vmem:[#allocation8] sm:$0x3] }
 0x3d0   : > { %957 = vst [vmem:[%s2047_s11] sm:$0x3] %v955_v33 }
 0x3d1   : > { %v961_v34 = vld [vmem:[#allocation10] sm:$0x3] }
 0x3d2   : > { %963 = vst [vmem:[%s2048_s22] sm:$0x3] %v961_v34 }
 0x3d7   : > { %v1033_v35 = vld [vmem:[%s2049_s20] sm:$0x3] }
 0x3d8   : > { %1034 = vst [vmem:[%s1017_s17] sm:$0x3] %v1033_v35 }
 0x3d9 PF: > { %1051 = sbr.rel (!%p1734_p3) target bundleno = 993 (0x3e1), region = 192  ;;  %s1052_s27 = sshrl.u32 (%p1734_p3), %s1720_s12, 3 }
 0x3da   : > { %s2050_s29 = scalar_lea.vmem (%p1734_p3), [#allocation11], %s1759_s18  ;;  %s1545_s16 = sshll.u32 (%p1734_p3), %s1052_s27, 1 }
 0x3db   : > { %s1054_s25 = scalar_lea.vmem (%p1734_p3), %s2035_s5, %s1545_s16 }
 0x3df   : > { %v1070_v36 = vld [vmem:[%s2050_s29] sm:$0x3] (%p1734_p3) }
 0x3e0   : > { %1071 = vst [vmem:[%s1054_s25] sm:$0x3] %v1070_v36 }
 0x3e1 PF: > { %s1546_s26 = sshll.u32 %s1720_s12, 1  ;;  %s2051_s19 = scalar_lea.vmem [#allocation13], %s1757_s28 }
 0x3e2   : > { %v1103_v37 = vld [vmem:[%s2051_s19] sm:$0x3]  ;;  %s2052_s11 = scalar_lea.vmem [#allocation15], %s1757_s28  ;;  %s1087_s14 = scalar_lea.vmem %s2036_s6, %s1546_s26 }
 0x3e3   : > { %v1136_v38 = vld [vmem:[%s2052_s11] sm:$0x3]  ;;  %s1120_s24 = scalar_lea.vmem %s2037_s7, %s1546_s26  ;;  %s2053_s23 = scalar_lea.vmem [#allocation17], %s1757_s28  ;;  %1104 = vst [vmem:[%s1087_s14] sm:$0x3] %v1103_v37 }
 0x3e4   : > { %v1169_v39 = vld [vmem:[%s2053_s23] sm:$0x3]  ;;  %s2054_s17 = scalar_lea.vmem [#allocation19], %s1757_s28  ;;  %1137 = vst [vmem:[%s1120_s24] sm:$0x3] %v1136_v38  ;;  %s1153_s29 = scalar_lea.vmem %s2038_s8, %s1546_s26 }
 0x3e5   : > { %v1202_v40 = vld [vmem:[%s2054_s17] sm:$0x3]  ;;  %s1186_s21 = scalar_lea.vmem %s2039_s9, %s1546_s26  ;;  %1170 = vst [vmem:[%s1153_s29] sm:$0x3] %v1169_v39 }
 0x3e6   : > { %1203 = vst [vmem:[%s1186_s21] sm:$0x3] %v1202_v40 }
 0x3e7 PF: > { %s2055_s25 = sld [smem:[#allocation33_spill]]  ;;  %p13_p13 = scmp.ge.s32.totalorder %s1723_s13, 4  }
 0x3e8   : > { %s2056_s30 = smov %s1637_s10  ;;  %s2058_s11 = smov %s1723_s13 }
 0x3e9   :  { %15 = sbr.rel (!%p13_p13) target bundleno = 2 (0x2), region = 484 }
 0x3ed   : > { %s2057_s10 = smov %s2055_s25 }

// kernel: reverse
= control target key start
LH: loop header
LB: loop body
LE: loop exit
PB: predicated region body
PF: predicated region fallthrough
CT: control target
= control target key end

     0   :  { %v2_v0 = vlaneseq  ;;  %s105_s0 = inlined_call_operand.vmem [shape: f32[2,4], index: 0, kind: input, shape index: {}]   ;;  %s106_s1 = inlined_call_operand.vmem [shape: f32[2,4], index: 1, kind: output, shape index: {}]  }
   0x2   :  { %v3_v1 = vsub.s32 3, %v2_v0 }
   0x4   :  { %4 = vset.pattern.permute.xlu0 %v3_v1 }
   0x5   :  { %v20_v2 = vld [vmem:[%s105_s0] sm:$0x3] }
   0x6   :  { %21 = vst [vmem:[#allocation1] sm:$0x3] %v20_v2 }
   0xd   :  { %v38_v3 = vld [vmem:[#allocation1] sm:$0x3] }
   0xe   :  { %39 = vst [vmem:[#allocation0] sm:$0x3] %v38_v3 }
  0x15   :  { %v40_v4 = vld [vmem:[#allocation0] sm:$0xff] }
  0x16   :  { %41 = vperm.xlu0 %4, %v40_v4  }
  0x95   :  { %v42_v5 = vpop.permute.xlu0 %41 }
  0x96   :  { %43 = vst [vmem:[#allocation2] sm:$0xff] %v42_v5 }
  0x9d   :  { %v47_v6 = vld [vmem:[#allocation2] sm:$0x3] }
  0x9e   :  { %49 = vst [vmem:[#allocation3] sm:$0x3] %v47_v6 }
  0xa5   :  { %v65_v7 = vld [vmem:[#allocation3] sm:$0x3] }
  0xa6   :  { %66 = vst [vmem:[%s106_s1] sm:$0x3] %v65_v7 }

// kernel: tile.0
= control target key start
LH: loop header
LB: loop body
LE: loop exit
PB: predicated region body
PF: predicated region fallthrough
CT: control target
= control target key end

     0   :  { %vm3_vm0 = vcmask 7168   ;;  %s247_s12 = smov 127   ;;  %s248_s21 = smov 126   ;;  %s454_s0 = inlined_call_operand.vmem [shape: s32[17,8], index: 0, kind: input, shape index: {}]   ;;  %s455_s1 = inlined_call_operand.vmem [shape: s32[136,1], index: 1, kind: output, shape index: {}]  }
   0x1   :  { %v18_v0 = vld [vmem:[%s454_s0] sm:$0xff]   ;;  %v196_v1 = vld [vmem:[%s454_s0 + $0x10] sm:$0x1]   ;;  %v193_v2 = vld [vmem:[%s454_s0 + $0x8] sm:$0xff]   ;;  %s249_s24 = smov 125   ;;  %s250_s27 = smov 124  }
   0x2   :  { %19 = vrot.lane.b32.xlu0 %v18_v0, %s247_s12  ;;  %37 = vrot.lane.b32.xlu1 %v196_v1, %s247_s12  ;;  %4 = vst.msk [vmem:[%s455_s1] ss:$8 sm:$0xf] %vm3_vm0, %v18_v0   ;;  %5 = vst.msk [vmem:[%s455_s1] ss:$8 sm:$0xf0] %vm3_vm0, %v18_v0  }
   0x3   :  { %187 = vst.msk [vmem:[%s455_s1 + $0x40] ss:$8 sm:$0xf] %vm3_vm0, %v193_v2   ;;  %188 = vst.msk [vmem:[%s455_s1 + $0x40] ss:$8 sm:$0xf0] %vm3_vm0, %v193_v2  }
   0x4   :  { %v203_v3 = vld [vmem:[%s454_s0 + $0x10] sm:$0x1]   ;;  %s251_s30 = smov 123   ;;  %s252_s8 = smov 122  }
   0x5   :  { %v210_v4 = vld [vmem:[%s454_s0 + $0x10] sm:$0x1]   ;;  %s253_s11 = smov 121  }
   0x6   :  { %28 = vrot.lane.b32.xlu0 %v193_v2, %s247_s12  ;;  %43 = vrot.lane.b32.xlu1 %v18_v0, %s248_s21  ;;  %v217_v5 = vld [vmem:[%s454_s0 + $0x10] sm:$0x1]  }
   0x7   :  { %v224_v6 = vld [vmem:[%s454_s0 + $0x10] sm:$0x1]  }
   0x8   :  { %v189_v7 = vld [vmem:[%s454_s0 + $0x10] sm:$0x1]  }
   0x9   :  { %190 = vst.msk [vmem:[%s455_s1 + $0x80] sm:$0x1] %vm3_vm0, %v189_v7   ;;  %v231_v8 = vld [vmem:[%s454_s0 + $0x10] sm:$0x1]  }
   0xa   :  { %52 = vrot.lane.b32.xlu0 %v193_v2, %s248_s21  ;;  %61 = vrot.lane.b32.xlu1 %v203_v3, %s248_s21  ;;  %v238_v9 = vld [vmem:[%s454_s0 + $0x10] sm:$0x1]  }
   0xe   :  { %67 = vrot.lane.b32.xlu0 %v18_v0, %s249_s24  ;;  %76 = vrot.lane.b32.xlu1 %v193_v2, %s249_s24 }
  0x12   :  { %85 = vrot.lane.b32.xlu0 %v210_v4, %s249_s24  ;;  %91 = vrot.lane.b32.xlu1 %v18_v0, %s250_s27 }
  0x16   :  { %100 = vrot.lane.b32.xlu0 %v193_v2, %s250_s27  ;;  %109 = vrot.lane.b32.xlu1 %v217_v5, %s250_s27 }
  0x1a   :  { %115 = vrot.lane.b32.xlu0 %v18_v0, %s251_s30  ;;  %124 = vrot.lane.b32.xlu1 %v193_v2, %s251_s30 }
  0x1e   :  { %133 = vrot.lane.b32.xlu0 %v224_v6, %s251_s30  ;;  %139 = vrot.lane.b32.xlu1 %v18_v0, %s252_s8 }
  0x22   :  { %148 = vrot.lane.b32.xlu0 %v193_v2, %s252_s8  ;;  %157 = vrot.lane.b32.xlu1 %v231_v8, %s252_s8 }
  0x26   :  { %163 = vrot.lane.b32.xlu0 %v18_v0, %s253_s11  ;;  %172 = vrot.lane.b32.xlu1 %v193_v2, %s253_s11 }
  0x2a   :  { %181 = vrot.lane.b32.xlu0 %v238_v9, %s253_s11 }
  0x74   :  { %v20_v10 = vpop.permute.xlu0 %19   ;;  %v38_v11 = vpop.permute.xlu1 %37  }
  0x75   :  { %191 = vst.msk [vmem:[%s455_s1 + $0x1] ss:$8 sm:$0xf] %vm3_vm0, %v20_v10   ;;  %192 = vst.msk [vmem:[%s455_s1 + $0x1] ss:$8 sm:$0xf0] %vm3_vm0, %v20_v10  }
  0x76   :  { %197 = vst.msk [vmem:[%s455_s1 + $0x81] sm:$0x1] %vm3_vm0, %v38_v11  }
  0x78   :  { %v29_v12 = vpop.permute.xlu0 %28   ;;  %v44_v13 = vpop.permute.xlu1 %43  }
  0x79   :  { %194 = vst.msk [vmem:[%s455_s1 + $0x41] ss:$8 sm:$0xf] %vm3_vm0, %v29_v12   ;;  %195 = vst.msk [vmem:[%s455_s1 + $0x41] ss:$8 sm:$0xf0] %vm3_vm0, %v29_v12  }
  0x7a   :  { %198 = vst.msk [vmem:[%s455_s1 + $0x2] ss:$8 sm:$0xf] %vm3_vm0, %v44_v13   ;;  %199 = vst.msk [vmem:[%s455_s1 + $0x2] ss:$8 sm:$0xf0] %vm3_vm0, %v44_v13  }
  0x7c   :  { %v53_v14 = vpop.permute.xlu0 %52   ;;  %v62_v15 = vpop.permute.xlu1 %61  }
  0x7d   :  { %201 = vst.msk [vmem:[%s455_s1 + $0x42] ss:$8 sm:$0xf] %vm3_vm0, %v53_v14   ;;  %202 = vst.msk [vmem:[%s455_s1 + $0x42] ss:$8 sm:$0xf0] %vm3_vm0, %v53_v14  }
  0x7e   :  { %204 = vst.msk [vmem:[%s455_s1 + $0x82] sm:$0x1] %vm3_vm0, %v62_v15  }
  0x80   :  { %v68_v16 = vpop.permute.xlu0 %67   ;;  %v77_v17 = vpop.permute.xlu1 %76  }
  0x81   :  { %205 = vst.msk [vmem:[%s455_s1 + $0x3] ss:$8 sm:$0xf] %vm3_vm0, %v68_v16   ;;  %206 = vst.msk [vmem:[%s455_s1 + $0x3] ss:$8 sm:$0xf0] %vm3_vm0, %v68_v16  }
  0x82   :  { %208 = vst.msk [vmem:[%s455_s1 + $0x43] ss:$8 sm:$0xf] %vm3_vm0, %v77_v17   ;;  %209 = vst.msk [vmem:[%s455_s1 + $0x43] ss:$8 sm:$0xf0] %vm3_vm0, %v77_v17  }
  0x84   :  { %v86_v18 = vpop.permute.xlu0 %85   ;;  %v92_v19 = vpop.permute.xlu1 %91  }
  0x85   :  { %211 = vst.msk [vmem:[%s455_s1 + $0x83] sm:$0x1] %vm3_vm0, %v86_v18   ;;  %212 = vst.msk [vmem:[%s455_s1 + $0x4] ss:$8 sm:$0xf] %vm3_vm0, %v92_v19  }
  0x86   :  { %213 = vst.msk [vmem:[%s455_s1 + $0x4] ss:$8 sm:$0xf0] %vm3_vm0, %v92_v19  }
  0x88   :  { %v101_v20 = vpop.permute.xlu0 %100   ;;  %v110_v21 = vpop.permute.xlu1 %109  }
  0x89   :  { %215 = vst.msk [vmem:[%s455_s1 + $0x44] ss:$8 sm:$0xf] %vm3_vm0, %v101_v20   ;;  %216 = vst.msk [vmem:[%s455_s1 + $0x44] ss:$8 sm:$0xf0] %vm3_vm0, %v101_v20  }
  0x8a   :  { %218 = vst.msk [vmem:[%s455_s1 + $0x84] sm:$0x1] %vm3_vm0, %v110_v21  }
  0x8c   :  { %v116_v22 = vpop.permute.xlu0 %115   ;;  %v125_v23 = vpop.permute.xlu1 %124  }
  0x8d   :  { %219 = vst.msk [vmem:[%s455_s1 + $0x5] ss:$8 sm:$0xf] %vm3_vm0, %v116_v22   ;;  %220 = vst.msk [vmem:[%s455_s1 + $0x5] ss:$8 sm:$0xf0] %vm3_vm0, %v116_v22  }
  0x8e   :  { %222 = vst.msk [vmem:[%s455_s1 + $0x45] ss:$8 sm:$0xf] %vm3_vm0, %v125_v23   ;;  %223 = vst.msk [vmem:[%s455_s1 + $0x45] ss:$8 sm:$0xf0] %vm3_vm0, %v125_v23  }
  0x90   :  { %v134_v24 = vpop.permute.xlu0 %133   ;;  %v140_v25 = vpop.permute.xlu1 %139  }
  0x91   :  { %225 = vst.msk [vmem:[%s455_s1 + $0x85] sm:$0x1] %vm3_vm0, %v134_v24   ;;  %226 = vst.msk [vmem:[%s455_s1 + $0x6] ss:$8 sm:$0xf] %vm3_vm0, %v140_v25  }
  0x92   :  { %227 = vst.msk [vmem:[%s455_s1 + $0x6] ss:$8 sm:$0xf0] %vm3_vm0, %v140_v25  }
  0x94   :  { %v149_v26 = vpop.permute.xlu0 %148   ;;  %v158_v27 = vpop.permute.xlu1 %157  }
  0x95   :  { %229 = vst.msk [vmem:[%s455_s1 + $0x46] ss:$8 sm:$0xf] %vm3_vm0, %v149_v26   ;;  %230 = vst.msk [vmem:[%s455_s1 + $0x46] ss:$8 sm:$0xf0] %vm3_vm0, %v149_v26  }
  0x96   :  { %232 = vst.msk [vmem:[%s455_s1 + $0x86] sm:$0x1] %vm3_vm0, %v158_v27  }
  0x98   :  { %v164_v28 = vpop.permute.xlu0 %163   ;;  %v173_v29 = vpop.permute.xlu1 %172  }
  0x99   :  { %233 = vst.msk [vmem:[%s455_s1 + $0x7] ss:$8 sm:$0xf] %vm3_vm0, %v164_v28   ;;  %234 = vst.msk [vmem:[%s455_s1 + $0x7] ss:$8 sm:$0xf0] %vm3_vm0, %v164_v28  }
  0x9a   :  { %236 = vst.msk [vmem:[%s455_s1 + $0x47] ss:$8 sm:$0xf] %vm3_vm0, %v173_v29   ;;  %237 = vst.msk [vmem:[%s455_s1 + $0x47] ss:$8 sm:$0xf0] %vm3_vm0, %v173_v29  }
  0x9c   :  { %v182_v30 = vpop.permute.xlu0 %181  }
  0x9d   :  { %239 = vst.msk [vmem:[%s455_s1 + $0x87] sm:$0x1] %vm3_vm0, %v182_v30  }

// kernel: forward.3
= control target key start
LH: loop header
LB: loop body
LE: loop exit
PB: predicated region body
PF: predicated region fallthrough
CT: control target
= control target key end

     0   :  { %s781_s18 = smov 0   ;;  %s783_s19 = smov 0   ;;  %s881_s0 = inlined_call_operand.vmem [shape: f32[8,3,64], index: 0, kind: input, shape index: {}]   ;;  %s882_s1 = inlined_call_operand.vmem [shape: f32[48,3], index: 1, kind: input, shape index: {}]   ;;  %s883_s2 = inlined_call_operand.vmem [shape: f32[48,1], index: 2, kind: input, shape index: {}]   ;;  %s884_s3 = inlined_call_operand.vmem [shape: f32[17,48], index: 3, kind: input, shape index: {}]   ;;  %s885_s4 = inlined_call_operand.vmem [shape: f32[17,1], index: 4, kind: input, shape index: {}]   ;;  %s886_s5 = inlined_call_operand.vmem [shape: f32[8,17,64], index: 5, kind: output, shape index: {}]  }
   0x1   :  { %s785_s20 = smov 0  }
   0x2 LB: > { %s27_s21 = sadd.s32 1, %s741_s19  ;;  %p614_p0 = scmp.ge.s32.totalorder %s745_s20, 1  ;;  %s745_s20 = sphi %s785_s20, %s15_s20   ;;  %s741_s19 = sphi %s783_s19, %s888_s19   ;;  %s737_s18 = sphi %s781_s18, %s887_s18  }
   0x3   : > { %p29_p1 = scmp.ge.s32.totalorder %s27_s21, 8  ;;  %p205_p2 = scmp.lt.s32.totalorder %s745_s20, 9 }
   0x5   : > { %s890_s21 = smov (%p29_p1, %s27_s21), 0  ;;  %p206_p3 = pnand %p614_p0, %p205_p2 }
   0x6   : > { %p238_p4 = scmp.lt.s32.totalorder (!%p206_p3), %s737_s18, 7  ;;  %v254_v0 = vld [vmem:[%s882_s1] sm:$0xff] (!%p206_p3)  ;;  %vm296_vm0 = vcmask (!%p206_p3), 23552   ;;  %v747_v1 = vmov (!%p206_p3), 0   ;;  %v262_v3 = vld [vmem:[%s883_s2 + $0x10] sm:$0xff] (!%p206_p3)  ;;  %vm315_vm1 = vcmask (!%p206_p3), 1042432  }
   0x7   : > { %209 = sbr.rel (%p206_p3) target bundleno = 467 (0x1d3), region = 40  ;;  %647 = vmatprep.mubr.msk.f32.mxu0 (!%p206_p3), %vm296_vm0, %v254_v0  ;;  %721 = vset.pattern.permute.xlu0 (!%p206_p3), %v747_v1  ;;  %v260_v2 = vld [vmem:[%s883_s2] sm:$0xff] (!%p206_p3)  ;;  %v261_v4 = vld [vmem:[%s883_s2 + $0x8] sm:$0xff] (!%p206_p3)  ;;  %v263_v5 = vld [vmem:[%s883_s2 + $0x18] sm:$0xff] (!%p206_p3)  ;;  %v748_v17 = vmov (!%p206_p3), 0.0|0.0   ;;  %vm749_vm2 = vmmov (!%p206_p3), 0  }
   0x8   : > { %722 = vset.pattern.permute.xlu1 (!%p206_p3), %v747_v1  ;;  %268 = vperm.xlu0 (!%p206_p3), %721, %v260_v2   ;;  %v255_v7 = vld [vmem:[%s882_s1 + $0x8] sm:$0xff] (!%p206_p3)  ;;  %v256_v8 = vld [vmem:[%s882_s1 + $0x10] sm:$0xff] (!%p206_p3)  ;;  %v264_v9 = vld [vmem:[%s883_s2 + $0x20] sm:$0xff] (!%p206_p3)  ;;  %v750_v18 = vmov (!%p206_p3), 0.0   ;;  %vm435_vm3 = vcmask (!%p206_p3), 392192   ;;  %vm525_vm4 = vcmask (!%p206_p3), 523264  }
   0x9   : > { %278 = vperm.xlu1 (!%p206_p3), %722, %v262_v3   ;;  %v265_v10 = vld [vmem:[%s883_s2 + $0x28] sm:$0xff] (!%p206_p3)  ;;  %v257_v11 = vld [vmem:[%s882_s1 + $0x18] sm:$0xff] (!%p206_p3)  ;;  %v258_v12 = vld [vmem:[%s882_s1 + $0x20] sm:$0xff] (!%p206_p3)  ;;  %686 = vmatprep.subr.bf16.mxu1 (!%p206_p3), %v748_v17  ;;  %vm528_vm5 = vcmask (!%p206_p3), 516096  }
   0xa   : > { %v417_v13 = vld [vmem:[%s885_s4] sm:$0xff] (!%p206_p3)  ;;  %v418_v14 = vld [vmem:[%s885_s4 + $0x8] sm:$0xff] (!%p206_p3)  ;;  %v419_v16 = vld [vmem:[%s885_s4 + $0x10] sm:$0x1] (!%p206_p3)  ;;  %671 = vmatprep.mubr.msk.f32.mxu1 (!%p206_p3), %vm749_vm2, %v750_v18 }
   0xb   : > { %v259_v15 = vld [vmem:[%s882_s1 + $0x28] sm:$0xff] (!%p206_p3)  ;;  %v414_v40 = vld [vmem:[%s884_s3] sm:$0xff] (!%p206_p3)  ;;  %v416_v42 = vld [vmem:[%s884_s3 + $0x10] sm:$0x1] (!%p206_p3) }
   0xc   : > { %273 = vperm.xlu0 (!%p206_p3), %721, %v261_v4   ;;  %v415_v41 = vld [vmem:[%s884_s3 + $0x8] sm:$0xff] (!%p206_p3) }
   0xd   : > { %283 = vperm.xlu1 (!%p206_p3), %722, %v263_v5  }
   0xe   : > { %s892_s18 = smov (!%p238_p4, %s737_s18), 7 }
   0xf   : > { %s615_s28 = sshll.u32 %s892_s18, 2  ;;  %s692_s16 = smul.u32 24, %s892_s18 }
  0x10   : > { %s244_s8 = scalar_lea.vmem %s881_s0, %s615_s28  ;;  %288 = vperm.xlu0 %721, %v264_v9  }
  0x11   : > { %v253_v6 = vld [vmem:[%s244_s8] sm:$0x7]  ;;  %293 = vperm.xlu1 %722, %v265_v10   ;;  %s252_s23 = scalar_lea.vmem %s886_s5, %s692_s16 }
  0x12   : > { %645 = vmatprep.subr.msk.mxu0 %vm315_vm1, %v253_v6 }
  0x13   : > { %646 = vmatpush3.msk.msra.mxu0 %vm315_vm1, %v253_v6 }
  0x14   : > { %648 = vmatmul.mubr.msk.f32.vlgmr.msra.gmra.mrb[0].mxu0 %vm296_vm0, %v255_v7  ;;  %422 = vperm.xlu0 %721, %v417_v13  }
  0x15   : > { %650 = vmatprep.mubr.msk.f32.mxu0 %vm296_vm0, %v256_v8  ;;  %427 = vperm.xlu1 %722, %v418_v14  }
  0x16   : > { %677 = vmatprep.subr.bf16.mxu0 %v748_v17 }
  0x18   : > { %651 = vmatmul.mubr.msk.f32.gmra.mrb[2].mxu0 %vm296_vm0, %v257_v11  ;;  %432 = vperm.xlu0 %721, %v419_v16  }
  0x19   : > { %653 = vmatprep.mubr.msk.f32.mxu0 %vm296_vm0, %v258_v12 }
  0x1c   : > { %654 = vmatmul.mubr.msk.f32.gmra.mrb[4].mxu0 %vm296_vm0, %v259_v15 }
  0x1d   : > { %668 = vmatprep.mubr.msk.f32.mxu0 %vm749_vm2, %v750_v18 }
  0x87   : > { %v269_v19 = vpop.permute.xlu0 %268 }
  0x88   : > { %v279_v20 = vpop.permute.xlu1 %278 }
  0x8b   : > { %v274_v21 = vpop.permute.xlu0 %273 }
  0x8c   : > { %v284_v25 = vpop.permute.xlu1 %283 }
  0x8f   : > { %v289_v35 = vpop.permute.xlu0 %288 }
  0x90   : > { %v294_v32 = vpop.permute.xlu1 %293 }
  0x93   : > { %v423_v43 = vpop.permute.xlu0 %422 }
  0x94   : > { %v428_v44 = vpop.permute.xlu1 %427 }
  0x97   : > { %v433_v51 = vpop.permute.xlu0 %432 }
  0xe7   : > { %v649_v22 = vpop.f32.mrb[0].mxu0 }
  0xe8   : > { %v391_v23 = vadd.f32 %v649_v22, %v274_v21  ;;  %v385_v24 = vpop.f32.mrb[1].mxu0 }
  0xe9   : > { %v386_v26 = vadd.f32 %v385_v24, %v269_v19 }
  0xeb   : > { %v678_v27 = vpack.c.bf16 %v391_v23, %v386_v26  ;;  %v652_v28 = vpop.f32.mrb[2].mxu0 }
  0xec   : > { %v401_v29 = vadd.f32 %v652_v28, %v284_v25  ;;  %v395_v30 = vpop.f32.mrb[3].mxu0 }
  0xed   : > { %v396_v31 = vadd.f32 %v395_v30, %v279_v20  ;;  %679 = vmatpush3.bf16.msra.mxu0 %v678_v27  ;;  %689 = vmatpush3.bf16.msra.mxu1 %v678_v27 }
  0xee   : > { %680 = vmatprep.subr.bf16.mxu0 %v748_v17  ;;  %687 = vmatprep.subr.bf16.mxu1 %v748_v17 }
  0xef   : > { %v681_v33 = vpack.c.bf16 %v401_v29, %v396_v31  ;;  %v655_v34 = vpop.f32.mrb[4].mxu0 }
  0xf0   : > { %v411_v36 = vadd.f32 %v655_v34, %v294_v32  ;;  %v405_v37 = vpop.f32.mrb[5].mxu0 }
  0xf1   : > { %v406_v38 = vadd.f32 %v405_v37, %v289_v35  ;;  %682 = vmatpush3.bf16.msra.mxu0 %v681_v33  ;;  %690 = vmatpush3.bf16.msra.mxu1 %v681_v33 }
  0xf2   : > { %683 = vmatprep.subr.bf16.mxu0 %v748_v17  ;;  %688 = vmatprep.subr.bf16.mxu1 %v748_v17 }
  0xf3   : > { %v684_v39 = vpack.c.bf16 %v411_v36, %v406_v38 }
  0xf5   : > { %685 = vmatpush3.bf16.msra.mxu0 %v684_v39  ;;  %691 = vmatpush3.bf16.msra.mxu1 %v684_v39 }
  0xf8   : > { %669 = vmatmul.mubr.msk.f32.vlgmr.msra.gmra.mrb[6].mxu0 %vm435_vm3, %v414_v40  ;;  %672 = vmatmul.mubr.msk.f32.vlgmr.msra.gmra.mrb[0].mxu1 %vm435_vm3, %v415_v41 }
  0xf9   : > { %674 = vmatprep.mubr.msk.f32.mxu1 %vm749_vm2, %v750_v18 }
  0xfc   : > { %675 = vmatmul.mubr.msk.f32.gmra.mrb[2].mxu1 %vm435_vm3, %v416_v42 }
 0x1cb   : > { %v511_v45 = vpop.f32.mrb[6].mxu0  ;;  %v516_v46 = vpop.f32.mrb[0].mxu1 }
 0x1cc   : > { %v512_v47 = vadd.f32 %v511_v45, %v423_v43  ;;  %v517_v48 = vadd.f32 %v516_v46, %v428_v44  ;;  %v673_v49 = vpop.f32.mrb[1].mxu1  ;;  %v670_v50 = vpop.f32.mrb[7].mxu0 }
 0x1ce   : > { %526 = vst.msk [vmem:[%s252_s23] sm:$0xff] %vm525_vm4, %v512_v47  ;;  %527 = vst.msk [vmem:[%s252_s23 + $0x8] sm:$0xff] %vm525_vm4, %v517_v48 }
 0x1cf   : > { %v521_v52 = vpop.f32.mrb[2].mxu1 }
 0x1d0   : > { %v522_v53 = vadd.f32 %v521_v52, %v433_v51  ;;  %v676_v54 = vpop.f32.mrb[3].mxu1 }
 0x1d2   : > { %529 = vst.msk [vmem:[%s252_s23 + $0x10] sm:$0x1] %vm528_vm5, %v522_v53 }
 0x1d3 PF: > { %s15_s20 = sadd.s32 1, %s745_s20   ;;  %s887_s18 = smov %s741_s19 }
 0x1d4   : > { %p12_p5 = scmp.ge.s32.totalorder %s15_s20, 10   ;;  %s888_s19 = smov %s890_s21 }
 0x1d6   :  { %14 = sbr.rel (!%p12_p5) target bundleno = 2 (0x2), region = 70 }

// kernel: forward.5
= control target key start
LH: loop header
LB: loop body
LE: loop exit
PB: predicated region body
PF: predicated region fallthrough
CT: control target
= control target key end

     0   :  { %s977_s18 = smov 0   ;;  %s1059_s0 = inlined_call_operand.vmem [shape: f32[2,17,512], index: 0, kind: input, shape index: {}]   ;;  %s1060_s1 = inlined_call_operand.vmem [shape: f32[17,17], index: 1, kind: input, shape index: {}]   ;;  %s1061_s2 = inlined_call_operand.vmem [shape: f32[17,1], index: 2, kind: input, shape index: {}]   ;;  %s1062_s3 = inlined_call_operand.vmem [shape: f32[2,3,512], index: 3, kind: input, shape index: {}]   ;;  %s1063_s4 = inlined_call_operand.vmem [shape: f32[2,17,3], index: 4, kind: output, shape index: {0}]   ;;  %s1064_s5 = inlined_call_operand.vmem [shape: f32[2,17,512], index: 5, kind: output, shape index: {1}]  }
   0x1 LB: > { %s854_s19 = sadd.s32 4294967295, %s943_s18   ;;  %p858_p0 = scmp.ge.s32.totalorder %s943_s18, 1  ;;  %s943_s18 = sphi %s977_s18, %s16_s18  }
   0x2   : > { %p200_p1 = scmp.lt.s32.totalorder %s943_s18, 3 }
   0x4   : > { %p201_p2 = pnand %p858_p0, %p200_p1 }
   0x5   : > { %p238_p3 = scmp.lt.s32.totalorder (!%p201_p2), %s854_s19, 1  ;;  %v945_v0 = vmov (!%p201_p2), 0.0   ;;  %v273_v1 = vld [vmem:[%s1061_s2] sm:$0xff] (!%p201_p2)  ;;  %v946_v2 = vmov (!%p201_p2), 0   ;;  %v275_v3 = vld [vmem:[%s1061_s2 + $0x10] sm:$0x1] (!%p201_p2) }
   0x6   : > { %204 = sbr.rel (%p201_p2) target bundleno = 813 (0x32d), region = 36  ;;  %378 = vmatprep.mubr.f32.mxu1 (!%p201_p2), %v945_v0  ;;  %903 = vset.pattern.permute.xlu0 (!%p201_p2), %v946_v2  ;;  %v274_v4 = vld [vmem:[%s1061_s2 + $0x8] sm:$0xff] (!%p201_p2)  ;;  %vm301_vm0 = vcmask (!%p201_p2), 1040384   ;;  %v270_v18 = vld [vmem:[%s1060_s1] sm:$0xff] (!%p201_p2)  ;;  %vm291_vm1 = vcmask (!%p201_p2), 138240   ;;  %vm749_vm2 = vcmask (!%p201_p2), 23552  }
   0x7   : > { %904 = vset.pattern.permute.xlu1 (!%p201_p2), %v946_v2  ;;  %278 = vperm.xlu0 (!%p201_p2), %903, %v273_v1   ;;  %v271_v21 = vld [vmem:[%s1060_s1 + $0x8] sm:$0xff] (!%p201_p2)  ;;  %v272_v23 = vld [vmem:[%s1060_s1 + $0x10] sm:$0x1] (!%p201_p2)  ;;  %vm752_vm3 = vcmask (!%p201_p2), 16384  }
   0x8   : > { %288 = vperm.xlu1 (!%p201_p2), %904, %v275_v3  }
   0xb   : > { %283 = vperm.xlu0 (!%p201_p2), %903, %v274_v4  }
   0xd   : > { %s1066_s19 = smov (!%p238_p3, %s854_s19), 1 }
   0xe   : > { %s891_s24 = smul.u32 96, %s1066_s19  ;;  %s876_s11 = sshll.u32 %s1066_s19, 4 }
   0xf   : > { %s247_s14 = scalar_lea.vmem %s1062_s3, %s876_s11  ;;  %s892_s20 = smul.u32 24, %s1066_s19 }
  0x10   : > { %s242_s29 = scalar_lea.vmem %s1059_s0, %s891_s24  ;;  %s1038_s17 = scalar_lea.vmem %s1064_s5, %s891_s24 }
  0x11   : > { %v259_v5 = vld [vmem:[%s242_s29 + $0x8] sm:$0xff]  ;;  %v258_v7 = vld [vmem:[%s242_s29] sm:$0xff]  ;;  %v261_v12 = vld [vmem:[%s242_s29 + $0x18] sm:$0xff]  ;;  %s252_s23 = scalar_lea.vmem %s1063_s4, %s892_s20 }
  0x12   : > { %v263_v6 = vld [vmem:[%s242_s29 + $0x28] sm:$0xff]  ;;  %v262_v9 = vld [vmem:[%s242_s29 + $0x20] sm:$0xff]  ;;  %v265_v13 = vld [vmem:[%s242_s29 + $0x38] sm:$0xff] }
  0x13   : > { %v877_v8 = vpack.c.bf16 %v263_v6, %v259_v5  ;;  %v879_v10 = vpack.c.bf16 %v262_v9, %v258_v7  ;;  %v267_v11 = vld [vmem:[%s242_s29 + $0x48] sm:$0x1]  ;;  %v260_v14 = vld [vmem:[%s242_s29 + $0x10] sm:$0xff]  ;;  %v266_v16 = vld [vmem:[%s242_s29 + $0x40] sm:$0x1]  ;;  %v881_v17 = vpack.c.bf16 %v265_v13, %v261_v12 }
  0x14   : > { %v264_v15 = vld [vmem:[%s242_s29 + $0x30] sm:$0xff]  ;;  %v269_v20 = vld [vmem:[%s242_s29 + $0x58] sm:$0x1] }
  0x15   : > { %878 = vmatprep.subr.bf16.mxu1 %v877_v8  ;;  %v883_v19 = vpack.c.bf16 %v264_v15, %v260_v14  ;;  %v268_v22 = vld [vmem:[%s242_s29 + $0x50] sm:$0x1] }
  0x16   : > { %880 = vmatpush1.bf16.msra.mxu1 %v879_v10 }
  0x17   : > { %864 = vmatprep.subr.msk.mxu1 %vm301_vm0, %v267_v11 }
  0x1a   : > { %865 = vmatpush1.msk.msra.mxu1 %vm301_vm0, %v266_v16 }
  0x1b   : > { %866 = vmatmul.mubr.msk.f32.vlgmr.msra.gmra.mrb[0].mxu1 %vm291_vm1, %v270_v18  ;;  %882 = vmatprep.subr.bf16.mxu1 %v881_v17 }
  0x1c   : > { %884 = vmatpush1.bf16.msra.mxu1 %v883_v19  ;;  %384 = vmatprep.mubr.f32.mxu1 %v945_v0 }
  0x1d   : > { %869 = vmatprep.subr.msk.mxu1 %vm301_vm0, %v269_v20 }
  0x1f   : > { %867 = vmatmul.mubr.msk.f32.gmra.mrb[2].mxu1 %vm291_vm1, %v271_v21 }
  0x20   : > { %390 = vmatprep.mubr.f32.mxu1 %v945_v0  ;;  %870 = vmatpush1.msk.msra.mxu1 %vm301_vm0, %v268_v22 }
  0x23   : > { %868 = vmatmul.mubr.msk.f32.gmra.mrb[4].mxu1 %vm291_vm1, %v272_v23 }
  0x24   : > { %461 = vmatprep.mubr.f32.mxu1 %v945_v0 }
  0x27   : > { %871 = vmatmul.mubr.msk.f32.vlgmr.msra.gmra.mrb[6].mxu1 %vm291_vm1, %v270_v18 }
  0x28   : > { %467 = vmatprep.mubr.f32.mxu1 %v945_v0 }
  0x2b   : > { %872 = vmatmul.mubr.msk.f32.gmra.mrb[8].mxu1 %vm291_vm1, %v271_v21 }
  0x2c   : > { %473 = vmatprep.mubr.f32.mxu1 %v945_v0 }
  0x2f   : > { %873 = vmatmul.mubr.msk.f32.gmra.mrb[10].mxu1 %vm291_vm1, %v272_v23 }
  0x86   : > { %v279_v28 = vpop.permute.xlu0 %278 }
  0x87   : > { %v289_v39 = vpop.permute.xlu1 %288 }
  0x8a   : > { %v284_v36 = vpop.permute.xlu0 %283 }
  0xee   : > { %v380_v24 = vpop.f32.mrb[0].mxu1 }
  0xef   : > { %v382_v25 = vpop.f32.mrb[1].mxu1  ;;  %v381_v32 = vadd.f32 %v380_v24, %v279_v28 }
  0xf0   : > { %v383_v35 = vadd.f32 %v382_v25, %v279_v28 }
  0xf2   : > { %v386_v26 = vpop.f32.mrb[2].mxu1 }
  0xf3   : > { %v388_v27 = vpop.f32.mrb[3].mxu1  ;;  %v387_v42 = vadd.f32 %v386_v26, %v284_v36 }
  0xf4   : > { %v389_v45 = vadd.f32 %v388_v27, %v284_v36 }
  0xf6   : > { %v392_v29 = vpop.f32.mrb[4].mxu1 }
  0xf7   : > { %v394_v30 = vpop.f32.mrb[5].mxu1  ;;  %v393_v48 = vadd.f32 %v392_v29, %v289_v39 }
  0xf8   : > { %v395_v50 = vadd.f32 %v394_v30, %v289_v39 }
  0xf9   : > { %v490_v58 = vsel %vm301_vm0, %v393_v48, -inf }
  0xfa   : > { %v463_v31 = vpop.f32.mrb[6].mxu1  ;;  %v491_v59 = vsel %vm301_vm0, %v395_v50, -inf }
  0xfb   : > { %v464_v33 = vadd.f32 %v463_v31, %v279_v28  ;;  %v465_v34 = vpop.f32.mrb[7].mxu1 }
  0xfc   : > { %v466_v37 = vadd.f32 %v465_v34, %v279_v28 }
  0xfd   : > { %v480_v38 = vmax.f32 %v381_v32, %v464_v33 }
  0xfe   : > { %v481_v40 = vmax.f32 %v383_v35, %v466_v37  ;;  %v469_v41 = vpop.f32.mrb[8].mxu1 }
  0xff   : > { %v470_v43 = vadd.f32 %v469_v41, %v284_v36  ;;  %v471_v44 = vpop.f32.mrb[9].mxu1 }
 0x100   : > { %v472_v46 = vadd.f32 %v471_v44, %v284_v36  ;;  %v482_v47 = vmax.f32 %v480_v38, %v481_v40 }
 0x101   : > { %v485_v49 = vmax.f32 %v387_v42, %v470_v43 }
 0x102   : > { %v486_v51 = vmax.f32 %v389_v45, %v472_v46  ;;  %v475_v52 = vpop.f32.mrb[10].mxu1  ;;  %483 = vmax.xlane.f32.xlu1 %v482_v47 }
 0x103   : > { %v476_v53 = vadd.f32 %v475_v52, %v289_v39  ;;  %v477_v54 = vpop.f32.mrb[11].mxu1  ;;  %v581_v52 = vld [vmem:[%s247_s14] sm:$0x77] }
 0x104   : > { %v478_v55 = vadd.f32 %v477_v54, %v289_v39  ;;  %v487_v56 = vmax.f32 %v485_v49, %v486_v51  ;;  %v582_v54 = vld [vmem:[%s247_s14 + $0x8] sm:$0x77] }
 0x105   : > { %v492_v57 = vsel %vm301_vm0, %v476_v53, -inf }
 0x106   : > { %v494_v60 = vsel %vm301_vm0, %v478_v55, -inf  ;;  %488 = vmax.xlane.f32.xlu0 %v487_v56  ;;  %v493_v61 = vmax.f32 %v490_v58, %v492_v57 }
 0x107   : > { %v495_v62 = vmax.f32 %v491_v59, %v494_v60 }
 0x109   : > { %v496_v63 = vmax.f32 %v493_v61, %v495_v62 }
 0x10b   : > { %497 = vmax.xlane.f32.xlu0 %v496_v63 }
 0x18f   : > { %v484_v0 = vpop.xlane.xlu1 %483 }
 0x190   : > { %v499_v1 = vsub.f32 %v381_v32, %v484_v0  ;;  %v500_v2 = vsub.f32 %v383_v35, %v484_v0  ;;  %v501_v3 = vsub.f32 %v464_v33, %v484_v0  ;;  %v502_v4 = vsub.f32 %v466_v37, %v484_v0 }
 0x192   : > { %v511_v5 = vmul.f32 1.442695, %v499_v1  ;;  %v513_v6 = vmul.f32 1.442695, %v500_v2  ;;  %v515_v7 = vmul.f32 1.442695, %v501_v3 }
 0x193   : > { %v517_v8 = vmul.f32 1.442695, %v502_v4  ;;  %v489_v9 = vpop.xlane.xlu0 %488 }
 0x194   : > { %907 = vpow2.f32 %v511_v5  ;;  %v503_v10 = vsub.f32 %v387_v42, %v489_v9  ;;  %v504_v11 = vsub.f32 %v389_v45, %v489_v9  ;;  %v505_v12 = vsub.f32 %v470_v43, %v489_v9 }
 0x195   : > { %909 = vpow2.f32 %v513_v6  ;;  %v506_v13 = vsub.f32 %v472_v46, %v489_v9 }
 0x196   : > { %911 = vpow2.f32 %v515_v7  ;;  %v519_v14 = vmul.f32 1.442695, %v503_v10  ;;  %v521_v15 = vmul.f32 1.442695, %v504_v11  ;;  %v523_v16 = vmul.f32 1.442695, %v505_v12 }
 0x197   : > { %913 = vpow2.f32 %v517_v8  ;;  %v525_v17 = vmul.f32 1.442695, %v506_v13 }
 0x198   : > { %915 = vpow2.f32 %v519_v14  ;;  %v498_v18 = vpop.xlane.xlu0 %497 }
 0x199   : > { %917 = vpow2.f32 %v521_v15  ;;  %v507_v19 = vsub.f32 %v393_v48, %v498_v18  ;;  %v508_v20 = vsub.f32 %v395_v50, %v498_v18  ;;  %v509_v21 = vsub.f32 %v476_v53, %v498_v18 }
 0x19a   : > { %v510_v22 = vsub.f32 %v478_v55, %v498_v18  ;;  %919 = vpow2.f32 %v523_v16  ;;  %v585_v53 = vcombine.high %v581_v52, %v581_v52  ;;  %v586_v55 = vcombine.high %v582_v54, %v582_v54 }
 0x19b   : > { %v527_v23 = vmul.f32 1.442695, %v507_v19  ;;  %v529_v24 = vmul.f32 1.442695, %v508_v20  ;;  %v531_v25 = vmul.f32 1.442695, %v509_v21  ;;  %921 = vpow2.f32 %v525_v17 }
 0x19c   : > { %v533_v26 = vmul.f32 1.442695, %v510_v22  ;;  %589 = vmatprep.subr.mxu0 %v585_v53 }
 0x19d   : > { %923 = vpow2.f32 %v527_v23  ;;  %590 = vmatpush1.xpose.msra.mxu0 %v581_v52 }
 0x19e   : > { %v908_v27 = vpop.eup %907  ;;  %925 = vpow2.f32 %v529_v24  ;;  %669 = vmatprep.subr.mxu0 %v586_v55 }
 0x19f   : > { %v910_v28 = vpop.eup %909  ;;  %927 = vpow2.f32 %v531_v25 }
 0x1a0   : > { %v912_v29 = vpop.eup %911  ;;  %929 = vpow2.f32 %v533_v26  ;;  %v535_v30 = vadd.f32 %v910_v28, %v908_v27 }
 0x1a1   : > { %v914_v31 = vpop.eup %913 }
 0x1a2   : > { %v916_v32 = vpop.eup %915  ;;  %v536_v33 = vadd.f32 %v912_v29, %v535_v30 }
 0x1a3   : > { %v918_v34 = vpop.eup %917 }
 0x1a4   : > { %v537_v35 = vadd.f32 %v914_v31, %v536_v33  ;;  %v540_v36 = vadd.f32 %v918_v34, %v916_v32  ;;  %v920_v37 = vpop.eup %919 }
 0x1a5   : > { %v922_v38 = vpop.eup %921 }
 0x1a6   : > { %538 = vadd.xlane.f32.xlu1 %v537_v35  ;;  %v541_v39 = vadd.f32 %v920_v37, %v540_v36 }
 0x1a7   : > { %v924_v40 = vpop.eup %923 }
 0x1a8   : > { %v926_v41 = vpop.eup %925  ;;  %v542_v42 = vadd.f32 %v922_v38, %v541_v39  ;;  %v545_v43 = vsel %vm301_vm0, %v924_v40, 0.0 }
 0x1a9   : > { %v928_v44 = vpop.eup %927  ;;  %v546_v45 = vsel %vm301_vm0, %v926_v41, 0.0 }
 0x1aa   : > { %v930_v46 = vpop.eup %929  ;;  %543 = vadd.xlane.f32.xlu0 %v542_v42  ;;  %v547_v47 = vadd.f32 %v546_v45, %v545_v43  ;;  %v548_v48 = vsel %vm301_vm0, %v928_v44, 0.0 }
 0x1ab   : > { %v550_v50 = vsel %vm301_vm0, %v930_v46, 0.0 }
 0x1ac   : > { %v549_v49 = vadd.f32 %v548_v48, %v547_v47 }
 0x1ae   : > { %v551_v51 = vadd.f32 %v550_v50, %v549_v49 }
 0x1b0   : > { %552 = vadd.xlane.f32.xlu1 %v551_v51 }
 0x233   : > { %v539_v56 = vpop.xlane.xlu1 %538 }
 0x234   : > { %931 = vrcp.f32 %v539_v56 }
 0x237   : > { %v544_v57 = vpop.xlane.xlu0 %543 }
 0x238   : > { %933 = vrcp.f32 %v544_v57 }
 0x23d   : > { %v553_v58 = vpop.xlane.xlu1 %552 }
 0x23e   : > { %v932_v59 = vpop.eup %931  ;;  %935 = vrcp.f32 %v553_v58 }
 0x23f   : > { %v558_v60 = vmul.f32 %v932_v59, %v910_v28  ;;  %v557_v61 = vmul.f32 %v932_v59, %v908_v27  ;;  %v560_v62 = vmul.f32 %v932_v59, %v914_v31  ;;  %v559_v63 = vmul.f32 %v932_v59, %v912_v29 }
 0x241   : > { %570 = vst [vmem:[%s1038_s17 + $0x8] sm:$0xff] %v558_v60  ;;  %653 = vmatprep.mubr.f32.mxu0 %v558_v60  ;;  %569 = vst [vmem:[%s1038_s17] sm:$0xff] %v557_v61 }
 0x242   : > { %572 = vst [vmem:[%s1038_s17 + $0x18] sm:$0xff] %v560_v62  ;;  %571 = vst [vmem:[%s1038_s17 + $0x10] sm:$0xff] %v559_v63  ;;  %v934_v0 = vpop.eup %933  ;;  %654 = vmatmul.mubr.f32.vlgmr.msra.gmra.mrb[0].mxu0 %v557_v61 }
 0x243   : > { %v562_v1 = vmul.f32 %v934_v0, %v918_v34  ;;  %670 = vmatpush1.xpose.msra.mxu0 %v582_v54  ;;  %v561_v2 = vmul.f32 %v934_v0, %v916_v32  ;;  %v564_v3 = vmul.f32 %v934_v0, %v922_v38  ;;  %v563_v4 = vmul.f32 %v934_v0, %v920_v37 }
 0x245   : > { %574 = vst [vmem:[%s1038_s17 + $0x28] sm:$0xff] %v562_v1  ;;  %658 = vmatprep.mubr.f32.mxu0 %v562_v1  ;;  %573 = vst [vmem:[%s1038_s17 + $0x20] sm:$0xff] %v561_v2 }
 0x246   : > { %576 = vst [vmem:[%s1038_s17 + $0x38] sm:$0xff] %v564_v3  ;;  %575 = vst [vmem:[%s1038_s17 + $0x30] sm:$0xff] %v563_v4  ;;  %659 = vmatmul.mubr.f32.gmra.mrb[2].mxu0 %v561_v2 }
 0x248   : > { %v936_v5 = vpop.eup %935 }
 0x249   : > { %v566_v6 = vmul.f32 %v936_v5, %v926_v41  ;;  %v565_v7 = vmul.f32 %v936_v5, %v924_v40  ;;  %v568_v8 = vmul.f32 %v936_v5, %v930_v46  ;;  %v567_v9 = vmul.f32 %v936_v5, %v928_v44 }
 0x24b   : > { %578 = vst [vmem:[%s1038_s17 + $0x48] sm:$0x1] %v566_v6  ;;  %663 = vmatprep.mubr.f32.mxu0 %v566_v6  ;;  %577 = vst [vmem:[%s1038_s17 + $0x40] sm:$0x1] %v565_v7 }
 0x24c   : > { %580 = vst [vmem:[%s1038_s17 + $0x58] sm:$0x1] %v568_v8  ;;  %579 = vst [vmem:[%s1038_s17 + $0x50] sm:$0x1] %v567_v9  ;;  %664 = vmatmul.mubr.f32.gmra.mrb[4].mxu0 %v565_v7 }
 0x24d   : > { %733 = vmatprep.mubr.f32.mxu0 %v560_v62 }
 0x250   : > { %734 = vmatmul.mubr.f32.vlgmr.msra.gmra.mrb[0].mxu0 %v559_v63 }
 0x251   : > { %738 = vmatprep.mubr.f32.mxu0 %v564_v3 }
 0x254   : > { %739 = vmatmul.mubr.f32.gmra.mrb[2].mxu0 %v563_v4 }
 0x255   : > { %743 = vmatprep.mubr.f32.mxu0 %v568_v8 }
 0x258   : > { %744 = vmatmul.mubr.f32.gmra.mrb[4].mxu0 %v567_v9 }
 0x323   : > { %v735_v10 = vpop.f32.mrb[0].mxu0 }
 0x324   : > { %750 = vst.msk [vmem:[%s252_s23] sm:$0xff] %vm749_vm2, %v735_v10  ;;  %v737_v11 = vpop.f32.mrb[1].mxu0 }
 0x327   : > { %v740_v12 = vpop.f32.mrb[2].mxu0 }
 0x328   : > { %751 = vst.msk [vmem:[%s252_s23 + $0x8] sm:$0xff] %vm749_vm2, %v740_v12  ;;  %v742_v13 = vpop.f32.mrb[3].mxu0 }
 0x32b   : > { %v745_v14 = vpop.f32.mrb[4].mxu0 }
 0x32c   : > { %753 = vst.msk [vmem:[%s252_s23 + $0x10] sm:$0x1] %vm752_vm3, %v745_v14  ;;  %v747_v15 = vpop.f32.mrb[5].mxu0 }
 0x32d PF: > { %s16_s18 = sadd.s32 1, %s943_s18  }
 0x32e   : > { %p13_p4 = scmp.ge.s32.totalorder %s16_s18, 4  }
 0x330   :  { %15 = sbr.rel (!%p13_p4) target bundleno = 1 (0x1), region = 81 }

// kernel: forward.4
= control target key start
LH: loop header
LB: loop body
LE: loop exit
PB: predicated region body
PF: predicated region fallthrough
CT: control target
= control target key end

     0   :  { %s1866_s18 = smov 0   ;;  %s1868_s19 = smov 0   ;;  %s2787_s0 = inlined_call_operand.vmem [shape: f32[2,3,512], index: 0, kind: input, shape index: {}]   ;;  %s2788_s1 = inlined_call_operand.vmem [shape: f32[2,4,3,4], index: 1, kind: input, shape index: {}]   ;;  %s2789_s2 = inlined_call_operand.vmem [shape: f32[2,4,136,8], index: 2, kind: input, shape index: {}]   ;;  %s2790_s3 = inlined_call_operand.vmem [shape: s32[136,1], index: 3, kind: input, shape index: {}]   ;;  %s2791_s4 = inlined_call_operand.vmem [shape: f32[17,136], index: 4, kind: input, shape index: {}]   ;;  %s2792_s5 = inlined_call_operand.vmem [shape: f32[2,17,512], index: 5, kind: output, shape index: {}]  }
   0x1   :  { %s1870_s20 = smov 0   ;;  %s1872_s21 = smov 0  }
   0x2   :  { %s1874_s22 = smov 0   ;;  %s1876_s23 = smov 0  }
   0x3   :  { %s1878_s24 = smov 0   ;;  %s1880_s25 = smov 0  }
   0x4   :  { %s1882_s26 = smov 0  }
   0x5 LB: > { %2802 = sst [smem:[#allocation3_spill]] %s1802_s19  ;;  %s27_s27 = sadd.s32 1, %s1818_s23  ;;  %s1830_s26 = sphi %s1882_s26, %s15_s26   ;;  %s1826_s25 = sphi %s1880_s25, %s2884_s25   ;;  %s1822_s24 = sphi %s1878_s24, %s2883_s24   ;;  %s1818_s23 = sphi %s1876_s23, %s2882_s23   ;;  %s1814_s22 = sphi %s1874_s22, %s2881_s22   ;;  %s1810_s21 = sphi %s1872_s21, %s2880_s21   ;;  %s1806_s20 = sphi %s1870_s20, %s2879_s20   ;;  %s1802_s19 = sphi %s1868_s19, %s2878_s19   ;;  %s1798_s18 = sphi %s1866_s18, %s2877_s18  }
   0x6   : > { %2803 = sst [smem:[#allocation4_spill]] %s1818_s23  ;;  %p28_p0 = scmp.ge.s32.totalorder %s27_s27, 4 }
   0x7   : > { %2804 = sst [smem:[#allocation5_spill]] %s1822_s24  ;;  %s30_s28 = sadd.s32 1, %s1822_s24 }
   0x8   : > { %2805 = sst [smem:[#allocation6_spill]] %s1826_s25  ;;  %s1519_s29 = sadd.s32 4294967295, %s1830_s26  }
   0x9   : > { %2806 = sst [smem:[#allocation7_spill]] %s1830_s26  ;;  %s34_s30 = sadd.s32 1, %s1826_s25 }
   0xa   : > { %s2886_s27 = smov (%p28_p0, %s27_s27), 0  ;;  %s2888_s28 = smov (!%p28_p0, %s30_s28), %s1822_s24 }
   0xb   : > { %2807 = sst [smem:[#allocation8_spill]] %s2886_s27  ;;  %p179_p1 = scmp.ne.s32.totalorder %s1802_s19, %s1798_s18 }
   0xc   : > { %p180_p2 = scmp.eq.s32.totalorder %s1519_s29, 15  ;;  %p32_p3 = scmp.ge.s32.totalorder %s2888_s28, 2 }
   0xd   : > { %p1523_p4 = scmp.ge.s32.totalorder %s1830_s26, 1  ;;  %p246_p6 = scmp.lt.s32.totalorder %s1830_s26, 17 }
   0xe   : > { %p1921_p5 = por %p180_p2, %p179_p1  ;;  %s2890_s28 = smov (%p32_p3, %s2888_s28), 0 }
   0xf   : > { %2809 = sst [smem:[#allocation9_spill]] %s2890_s28  ;;  %s2892_s30 = smov (!%p32_p3, %s34_s30), %s1826_s25 }
  0x10   : > { %p247_p7 = pnand %p1523_p4, %p246_p6  ;;  %p36_p8 = scmp.ge.s32.totalorder %s2892_s30, 2 }
  0x11   : > { %s165_s7 = ssub.s32 %s1822_s24, %s2890_s28  ;;  %s169_s10 = sadd.s32 1, %s1802_s19 }
  0x12   : > { %s2894_s30 = smov (%p36_p8, %s2892_s30), 0 }
  0x13   : > { %2810 = sst [smem:[#allocation10_spill]] %s2894_s30  ;;  %s164_s8 = ssub.s32 %s1826_s25, %s2894_s30 }
  0x14   : > { %s166_s9 = sor.u32 %s165_s7, %s164_s8  ;;  %250 = sbr.rel (%p247_p7) target bundleno = 859 (0x35b), region = 40 }
  0x15   : > { %p167_p9 = scmp.eq.s32.totalorder %s166_s9, 0 }
  0x17   : > { %s1937_s11 = scalar_select %p167_p9, %s1802_s19, %s169_s10  }
  0x19   : > { %2811 = sst [smem:[#allocation11_spill]] %s1937_s11 }
  0x1b   : > { %s291_s12 = sand.u32 1, %s1798_s18   ;;  %s1941_s13 = sshll.u32 %s1810_s21, 1 }
  0x1c   : > { %s1664_s14 = smul.u32 48, %s291_s12  ;;  %p295_p10 = scmp.lt.s32.totalorder %s1814_s22, 1 }
  0x1d   : > { %p297_p11 = scmp.lt.s32.totalorder %s1941_s13, 3  ;;  %p306_p12 = scmp.lt.s32.totalorder %s1806_s20, 3 }
  0x1e   : > { %s296_s15 = scalar_select %p295_p10, %s1814_s22, 1 }
  0x1f   : > { %s298_s16 = scalar_select %p297_p11, %s1941_s13, 3 }
  0x20   : > { %s1525_s17 = sshll.u32 %s296_s15, 2  ;;  %s1666_s30 = smul.u32 68, %s296_s15 }
  0x21   : > { %s300_s29 = sadd.s32 %s1525_s17, %s298_s16  ;;  %p1530_p13 = scmp.ne.s32.totalorder %s1806_s20, 0 }
  0x22   : > { %s1526_s7 = sshll.u32 %s300_s29, 2  ;;  %s1960_s29 = scalar_lea.vmem [#allocation2], %s1664_s14  ;;  %v1832_v0 = vmov (!%p1530_p13), 0.0  }
  0x23   : > { %s302_s10 = scalar_lea.vmem %s2787_s0, %s1526_s7  ;;  %326 = vst [vmem:[%s1960_s29] sm:$0xff] (!%p1530_p13), %v1832_v0  ;;  %327 = vst [vmem:[%s1960_s29 + $0x8] sm:$0xff] (!%p1530_p13), %v1832_v0 }
  0x24   : > { %s307_s28 = scalar_select %p306_p12, %s1806_s20, 3 }
  0x25   : > { %325 = sbr.rel (%p1530_p13) target bundleno = 44 (0x2c), region = 44  ;;  %328 = vst [vmem:[%s1960_s29 + $0x10] sm:$0xff] (!%p1530_p13), %v1832_v0  ;;  %329 = vst [vmem:[%s1960_s29 + $0x18] sm:$0xff] (!%p1530_p13), %v1832_v0 }
  0x26   : > { %s309_s18 = sadd.s32 %s1525_s17, %s307_s28  ;;  %s1665_s21 = smul.u32 17, %s307_s28  ;;  %330 = vst [vmem:[%s1960_s29 + $0x20] sm:$0x1] (!%p1530_p13), %v1832_v0  ;;  %331 = vst [vmem:[%s1960_s29 + $0x28] sm:$0x1] (!%p1530_p13), %v1832_v0 }
  0x27   : > { %s1528_s27 = sshll.u32 %s309_s18, 2 }
  0x28   : > { %s311_s12 = scalar_lea.vmem %s2788_s1, %s1528_s27  ;;  %s318_s23 = sadd.s32 %s1666_s30, %s1665_s21 }
  0x29   : > { %s1529_s11 = sshll.u32 %s318_s23, 3 }
  0x2a   : > { %s1958_s16 = scalar_lea.vmem %s2789_s2, %s1529_s11 }
  0x2c PF: > { %v332_v1 = vld [vmem:[%s302_s10] sm:$0x77]  ;;  %vm384_vm0 = vcmask 1042432   ;;  %v2800_v3 = vmov 0.0   ;;  %v352_v4 = vld [vmem:[%s2790_s3 + $0x8] sm:$0xff]  ;;  %vm381_vm1 = vcmask 23552   ;;  %v514_v33 = vlaneseq }
  0x2d   : > { %v380_v2 = vcombine.high %v332_v1, %v332_v1  ;;  %453 = vmatprep.mubr.f32.mxu0 %v2800_v3  ;;  %1117 = vmatprep.mubr.f32.mxu1 %v2800_v3  ;;  %v333_v5 = vld [vmem:[%s311_s12] sm:$0x7]  ;;  %v1834_v6 = vmov 3   ;;  %v1835_v7 = vmov 0   ;;  %v353_v8 = vld [vmem:[%s2790_s3 + $0x10] sm:$0xff]  ;;  %v354_v10 = vld [vmem:[%s2790_s3 + $0x18] sm:$0xff] }
  0x2e   : > { %1752 = vset.pattern.permute.xlu0 %v1834_v6  ;;  %1754 = vset.pattern.permute.xlu1 %v1835_v7  ;;  %v351_v9 = vld [vmem:[%s2790_s3] sm:$0xff]  ;;  %v356_v12 = vld [vmem:[%s2790_s3 + $0x28] sm:$0xff]  ;;  %v357_v13 = vld [vmem:[%s2790_s3 + $0x30] sm:$0xff]  ;;  %v2026_v42 = vshrl.u32 %v514_v33, 7  ;;  %s1675_s26 = smul.u32 (%p1921_p5), 12, %s1814_s22 }
  0x2f   : > { %1531 = vmatprep.subr.msk.mxu0 %vm384_vm0, %v380_v2  ;;  %376 = vperm.xlu0 %1752, %v333_v5   ;;  %v355_v11 = vld [vmem:[%s2790_s3 + $0x20] sm:$0xff]  ;;  %v358_v14 = vld [vmem:[%s2790_s3 + $0x38] sm:$0xff]  ;;  %v360_v16 = vld [vmem:[%s2790_s3 + $0x48] sm:$0xff] }
  0x30   : > { %1532 = vmatpush1.msk.msra.mxu0 %vm384_vm0, %v332_v1  ;;  %572 = vperm.xlu1 %1754, %v352_v4   ;;  %v359_v15 = vld [vmem:[%s2790_s3 + $0x40] sm:$0xff]  ;;  %v361_v17 = vld [vmem:[%s2790_s3 + $0x50] sm:$0xff]  ;;  %v362_v18 = vld [vmem:[%s2790_s3 + $0x58] sm:$0xff]  ;;  %v961_v52 = vsub.s32 2, %v2026_v42  ;;  %v621_v63 = vsub.s32 1, %v2026_v42  ;;  %v2037_v0 = vsub.s32 0, %v2026_v42  ;;  %s1373_s27 = sadd.s32 (%p1921_p5), %s1675_s26, %s1941_s13 }
  0x31   : > { %1533 = vmatmul.mubr.msk.f32.vlgmr.msra.gmra.mrb[0].mxu0 %vm381_vm1, %v333_v5  ;;  %v363_v19 = vld [vmem:[%s2790_s3 + $0x60] sm:$0xff]  ;;  %v364_v20 = vld [vmem:[%s2790_s3 + $0x68] sm:$0xff]  ;;  %v365_v21 = vld [vmem:[%s2790_s3 + $0x70] sm:$0xff]  ;;  %s1629_s28 = sshll.u32 (%p1921_p5), %s1373_s27, 3 }
  0x32   : > { %v366_v22 = vld [vmem:[%s2790_s3 + $0x78] sm:$0xff]  ;;  %v367_v23 = vld [vmem:[%s2790_s3 + $0x80] sm:$0xff]  ;;  %s1375_s11 = scalar_lea.vmem (%p1921_p5), %s2792_s5, %s1629_s28 }
  0x33   : > { %1753 = vset.pattern.permute.xlu0 %v1835_v7 }
  0x34   : > { %575 = vperm.xlu1 %1754, %v353_v8   ;;  %569 = vperm.xlu0 %1753, %v351_v9  }
  0x38   : > { %578 = vperm.xlu1 %1754, %v354_v10   ;;  %581 = vperm.xlu0 %1753, %v355_v11  }
  0x3c   : > { %584 = vperm.xlu1 %1754, %v356_v12   ;;  %587 = vperm.xlu0 %1753, %v357_v13  }
  0x40   : > { %590 = vperm.xlu1 %1754, %v358_v14   ;;  %593 = vperm.xlu0 %1753, %v359_v15  }
  0x44   : > { %596 = vperm.xlu1 %1754, %v360_v16   ;;  %599 = vperm.xlu0 %1753, %v361_v17  }
  0x48   : > { %602 = vperm.xlu1 %1754, %v362_v18   ;;  %605 = vperm.xlu0 %1753, %v363_v19  }
  0x4c   : > { %608 = vperm.xlu1 %1754, %v364_v20   ;;  %611 = vperm.xlu0 %1753, %v365_v21  }
  0x50   : > { %614 = vperm.xlu1 %1754, %v366_v22   ;;  %617 = vperm.xlu0 %1753, %v367_v23  }
  0xae   : > { %v377_v24 = vpop.permute.xlu0 %376 }
  0xaf   : > { %v2022_v31 = vpop.permute.xlu1 %572 }
  0xb3   : > { %v2024_v40 = vpop.permute.xlu1 %575  ;;  %v2028_v48 = vpop.permute.xlu0 %569 }
  0xb7   : > { %v2033_v58 = vpop.permute.xlu1 %578  ;;  %v2043_v6 = vpop.permute.xlu0 %581 }
  0xbb   : > { %v2055_v19 = vpop.permute.xlu1 %584  ;;  %v588_v33 = vpop.permute.xlu0 %587 }
 0x104   : > { %v455_v25 = vpop.f32.mrb[0].mxu0 }
 0x105   : > { %v456_v26 = vadd.f32 %v455_v25, %v377_v24  ;;  %v457_v27 = vpop.f32.mrb[1].mxu0 }
 0x106   : > { %v458_v28 = vadd.f32 %v457_v27, %v377_v24 }
 0x107   : > { %vm466_vm2 = vcmp.eq.f32.partialorder %v456_v26, 0.0  ;;  %vm460_vm4 = vcmp.gt.f32.partialorder %v456_v26, 0.0 }
 0x108   : > { %v468_v29 = vsel %vm466_vm2, 1.0, %v456_v26  ;;  %vm467_vm3 = vcmp.eq.f32.partialorder %v458_v28, 0.0  ;;  %vm461_vm5 = vcmp.gt.f32.partialorder %v458_v28, 0.0  ;;  %v1534_v55 = vsel %vm460_vm4, 1.0, %v2800_v3 }
 0x109   : > { %1756 = vrcp.f32 %v468_v29  ;;  %v469_v30 = vsel %vm467_vm3, 1.0, %v458_v28  ;;  %v1535_v57 = vsel %vm461_vm5, 1.0, %v2800_v3  ;;  %v2039_v2 = vrot.slane %v1534_v55, %v961_v52 }
 0x10a   : > { %1758 = vrcp.f32 %v469_v30  ;;  %v2041_v5 = vrot.slane %v1535_v57, %v961_v52 }
 0x113   : > { %v1757_v32 = vpop.eup %1756 }
 0x114   : > { %v1759_v34 = vpop.eup %1758  ;;  %v480_v35 = vrot.slane %v1757_v32, 1  ;;  %v474_v36 = vrot.slane %v1757_v32, 2 }
 0x115   : > { %v481_v37 = vrot.slane %v1759_v34, 1  ;;  %v475_v38 = vrot.slane %v1759_v34, 2 }
 0x116   : > { %v484_v39 = vmul.f32 %v480_v35, %v456_v26  ;;  %v478_v41 = vmul.f32 %v474_v36, %v456_v26 }
 0x117   : > { %v485_v43 = vmul.f32 %v481_v37, %v458_v28  ;;  %v479_v44 = vmul.f32 %v475_v38, %v458_v28 }
 0x118   : > { %v488_v45 = vmul.f32 0.875, %v484_v39  ;;  %v486_v46 = vmul.f32 0.875, %v478_v41  ;;  %v591_v41 = vpop.permute.xlu1 %590 }
 0x119   : > { %v489_v47 = vmul.f32 0.875, %v485_v43  ;;  %v487_v49 = vmul.f32 0.875, %v479_v44 }
 0x11a   : > { %v494_v50 = vmax.f32 %v488_v45, -2.0  ;;  %v490_v51 = vmax.f32 %v486_v46, -2.0 }
 0x11b   : > { %v495_v53 = vmax.f32 %v489_v47, -2.0  ;;  %v491_v54 = vmax.f32 %v487_v49, -2.0 }
 0x11c   : > { %v496_v56 = vmin.f32 %v494_v50, 9.0  ;;  %v492_v59 = vmin.f32 %v490_v51, 9.0  ;;  %v594_v50 = vpop.permute.xlu0 %593 }
 0x11d   : > { %v497_v60 = vmin.f32 %v495_v53, 9.0  ;;  %v493_v61 = vmin.f32 %v491_v54, 9.0 }
 0x11e   : > { %v500_v62 = vfloor.f32 %v496_v56  ;;  %v498_v1 = vfloor.f32 %v492_v59 }
 0x11f   : > { %v501_v4 = vfloor.f32 %v497_v60  ;;  %v499_v7 = vfloor.f32 %v493_v61 }
 0x120   : > { %v506_v8 = vsub.f32 %v496_v56, %v500_v62  ;;  %v1671_v9 = vtrunc.f32 %v500_v62  ;;  %v2045_v10 = vsub.f32 %v492_v59, %v498_v1  ;;  %v2047_v11 = vtrunc.f32 %v498_v1  ;;  %v597_v56 = vpop.permute.xlu1 %596 }
 0x121   : > { %v507_v12 = vsub.f32 %v497_v60, %v501_v4  ;;  %v1673_v13 = vtrunc.f32 %v501_v4  ;;  %v2049_v14 = vsub.f32 %v493_v61, %v499_v7  ;;  %v2051_v15 = vtrunc.f32 %v499_v7 }
 0x122   : > { %v508_v16 = vsub.f32 1.0, %v506_v8  ;;  %v1672_v17 = vcvt.f32.s32 %v1671_v9  ;;  %v2053_v18 = vrot.slane %v506_v8, %v621_v63 }
 0x123   : > { %v509_v21 = vsub.f32 1.0, %v507_v12  ;;  %v1674_v22 = vcvt.f32.s32 %v1673_v13  ;;  %v2058_v23 = vrot.slane %v507_v12, %v621_v63  ;;  %v505_v24 = vsub.f32 1.0, %v2049_v14 }
 0x124   : > { %v2061_v25 = vrot.slane %v1672_v17, %v621_v63  ;;  %v2063_v26 = vrot.slane %v508_v16, %v621_v63  ;;  %v771_v27 = vadd.s32 1, %v1672_v17  ;;  %v603_v12 = vpop.permute.xlu1 %602 }
 0x125   : > { %v2066_v29 = vrot.slane %v1674_v22, %v621_v63  ;;  %v2068_v30 = vrot.slane %v509_v21, %v621_v63  ;;  %v772_v32 = vadd.s32 1, %v1674_v22  ;;  %v2071_v34 = vrot.slane %v505_v24, %v2037_v0 }
 0x126   : > { %v2073_v35 = vrot.slane %v771_v27, %v621_v63  ;;  %vm629_vm6 = vcmp.eq.s32.totalorder %v2022_v31, %v2061_v25  ;;  %vm631_vm7 = vcmp.eq.s32.totalorder %v2024_v40, %v2061_v25  ;;  %vm627_vm8 = vcmp.eq.s32.totalorder %v2028_v48, %v2061_v25 }
 0x127   : > { %v2082_v36 = vsel %vm629_vm6, 1.0, %v2800_v3  ;;  %v2084_v37 = vrot.slane %v772_v32, %v621_v63  ;;  %vm632_vm9 = vcmp.eq.s32.totalorder %v2024_v40, %v2066_v29  ;;  %v2089_v38 = vsel %vm631_vm7, 1.0, %v2800_v3  ;;  %v600_v63 = vpop.permute.xlu0 %599 }
 0x128   : > { %vm783_vm10 = vcmp.eq.s32.totalorder %v2022_v31, %v2073_v35  ;;  %v2094_v39 = vsel %vm632_vm9, 1.0, %v2800_v3  ;;  %vm785_vm11 = vcmp.eq.s32.totalorder %v2024_v40, %v2073_v35  ;;  %vm628_vm12 = vcmp.eq.s32.totalorder %v2028_v48, %v2066_v29 }
 0x129   : > { %v2101_v43 = vsel %vm783_vm10, 1.0, %v2800_v3  ;;  %vm786_vm13 = vcmp.eq.s32.totalorder %v2024_v40, %v2084_v37  ;;  %v2106_v44 = vsel %vm785_vm11, 1.0, %v2800_v3  ;;  %v2109_v45 = vsel %vm627_vm8, 1.0, %v2800_v3 }
 0x12a   : > { %v2112_v46 = vsel %vm786_vm13, 1.0, %v2800_v3  ;;  %v2115_v47 = vsel %vm628_vm12, 1.0, %v2800_v3  ;;  %vm781_vm14 = vcmp.eq.s32.totalorder %v2028_v48, %v2073_v35  ;;  %vm782_vm15 = vcmp.eq.s32.totalorder %v2028_v48, %v2084_v37 }
 0x12b   : > { %v2122_v40 = vsel %vm781_vm14, 1.0, %v2800_v3  ;;  %v2125_v49 = vsel %vm782_vm15, 1.0, %v2800_v3  ;;  %vm633_vm0 = vcmp.eq.s32.totalorder %v2033_v58, %v2061_v25  ;;  %vm634_vm1 = vcmp.eq.s32.totalorder %v2033_v58, %v2066_v29  ;;  %v606_v24 = vpop.permute.xlu0 %605 }
 0x12c   : > { %v2132_v51 = vsel %vm633_vm0, 1.0, %v2800_v3  ;;  %v2135_v52 = vsel %vm634_vm1, 1.0, %v2800_v3  ;;  %vm787_vm2 = vcmp.eq.s32.totalorder %v2033_v58, %v2073_v35  ;;  %vm788_vm3 = vcmp.eq.s32.totalorder %v2033_v58, %v2084_v37 }
 0x12d   : > { %v2142_v48 = vsel %vm787_vm2, 1.0, %v2800_v3  ;;  %v2145_v53 = vsel %vm788_vm3, 1.0, %v2800_v3  ;;  %vm635_vm4 = vcmp.eq.s32.totalorder %v2043_v6, %v2061_v25  ;;  %vm636_vm5 = vcmp.eq.s32.totalorder %v2043_v6, %v2066_v29 }
 0x12e   : > { %v2152_v54 = vsel %vm635_vm4, 1.0, %v2800_v3  ;;  %v2155_v55 = vsel %vm636_vm5, 1.0, %v2800_v3  ;;  %vm789_vm6 = vcmp.eq.s32.totalorder %v2043_v6, %v2073_v35  ;;  %vm790_vm7 = vcmp.eq.s32.totalorder %v2043_v6, %v2084_v37 }
 0x12f   : > { %v2162_v57 = vsel %vm789_vm6, 1.0, %v2800_v3  ;;  %v2165_v58 = vsel %vm790_vm7, 1.0, %v2800_v3  ;;  %vm637_vm8 = vcmp.eq.s32.totalorder %v2055_v19, %v2061_v25  ;;  %vm638_vm9 = vcmp.eq.s32.totalorder %v2055_v19, %v2066_v29 }
 0x130   : > { %v2172_v59 = vsel %vm637_vm8, 1.0, %v2800_v3  ;;  %v2175_v60 = vsel %vm638_vm9, 1.0, %v2800_v3  ;;  %vm791_vm10 = vcmp.eq.s32.totalorder %v2055_v19, %v2073_v35  ;;  %vm792_vm11 = vcmp.eq.s32.totalorder %v2055_v19, %v2084_v37 }
 0x131   : > { %v2182_v61 = vsel %vm791_vm10, 1.0, %v2800_v3  ;;  %v2185_v62 = vsel %vm792_vm11, 1.0, %v2800_v3  ;;  %vm639_vm12 = vcmp.eq.s32.totalorder %v588_v33, %v2061_v25  ;;  %vm640_vm13 = vcmp.eq.s32.totalorder %v588_v33, %v2066_v29 }
 0x132   : > { %v2190_v1 = vsel %vm639_vm12, 1.0, %v2800_v3  ;;  %v2193_v4 = vsel %vm640_vm13, 1.0, %v2800_v3  ;;  %vm793_vm14 = vcmp.eq.s32.totalorder %v588_v33, %v2073_v35  ;;  %vm794_vm15 = vcmp.eq.s32.totalorder %v588_v33, %v2084_v37 }
 0x133   : > { %v2198_v6 = vsel %vm793_vm14, 1.0, %v2800_v3  ;;  %v2201_v7 = vsel %vm794_vm15, 1.0, %v2800_v3  ;;  %vm641_vm0 = vcmp.eq.s32.totalorder %v591_v41, %v2061_v25  ;;  %vm642_vm1 = vcmp.eq.s32.totalorder %v591_v41, %v2066_v29 }
 0x134   : > { %v2206_v8 = vsel %vm641_vm0, 1.0, %v2800_v3  ;;  %v2209_v9 = vsel %vm642_vm1, 1.0, %v2800_v3  ;;  %vm795_vm2 = vcmp.eq.s32.totalorder %v591_v41, %v2073_v35  ;;  %vm796_vm3 = vcmp.eq.s32.totalorder %v591_v41, %v2084_v37 }
 0x135   : > { %v2214_v13 = vsel %vm795_vm2, 1.0, %v2800_v3  ;;  %v2217_v16 = vsel %vm796_vm3, 1.0, %v2800_v3  ;;  %vm643_vm4 = vcmp.eq.s32.totalorder %v594_v50, %v2061_v25  ;;  %vm644_vm5 = vcmp.eq.s32.totalorder %v594_v50, %v2066_v29 }
 0x136   : > { %v2222_v17 = vsel %vm643_vm4, 1.0, %v2800_v3  ;;  %v2225_v19 = vsel %vm644_vm5, 1.0, %v2800_v3  ;;  %vm797_vm6 = vcmp.eq.s32.totalorder %v594_v50, %v2073_v35  ;;  %vm798_vm7 = vcmp.eq.s32.totalorder %v594_v50, %v2084_v37 }
 0x137   : > { %v2230_v21 = vsel %vm797_vm6, 1.0, %v2800_v3  ;;  %v2233_v22 = vsel %vm798_vm7, 1.0, %v2800_v3  ;;  %vm645_vm8 = vcmp.eq.s32.totalorder %v597_v56, %v2061_v25  ;;  %vm646_vm9 = vcmp.eq.s32.totalorder %v597_v56, %v2066_v29 }
 0x138   : > { %v2238_v27 = vsel %vm645_vm8, 1.0, %v2800_v3  ;;  %v2241_v32 = vsel %vm646_vm9, 1.0, %v2800_v3  ;;  %vm799_vm10 = vcmp.eq.s32.totalorder %v597_v56, %v2073_v35  ;;  %vm800_vm11 = vcmp.eq.s32.totalorder %v597_v56, %v2084_v37  ;;  %v609_v56 = vpop.permute.xlu1 %608 }
 0x139   : > { %2812 = vst [vmem:[#allocation12_spill] sm:$0xff] %v2241_v32  ;;  %v2246_v33 = vsel %vm799_vm10, 1.0, %v2800_v3  ;;  %v2249_v41 = vsel %vm800_vm11, 1.0, %v2800_v3  ;;  %vm647_vm12 = vcmp.eq.s32.totalorder %v600_v63, %v2061_v25  ;;  %vm648_vm13 = vcmp.eq.s32.totalorder %v600_v63, %v2066_v29 }
 0x13a   : > { %2813 = vst [vmem:[#allocation13_spill] sm:$0xff] %v2246_v33  ;;  %2814 = vst [vmem:[#allocation14_spill] sm:$0xff] %v2249_v41  ;;  %v2254_v50 = vsel %vm647_vm12, 1.0, %v2800_v3  ;;  %v2257_v20 = vsel %vm648_vm13, 1.0, %v2800_v3  ;;  %vm801_vm14 = vcmp.eq.s32.totalorder %v600_v63, %v2073_v35  ;;  %vm802_vm15 = vcmp.eq.s32.totalorder %v600_v63, %v2084_v37 }
 0x13b   : > { %2815 = vst [vmem:[#allocation15_spill] sm:$0xff] %v2254_v50  ;;  %2816 = vst [vmem:[#allocation16_spill] sm:$0xff] %v2257_v20  ;;  %v2262_v28 = vsel %vm801_vm14, 1.0, %v2800_v3  ;;  %v2265_v41 = vsel %vm802_vm15, 1.0, %v2800_v3  ;;  %vm649_vm0 = vcmp.eq.s32.totalorder %v603_v12, %v2061_v25  ;;  %vm650_vm1 = vcmp.eq.s32.totalorder %v603_v12, %v2066_v29 }
 0x13c   : > { %2817 = vst [vmem:[#allocation17_spill] sm:$0xff] %v2262_v28  ;;  %2818 = vst [vmem:[#allocation18_spill] sm:$0xff] %v2265_v41  ;;  %v2270_v50 = vsel %vm649_vm0, 1.0, %v2800_v3  ;;  %v2273_v20 = vsel %vm650_vm1, 1.0, %v2800_v3  ;;  %vm803_vm2 = vcmp.eq.s32.totalorder %v603_v12, %v2073_v35  ;;  %vm804_vm3 = vcmp.eq.s32.totalorder %v603_v12, %v2084_v37  ;;  %v612_v41 = vpop.permute.xlu0 %611 }
 0x13d   : > { %2819 = vst [vmem:[#allocation19_spill] sm:$0xff] %v2270_v50  ;;  %2820 = vst [vmem:[#allocation20_spill] sm:$0xff] %v2273_v20  ;;  %v2278_v63 = vsel %vm803_vm2, 1.0, %v2800_v3  ;;  %v2281_v28 = vsel %vm804_vm3, 1.0, %v2800_v3  ;;  %vm651_vm4 = vcmp.eq.s32.totalorder %v606_v24, %v2061_v25  ;;  %vm652_vm5 = vcmp.eq.s32.totalorder %v606_v24, %v2066_v29 }
 0x13e   : > { %2821 = vst [vmem:[#allocation21_spill] sm:$0xff] %v2278_v63  ;;  %2822 = vst [vmem:[#allocation22_spill] sm:$0xff] %v2281_v28  ;;  %v2286_v50 = vsel %vm651_vm4, 1.0, %v2800_v3  ;;  %v2289_v20 = vsel %vm652_vm5, 1.0, %v2800_v3  ;;  %vm805_vm6 = vcmp.eq.s32.totalorder %v606_v24, %v2073_v35  ;;  %vm806_vm7 = vcmp.eq.s32.totalorder %v606_v24, %v2084_v37  ;;  %v615_v24 = vpop.permute.xlu1 %614 }
 0x13f   : > { %2823 = vst [vmem:[#allocation23_spill] sm:$0xff] %v2286_v50  ;;  %2824 = vst [vmem:[#allocation24_spill] sm:$0xff] %v2289_v20  ;;  %v2294_v12 = vsel %vm805_vm6, 1.0, %v2800_v3  ;;  %v2297_v28 = vsel %vm806_vm7, 1.0, %v2800_v3  ;;  %vm653_vm8 = vcmp.eq.s32.totalorder %v609_v56, %v2061_v25  ;;  %vm654_vm9 = vcmp.eq.s32.totalorder %v609_v56, %v2066_v29 }
 0x140   : > { %2825 = vst [vmem:[#allocation25_spill] sm:$0xff] %v2294_v12  ;;  %2826 = vst [vmem:[#allocation26_spill] sm:$0xff] %v2297_v28  ;;  %v2302_v63 = vsel %vm653_vm8, 1.0, %v2800_v3  ;;  %v2305_v50 = vsel %vm654_vm9, 1.0, %v2800_v3  ;;  %vm807_vm10 = vcmp.eq.s32.totalorder %v609_v56, %v2073_v35  ;;  %vm808_vm11 = vcmp.eq.s32.totalorder %v609_v56, %v2084_v37 }
 0x141   : > { %2827 = vst [vmem:[#allocation27_spill] sm:$0xff] %v2302_v63  ;;  %2828 = vst [vmem:[#allocation28_spill] sm:$0xff] %v2305_v50  ;;  %v2310_v20 = vsel %vm807_vm10, 1.0, %v2800_v3  ;;  %v2313_v28 = vsel %vm808_vm11, 1.0, %v2800_v3  ;;  %vm655_vm12 = vcmp.eq.s32.totalorder %v612_v41, %v2061_v25  ;;  %vm656_vm13 = vcmp.eq.s32.totalorder %v612_v41, %v2066_v29 }
 0x142   : > { %2829 = vst [vmem:[#allocation29_spill] sm:$0xff] %v2310_v20  ;;  %2830 = vst [vmem:[#allocation30_spill] sm:$0xff] %v2313_v28  ;;  %v2318_v63 = vsel %vm655_vm12, 1.0, %v2800_v3  ;;  %v2321_v50 = vsel %vm656_vm13, 1.0, %v2800_v3  ;;  %vm809_vm14 = vcmp.eq.s32.totalorder %v612_v41, %v2073_v35  ;;  %vm810_vm15 = vcmp.eq.s32.totalorder %v612_v41, %v2084_v37  ;;  %v618_v28 = vpop.permute.xlu0 %617 }
 0x143   : > { %2831 = vst [vmem:[#allocation31_spill] sm:$0xff] %v2318_v63  ;;  %2832 = vst [vmem:[#allocation32_spill] sm:$0xff] %v2321_v50  ;;  %v2326_v56 = vsel %vm809_vm14, 1.0, %v2800_v3  ;;  %v2329_v20 = vsel %vm810_vm15, 1.0, %v2800_v3  ;;  %vm657_vm0 = vcmp.eq.s32.totalorder %v615_v24, %v2061_v25  ;;  %vm658_vm1 = vcmp.eq.s32.totalorder %v615_v24, %v2066_v29 }
 0x144   : > { %2833 = vst [vmem:[#allocation33_spill] sm:$0xff] %v2326_v56  ;;  %2834 = vst [vmem:[#allocation34_spill] sm:$0xff] %v2329_v20  ;;  %v1570_v63 = vsel %vm657_vm0, 1.0, %v2800_v3  ;;  %v1571_v12 = vsel %vm658_vm1, 1.0, %v2800_v3  ;;  %vm811_vm2 = vcmp.eq.s32.totalorder %v615_v24, %v2073_v35  ;;  %vm812_vm3 = vcmp.eq.s32.totalorder %v615_v24, %v2084_v37 }
 0x145   : > { %v2338_v41 = vmul.f32 %v1570_v63, %v2063_v26  ;;  %v2341_v50 = vmul.f32 %v1571_v12, %v2068_v30  ;;  %v1604_v20 = vsel %vm811_vm2, 1.0, %v2800_v3  ;;  %v1605_v56 = vsel %vm812_vm3, 1.0, %v2800_v3 }
 0x146   : > { %v2346_v32 = vmul.f32 %v1604_v20, %v2053_v18  ;;  %v2349_v33 = vmul.f32 %v1605_v56, %v2058_v23  ;;  %vm659_vm4 = vcmp.eq.s32.totalorder %v618_v28, %v2061_v25  ;;  %vm660_vm5 = vcmp.eq.s32.totalorder %v618_v28, %v2066_v29 }
 0x147   : > { %2835 = vst [vmem:[#allocation35_spill] sm:$0xff] %v2341_v50  ;;  %v1572_v63 = vsel %vm659_vm4, 1.0, %v2800_v3  ;;  %v1573_v24 = vsel %vm660_vm5, 1.0, %v2800_v3  ;;  %vm813_vm6 = vcmp.eq.s32.totalorder %v618_v28, %v2073_v35  ;;  %vm814_vm7 = vcmp.eq.s32.totalorder %v618_v28, %v2084_v37 }
 0x148   : > { %2836 = vst [vmem:[#allocation36_spill] sm:$0xff] %v2346_v32  ;;  %2837 = vst [vmem:[#allocation37_spill] sm:$0xff] %v2349_v33  ;;  %v2358_v12 = vmul.f32 %v1572_v63, %v2063_v26  ;;  %v2361_v20 = vmul.f32 %v1573_v24, %v2068_v30  ;;  %v1606_v56 = vsel %vm813_vm6, 1.0, %v2800_v3  ;;  %v1607_v25 = vsel %vm814_vm7, 1.0, %v2800_v3 }
 0x149   : > { %v2366_v33 = vmul.f32 %v1606_v56, %v2053_v18  ;;  %v2369_v50 = vmul.f32 %v1607_v25, %v2058_v23  ;;  %v2842_v35 = vcvt.f32.s32 %v2051_v15  ;;  %v563_v24 = vrot.slane %v2049_v14, %v2037_v0 }
 0x14a   : > { %2838 = vst [vmem:[#allocation38_spill] sm:$0xff] %v2358_v12  ;;  %2839 = vst [vmem:[#allocation39_spill] sm:$0xff] %v2361_v20  ;;  %v1668_v20 = vcvt.f32.s32 %v2047_v11  ;;  %v2844_v3 = vsub.f32 1.0, %v2045_v10  ;;  %v559_v25 = vrot.slane %v2045_v10, %v2037_v0  ;;  %v737_v15 = vmul.f32 %v2109_v45, %v2063_v26 }
 0x14b   : > { %2840 = vst [vmem:[#allocation40_spill] sm:$0xff] %v2366_v33  ;;  %2841 = vst [vmem:[#allocation41_spill] sm:$0xff] %v2369_v50  ;;  %v523_v28 = vrot.slane %v2842_v35, %v2037_v0  ;;  %v2843_v63 = vmov %v2842_v35  ;;  %v891_v35 = vmul.f32 %v2122_v40, %v2053_v18  ;;  %v2845_v14 = vmov 0.0  }
 0x14c   : > { %v541_v12 = vadd.s32 1, %v2843_v63  ;;  %v533_v56 = vrot.slane %v2844_v3, %v2037_v0  ;;  %v519_v11 = vrot.slane %v1668_v20, %v2037_v0  ;;  %v540_v33 = vadd.s32 1, %v1668_v20 }
 0x14d   : > { %vm525_vm8 = vcmp.eq.s32.totalorder %v2026_v42, %v523_v28  ;;  %vm1001_vm9 = vcmask 64512   ;;  %v738_v3 = vmul.f32 %v2115_v47, %v2068_v30  ;;  %v892_v45 = vmul.f32 %v2125_v49, %v2058_v23 }
 0x14e   : > { %v549_v50 = vrot.slane %v541_v12, %v2037_v0  ;;  %v1537_v63 = vsel %vm525_vm8, 1.0, %v2845_v14  ;;  %v925_v12 = vadd.f32 %v891_v35, %v737_v15  ;;  %vm524_vm11 = vcmp.eq.s32.totalorder %v2026_v42, %v519_v11 }
 0x14f   : > { %v539_v10 = vmul.f32 %v1537_v63, %v2071_v34  ;;  %v545_v40 = vrot.slane %v540_v33, %v2037_v0  ;;  %v739_v20 = vmul.f32 %v2082_v36, %v2063_v26  ;;  %v1536_v47 = vsel %vm524_vm11, 1.0, %v2845_v14 }
 0x150   : > { %vm551_vm10 = vcmp.eq.s32.totalorder %v2026_v42, %v549_v50  ;;  %v2405_v34 = vmul.f32 %v2039_v2, %v925_v12  ;;  %v926_v50 = vadd.f32 %v892_v45, %v738_v3  ;;  %v538_v15 = vmul.f32 %v1536_v47, %v533_v56 }
 0x151   : > { %v1539_v28 = vsel %vm551_vm10, 1.0, %v2845_v14  ;;  %vm550_vm12 = vcmp.eq.s32.totalorder %v2026_v42, %v545_v40  ;;  %v893_v49 = vmul.f32 %v2101_v43, %v2053_v18  ;;  %vm630_vm13 = vcmp.eq.s32.totalorder %v2022_v31, %v2066_v29 }
 0x152   : > { %v565_v32 = vmul.f32 %v1539_v28, %v563_v24  ;;  %v1538_v36 = vsel %vm550_vm12, 1.0, %v2845_v14  ;;  %v2414_v33 = vmul.f32 %v2041_v5, %v926_v50  ;;  %v1543_v24 = vsel %vm630_vm13, 1.0, %v2845_v14 }
 0x153   : > { %v564_v35 = vmul.f32 %v1538_v36, %v559_v25  ;;  %v927_v63 = vadd.f32 %v893_v49, %v739_v20  ;;  %v740_v56 = vmul.f32 %v1543_v24, %v2068_v30  ;;  %vm784_vm14 = vcmp.eq.s32.totalorder %v2022_v31, %v2084_v37  ;;  %v334_v25 = vld [vmem:[%s1958_s16] sm:$0xff]  ;;  %v335_v20 = vld [vmem:[%s1958_s16 + $0x8] sm:$0xff] }
 0x154   : > { %v567_v0 = vadd.f32 %v565_v32, %v539_v10  ;;  %v1577_v42 = vsel %vm784_vm14, 1.0, %v2845_v14  ;;  %v741_v29 = vmul.f32 %v2089_v38, %v2063_v26  ;;  %v895_v43 = vmul.f32 %v2106_v44, %v2053_v18 }
 0x155   : > { %v742_v32 = vmul.f32 %v2094_v39, %v2068_v30  ;;  %v566_v11 = vadd.f32 %v564_v35, %v538_v15  ;;  %v2429_v3 = vmul.f32 %v2039_v2, %v927_v63  ;;  %v894_v10 = vmul.f32 %v1577_v42, %v2058_v23 }
 0x156   : > { %1053 = vmatprep.subr.mxu1 %v567_v0  ;;  %v896_v31 = vmul.f32 %v2112_v46, %v2058_v23  ;;  %v929_v37 = vadd.f32 %v895_v43, %v741_v29  ;;  %v743_v38 = vmul.f32 %v2132_v51, %v2063_v26  ;;  %v897_v44 = vmul.f32 %v2142_v48, %v2053_v18 }
 0x157   : > { %v744_v39 = vmul.f32 %v2135_v52, %v2068_v30  ;;  %1054 = vmatpush1.msra.mxu1 %v566_v11  ;;  %v928_v12 = vadd.f32 %v894_v10, %v740_v56  ;;  %v898_v28 = vmul.f32 %v2145_v53, %v2058_v23  ;;  %v745_v46 = vmul.f32 %v2152_v54, %v2063_v26  ;;  %v336_v56 = vld [vmem:[%s1958_s16 + $0x10] sm:$0xff] }
 0x158   : > { %v930_v45 = vadd.f32 %v896_v31, %v742_v32  ;;  %1608 = vmatmul.mubr.msk.f32.vlgmr.msra.gmra.mrb[0].mxu1 %vm1001_vm9, %v334_v25  ;;  %v2446_v40 = vmul.f32 %v2039_v2, %v929_v37  ;;  %v931_v51 = vadd.f32 %v897_v44, %v743_v38  ;;  %v899_v48 = vmul.f32 %v2162_v57, %v2053_v18  ;;  %v337_v37 = vld [vmem:[%s1958_s16 + $0x18] sm:$0xff] }
 0x159   : > { %v746_v52 = vmul.f32 %v2155_v55, %v2068_v30  ;;  %1123 = vmatprep.mubr.f32.mxu1 %v2845_v14  ;;  %v2455_v53 = vmul.f32 %v2041_v5, %v928_v12  ;;  %v932_v47 = vadd.f32 %v898_v28, %v744_v39  ;;  %v900_v50 = vmul.f32 %v2165_v58, %v2058_v23  ;;  %v2846_v12 = vld [vmem:[#allocation13_spill] sm:$0xff] }
 0x15a   : > { %v2458_v54 = vmul.f32 %v2041_v5, %v930_v45  ;;  %v2463_v15 = vmul.f32 %v2039_v2, %v931_v51  ;;  %v933_v57 = vadd.f32 %v899_v48, %v745_v46  ;;  %v747_v55 = vmul.f32 %v2172_v59, %v2063_v26  ;;  %v2848_v48 = vld [vmem:[#allocation14_spill] sm:$0xff] }
 0x15b   : > { %v901_v49 = vmul.f32 %v2182_v61, %v2053_v18  ;;  %v2470_v0 = vmul.f32 %v2041_v5, %v932_v47  ;;  %v934_v36 = vadd.f32 %v900_v50, %v746_v52  ;;  %v748_v24 = vmul.f32 %v2175_v60, %v2068_v30  ;;  %v2850_v50 = vld [vmem:[#allocation17_spill] sm:$0xff] }
 0x15c   : > { %v902_v58 = vmul.f32 %v2185_v62, %v2058_v23  ;;  %1609 = vmatmul.mubr.msk.f32.gmra.mrb[2].mxu1 %vm1001_vm9, %v335_v20  ;;  %v2478_v35 = vmul.f32 %v2039_v2, %v933_v57  ;;  %v749_v59 = vmul.f32 %v2190_v1, %v2063_v26  ;;  %v903_v61 = vmul.f32 %v2198_v6, %v2053_v18 }
 0x15d   : > { %v935_v63 = vadd.f32 %v901_v49, %v747_v55  ;;  %1129 = vmatprep.mubr.f32.mxu1 %v2845_v14  ;;  %v2487_v60 = vmul.f32 %v2041_v5, %v934_v36  ;;  %v750_v62 = vmul.f32 %v2193_v4, %v2068_v30  ;;  %v904_v29 = vmul.f32 %v2201_v7, %v2058_v23  ;;  %v338_v55 = vld [vmem:[%s1958_s16 + $0x20] sm:$0xff] }
 0x15e   : > { %v936_v42 = vadd.f32 %v902_v58, %v748_v24  ;;  %v937_v1 = vadd.f32 %v903_v61, %v749_v59  ;;  %v751_v6 = vmul.f32 %v2206_v8, %v2063_v26  ;;  %v905_v32 = vmul.f32 %v2214_v13, %v2053_v18  ;;  %v2851_v24 = vld [vmem:[#allocation16_spill] sm:$0xff] }
 0x15f   : > { %v2494_v43 = vmul.f32 %v2039_v2, %v935_v63  ;;  %v938_v25 = vadd.f32 %v904_v29, %v750_v62  ;;  %v752_v4 = vmul.f32 %v2209_v9, %v2068_v30  ;;  %v906_v7 = vmul.f32 %v2217_v16, %v2058_v23  ;;  %v2852_v63 = vld [vmem:[#allocation18_spill] sm:$0xff]  ;;  %v2854_v29 = vld [vmem:[#allocation21_spill] sm:$0xff] }
 0x160   : > { %v2501_v11 = vmul.f32 %v2041_v5, %v936_v42  ;;  %1610 = vmatmul.mubr.msk.f32.gmra.mrb[4].mxu1 %vm1001_vm9, %v336_v56  ;;  %v2509_v10 = vmul.f32 %v2039_v2, %v937_v1  ;;  %v939_v31 = vadd.f32 %v905_v32, %v751_v6  ;;  %v753_v8 = vmul.f32 %v2222_v17, %v2063_v26  ;;  %v2853_v42 = vld [vmem:[#allocation19_spill] sm:$0xff] }
 0x161   : > { %v907_v13 = vmul.f32 %v2230_v21, %v2053_v18  ;;  %1135 = vmatprep.mubr.f32.mxu1 %v2845_v14  ;;  %v2518_v9 = vmul.f32 %v2041_v5, %v938_v25  ;;  %v940_v38 = vadd.f32 %v906_v7, %v752_v4  ;;  %v754_v16 = vmul.f32 %v2225_v19, %v2068_v30  ;;  %v2847_v19 = vld [vmem:[#allocation12_spill] sm:$0xff]  ;;  %v2856_v7 = vld [vmem:[#allocation22_spill] sm:$0xff] }
 0x162   : > { %v908_v44 = vmul.f32 %v2233_v22, %v2058_v23  ;;  %v2525_v39 = vmul.f32 %v2039_v2, %v939_v31  ;;  %v755_v21 = vmul.f32 %v2238_v27, %v2063_v26  ;;  %v909_v45 = vmul.f32 %v2846_v12, %v2053_v18  ;;  %v2849_v27 = vld [vmem:[#allocation15_spill] sm:$0xff]  ;;  %v2855_v25 = vld [vmem:[#allocation20_spill] sm:$0xff] }
 0x163   : > { %v941_v17 = vadd.f32 %v907_v13, %v753_v8  ;;  %v2532_v28 = vmul.f32 %v2041_v5, %v940_v38  ;;  %v756_v51 = vmul.f32 %v2847_v19, %v2068_v30  ;;  %v910_v22 = vmul.f32 %v2848_v48, %v2058_v23  ;;  %v2860_v19 = vld [vmem:[#allocation26_spill] sm:$0xff] }
 0x164   : > { %v942_v46 = vadd.f32 %v908_v44, %v754_v16  ;;  %1611 = vmatmul.mubr.msk.f32.gmra.mrb[6].mxu1 %vm1001_vm9, %v337_v37  ;;  %v943_v20 = vadd.f32 %v909_v45, %v755_v21  ;;  %v757_v47 = vmul.f32 %v2849_v27, %v2063_v26  ;;  %v911_v57 = vmul.f32 %v2850_v50, %v2053_v18  ;;  %v2857_v37 = vld [vmem:[#allocation23_spill] sm:$0xff]  ;;  %v2858_v16 = vld [vmem:[#allocation25_spill] sm:$0xff]  ;;  %v2859_v45 = vld [vmem:[#allocation24_spill] sm:$0xff] }
 0x165   : > { %v2540_v52 = vmul.f32 %v2039_v2, %v941_v17  ;;  %1141 = vmatprep.mubr.f32.mxu1 %v2845_v14  ;;  %v944_v36 = vadd.f32 %v910_v22, %v756_v51  ;;  %v758_v58 = vmul.f32 %v2851_v24, %v2068_v30  ;;  %v912_v59 = vmul.f32 %v2852_v63, %v2058_v23  ;;  %v339_v17 = vld [vmem:[%s1958_s16 + $0x28] sm:$0xff] }
 0x166   : > { %v2549_v49 = vmul.f32 %v2041_v5, %v942_v46  ;;  %v2556_v61 = vmul.f32 %v2039_v2, %v943_v20  ;;  %v945_v56 = vadd.f32 %v911_v57, %v757_v47  ;;  %v759_v62 = vmul.f32 %v2853_v42, %v2063_v26  ;;  %v2861_v20 = vld [vmem:[#allocation27_spill] sm:$0xff]  ;;  %v2862_v47 = vld [vmem:[#allocation29_spill] sm:$0xff] }
 0x167   : > { %v913_v1 = vmul.f32 %v2854_v29, %v2053_v18  ;;  %v2563_v6 = vmul.f32 %v2041_v5, %v944_v36  ;;  %v946_v32 = vadd.f32 %v912_v59, %v758_v58  ;;  %v760_v4 = vmul.f32 %v2855_v25, %v2068_v30  ;;  %v2863_v36 = vld [vmem:[#allocation28_spill] sm:$0xff]  ;;  %v2864_v58 = vld [vmem:[#allocation30_spill] sm:$0xff]  ;;  %v2865_v42 = vld [vmem:[#allocation31_spill] sm:$0xff] }
 0x168   : > { %v914_v31 = vmul.f32 %v2856_v7, %v2058_v23  ;;  %1612 = vmatmul.mubr.msk.f32.gmra.mrb[8].mxu1 %vm1001_vm9, %v338_v55  ;;  %v2571_v8 = vmul.f32 %v2039_v2, %v945_v56  ;;  %v761_v38 = vmul.f32 %v2857_v37, %v2063_v26  ;;  %v915_v44 = vmul.f32 %v2858_v16, %v2053_v18  ;;  %v2866_v29 = vld [vmem:[#allocation33_spill] sm:$0xff]  ;;  %v2867_v7 = vld [vmem:[#allocation32_spill] sm:$0xff] }
 0x169   : > { %v947_v13 = vadd.f32 %v913_v1, %v759_v62  ;;  %1147 = vmatprep.mubr.f32.mxu1 %v2845_v14  ;;  %v2580_v21 = vmul.f32 %v2041_v5, %v946_v32  ;;  %v762_v46 = vmul.f32 %v2859_v45, %v2068_v30  ;;  %v916_v51 = vmul.f32 %v2860_v19, %v2058_v23  ;;  %v340_v32 = vld [vmem:[%s1958_s16 + $0x30] sm:$0xff] }
 0x16a   : > { %v948_v12 = vadd.f32 %v914_v31, %v760_v4  ;;  %v949_v22 = vadd.f32 %v915_v44, %v761_v38  ;;  %v763_v27 = vmul.f32 %v2861_v20, %v2063_v26  ;;  %v917_v50 = vmul.f32 %v2862_v47, %v2053_v18  ;;  %v2870_v44 = vld [vmem:[#allocation35_spill] sm:$0xff]  ;;  %v2872_v19 = vld [vmem:[#allocation38_spill] sm:$0xff] }
 0x16b   : > { %v2587_v48 = vmul.f32 %v2039_v2, %v947_v13  ;;  %v950_v55 = vadd.f32 %v916_v51, %v762_v46  ;;  %v764_v24 = vmul.f32 %v2863_v36, %v2068_v30  ;;  %v918_v63 = vmul.f32 %v2864_v58, %v2058_v23  ;;  %v2868_v13 = vld [vmem:[#allocation34_spill] sm:$0xff]  ;;  %v342_v58 = vld [vmem:[%s1958_s16 + $0x40] sm:$0xff] }
 0x16c   : > { %v2594_v57 = vmul.f32 %v2041_v5, %v948_v12  ;;  %1613 = vmatmul.mubr.msk.f32.gmra.mrb[10].mxu1 %vm1001_vm9, %v339_v17  ;;  %v2602_v59 = vmul.f32 %v2039_v2, %v949_v22  ;;  %v951_v56 = vadd.f32 %v917_v50, %v763_v27  ;;  %v765_v62 = vmul.f32 %v2865_v42, %v2063_v26  ;;  %v2871_v17 = vld [vmem:[#allocation37_spill] sm:$0xff]  ;;  %v2874_v22 = vld [vmem:[#allocation39_spill] sm:$0xff] }
 0x16d   : > { %v919_v1 = vmul.f32 %v2866_v29, %v2053_v18  ;;  %1153 = vmatprep.mubr.f32.mxu1 %v2845_v14  ;;  %v2611_v25 = vmul.f32 %v2041_v5, %v950_v55  ;;  %v952_v4 = vadd.f32 %v918_v63, %v764_v24  ;;  %v766_v31 = vmul.f32 %v2867_v7, %v2068_v30  ;;  %v2869_v18 = vld [vmem:[#allocation36_spill] sm:$0xff]  ;;  %v341_v50 = vld [vmem:[%s1958_s16 + $0x38] sm:$0xff]  ;;  %v343_v63 = vld [vmem:[%s1958_s16 + $0x48] sm:$0xff] }
 0x16e   : > { %v920_v37 = vmul.f32 %v2868_v13, %v2058_v23  ;;  %v2618_v38 = vmul.f32 %v2039_v2, %v951_v56  ;;  %v955_v16 = vadd.f32 %v2869_v18, %v2338_v41  ;;  %v956_v12 = vadd.f32 %v2871_v17, %v2870_v44  ;;  %v2873_v30 = vld [vmem:[#allocation40_spill] sm:$0xff]  ;;  %v2875_v23 = vld [vmem:[#allocation41_spill] sm:$0xff]  ;;  %v349_v29 = vld [vmem:[%s1958_s16 + $0x78] sm:$0xff] }
 0x16f   : > { %v953_v26 = vadd.f32 %v919_v1, %v765_v62  ;;  %v2625_v45 = vmul.f32 %v2041_v5, %v952_v4  ;;  %v957_v51 = vadd.f32 %v2873_v30, %v2872_v19  ;;  %v958_v20 = vadd.f32 %v2875_v23, %v2874_v22  ;;  %v346_v56 = vld [vmem:[%s1958_s16 + $0x60] sm:$0xff]  ;;  %v347_v42 = vld [vmem:[%s1958_s16 + $0x68] sm:$0xff]  ;;  %v348_v62 = vld [vmem:[%s1958_s16 + $0x70] sm:$0xff] }
 0x170   : > { %v954_v46 = vadd.f32 %v920_v37, %v766_v31  ;;  %1614 = vmatmul.mubr.msk.f32.gmra.mrb[12].mxu1 %vm1001_vm9, %v340_v32  ;;  %v2636_v41 = vmul.f32 %v2039_v2, %v955_v16  ;;  %v2639_v47 = vmul.f32 %v2041_v5, %v956_v12  ;;  %v350_v1 = vld [vmem:[%s1958_s16 + $0x80] sm:$0xff]  ;;  %v369_v32 = vld [vmem:[%s2791_s4 + $0x8] sm:$0xff] }
 0x171   : > { %v2633_v27 = vmul.f32 %v2039_v2, %v953_v26  ;;  %1159 = vmatprep.mubr.f32.mxu1 %v2845_v14  ;;  %v2647_v36 = vmul.f32 %v2039_v2, %v957_v51  ;;  %v2650_v24 = vmul.f32 %v2041_v5, %v958_v20  ;;  %v344_v2 = vld [vmem:[%s1958_s16 + $0x50] sm:$0xff]  ;;  %1625 = vmatprep.mubr.msk.f32.mxu0 %vm1001_vm9, %v369_v32 }
 0x172   : > { %v2644_v55 = vmul.f32 %v2041_v5, %v954_v46  ;;  %v345_v5 = vld [vmem:[%s1958_s16 + $0x58] sm:$0xff] }
 0x174   : > { %1615 = vmatmul.mubr.msk.f32.gmra.mrb[14].mxu1 %vm1001_vm9, %v341_v50 }
 0x175   : > { %1165 = vmatprep.mubr.f32.mxu1 %v2845_v14 }
 0x178   : > { %1616 = vmatmul.mubr.msk.f32.gmra.mrb[16].mxu1 %vm1001_vm9, %v342_v58 }
 0x179   : > { %1171 = vmatprep.mubr.f32.mxu1 %v2845_v14 }
 0x17c   : > { %1617 = vmatmul.mubr.msk.f32.gmra.mrb[18].mxu1 %vm1001_vm9, %v343_v63 }
 0x17d   : > { %1177 = vmatprep.mubr.f32.mxu1 %v2845_v14 }
 0x180   : > { %1618 = vmatmul.mubr.msk.f32.gmra.mrb[20].mxu1 %vm1001_vm9, %v344_v2 }
 0x181   : > { %1183 = vmatprep.mubr.f32.mxu1 %v2845_v14 }
 0x184   : > { %1619 = vmatmul.mubr.msk.f32.gmra.mrb[22].mxu1 %vm1001_vm9, %v345_v5 }
 0x185   : > { %1189 = vmatprep.mubr.f32.mxu1 %v2845_v14 }
 0x188   : > { %1620 = vmatmul.mubr.msk.f32.gmra.mrb[24].mxu1 %vm1001_vm9, %v346_v56 }
 0x189   : > { %1195 = vmatprep.mubr.f32.mxu1 %v2845_v14 }
 0x18c   : > { %1621 = vmatmul.mubr.msk.f32.gmra.mrb[26].mxu1 %vm1001_vm9, %v347_v42 }
 0x18d   : > { %1201 = vmatprep.mubr.f32.mxu1 %v2845_v14 }
 0x190   : > { %1622 = vmatmul.mubr.msk.f32.gmra.mrb[28].mxu1 %vm1001_vm9, %v348_v62 }
 0x191   : > { %1207 = vmatprep.mubr.f32.mxu1 %v2845_v14 }
 0x194   : > { %1623 = vmatmul.mubr.msk.f32.gmra.mrb[30].mxu1 %vm1001_vm9, %v349_v29 }
 0x195   : > { %1213 = vmatprep.mubr.f32.mxu1 %v2845_v14 }
 0x198   : > { %1624 = vmatmul.mubr.msk.f32.gmra.mrb[32].mxu1 %vm1001_vm9, %v350_v1 }
 0x22b   : > { %v1119_v4 = vpop.f32.mrb[0].mxu1 }
 0x22c   : > { %v1220_v7 = vmul.f32 %v1119_v4, %v2405_v34  ;;  %v1121_v31 = vpop.f32.mrb[1].mxu1 }
 0x22d   : > { %v1221_v13 = vmul.f32 %v1121_v31, %v2414_v33 }
 0x22f   : > { %v1125_v37 = vpop.f32.mrb[2].mxu1 }
 0x230   : > { %v1222_v26 = vmul.f32 %v1125_v37, %v2429_v3  ;;  %v1127_v18 = vpop.f32.mrb[3].mxu1 }
 0x231   : > { %v1223_v14 = vmul.f32 %v1127_v18, %v2455_v53 }
 0x232   : > { %v1634_v16 = vpack.c.bf16 %v1222_v26, %v1220_v7 }
 0x233   : > { %v1632_v44 = vpack.c.bf16 %v1223_v14, %v1221_v13  ;;  %v1131_v17 = vpop.f32.mrb[4].mxu1 }
 0x234   : > { %v1224_v12 = vmul.f32 %v1131_v17, %v2446_v40  ;;  %v1133_v46 = vpop.f32.mrb[5].mxu1 }
 0x235   : > { %v1225_v19 = vmul.f32 %v1133_v46, %v2458_v54  ;;  %1633 = vmatprep.subr.bf16.mxu0 %v1632_v44 }
 0x236   : > { %1635 = vmatpush1.bf16.msra.mxu0 %v1634_v16 }
 0x237   : > { %v1137_v34 = vpop.f32.mrb[6].mxu1 }
 0x238   : > { %v1226_v30 = vmul.f32 %v1137_v34, %v2463_v15  ;;  %v1139_v33 = vpop.f32.mrb[7].mxu1 }
 0x239   : > { %v1227_v51 = vmul.f32 %v1139_v33, %v2470_v0 }
 0x23a   : > { %v1638_v3 = vpack.c.bf16 %v1226_v30, %v1224_v12 }
 0x23b   : > { %v1636_v22 = vpack.c.bf16 %v1227_v51, %v1225_v19  ;;  %v1143_v23 = vpop.f32.mrb[8].mxu1 }
 0x23c   : > { %v1228_v53 = vmul.f32 %v1143_v23, %v2478_v35  ;;  %v1145_v20 = vpop.f32.mrb[9].mxu1 }
 0x23d   : > { %v1229_v50 = vmul.f32 %v1145_v20, %v2487_v60  ;;  %1637 = vmatprep.subr.bf16.mxu0 %v1636_v22 }
 0x23e   : > { %1639 = vmatpush1.bf16.msra.mxu0 %v1638_v3 }
 0x23f   : > { %v1149_v40 = vpop.f32.mrb[10].mxu1 }
 0x240   : > { %v1230_v54 = vmul.f32 %v1149_v40, %v2494_v43  ;;  %v1151_v58 = vpop.f32.mrb[11].mxu1 }
 0x241   : > { %v1231_v63 = vmul.f32 %v1151_v58, %v2501_v11  ;;  %v1255_v58 = vld [vmem:[%s1960_s29 + $0x8] sm:$0xff] }
 0x242   : > { %v1642_v15 = vpack.c.bf16 %v1230_v54, %v1228_v53  ;;  %v1254_v54 = vld [vmem:[%s1960_s29] sm:$0xff] }
 0x243   : > { %v1640_v2 = vpack.c.bf16 %v1231_v63, %v1229_v50  ;;  %v1155_v5 = vpop.f32.mrb[12].mxu1 }
 0x244   : > { %v1232_v0 = vmul.f32 %v1155_v5, %v2509_v10  ;;  %v1157_v56 = vpop.f32.mrb[13].mxu1 }
 0x245   : > { %v1233_v42 = vmul.f32 %v1157_v56, %v2518_v9  ;;  %1641 = vmatprep.subr.bf16.mxu0 %v1640_v2  ;;  %v1257_v56 = vld [vmem:[%s1960_s29 + $0x18] sm:$0xff] }
 0x246   : > { %1643 = vmatpush1.bf16.msra.mxu0 %v1642_v15 }
 0x247   : > { %v1161_v35 = vpop.f32.mrb[14].mxu1 }
 0x248   : > { %v1234_v60 = vmul.f32 %v1161_v35, %v2525_v39  ;;  %v1163_v62 = vpop.f32.mrb[15].mxu1 }
 0x249   : > { %v1235_v29 = vmul.f32 %v1163_v62, %v2532_v28 }
 0x24a   : > { %v1646_v43 = vpack.c.bf16 %v1234_v60, %v1232_v0  ;;  %v1256_v0 = vld [vmem:[%s1960_s29 + $0x10] sm:$0xff] }
 0x24b   : > { %v1644_v1 = vpack.c.bf16 %v1235_v29, %v1233_v42  ;;  %v1167_v32 = vpop.f32.mrb[16].mxu1  ;;  %v1258_v29 = vld [vmem:[%s1960_s29 + $0x20] sm:$0x1] }
 0x24c   : > { %v1236_v11 = vmul.f32 %v1167_v32, %v2540_v52  ;;  %v1169_v4 = vpop.f32.mrb[17].mxu1 }
 0x24d   : > { %v1237_v7 = vmul.f32 %v1169_v4, %v2549_v49  ;;  %1645 = vmatprep.subr.bf16.mxu0 %v1644_v1 }
 0x24e   : > { %1647 = vmatpush1.bf16.msra.mxu0 %v1646_v43  ;;  %v1259_v43 = vld [vmem:[%s1960_s29 + $0x28] sm:$0x1] }
 0x24f   : > { %v1173_v10 = vpop.f32.mrb[18].mxu1 }
 0x250   : > { %v1238_v9 = vmul.f32 %v1173_v10, %v2556_v61  ;;  %v1175_v31 = vpop.f32.mrb[19].mxu1 }
 0x251   : > { %v1239_v13 = vmul.f32 %v1175_v31, %v2563_v6 }
 0x252   : > { %v1650_v39 = vpack.c.bf16 %v1238_v9, %v1236_v11 }
 0x253   : > { %v1648_v37 = vpack.c.bf16 %v1239_v13, %v1237_v7  ;;  %v1179_v26 = vpop.f32.mrb[20].mxu1 }
 0x254   : > { %v1240_v28 = vmul.f32 %v1179_v26, %v2571_v8  ;;  %v1181_v18 = vpop.f32.mrb[21].mxu1 }
 0x255   : > { %v1241_v14 = vmul.f32 %v1181_v18, %v2580_v21  ;;  %1649 = vmatprep.subr.bf16.mxu0 %v1648_v37 }
 0x256   : > { %1651 = vmatpush1.bf16.msra.mxu0 %v1650_v39 }
 0x257   : > { %v1185_v52 = vpop.f32.mrb[22].mxu1 }
 0x258   : > { %v1242_v49 = vmul.f32 %v1185_v52, %v2587_v48  ;;  %v1187_v16 = vpop.f32.mrb[23].mxu1 }
 0x259   : > { %v1243_v44 = vmul.f32 %v1187_v16, %v2594_v57 }
 0x25a   : > { %v1654_v61 = vpack.c.bf16 %v1242_v49, %v1240_v28 }
 0x25b   : > { %v1652_v17 = vpack.c.bf16 %v1243_v44, %v1241_v14  ;;  %v1191_v12 = vpop.f32.mrb[24].mxu1 }
 0x25c   : > { %v1244_v6 = vmul.f32 %v1191_v12, %v2602_v59  ;;  %v1193_v46 = vpop.f32.mrb[25].mxu1 }
 0x25d   : > { %v1245_v19 = vmul.f32 %v1193_v46, %v2611_v25  ;;  %1653 = vmatprep.subr.bf16.mxu0 %v1652_v17 }
 0x25e   : > { %1655 = vmatpush1.bf16.msra.mxu0 %v1654_v61 }
 0x25f   : > { %v1197_v8 = vpop.f32.mrb[26].mxu1 }
 0x260   : > { %v1246_v21 = vmul.f32 %v1197_v8, %v2618_v38  ;;  %v1199_v34 = vpop.f32.mrb[27].mxu1 }
 0x261   : > { %v1247_v30 = vmul.f32 %v1199_v34, %v2625_v45 }
 0x262   : > { %v1658_v48 = vpack.c.bf16 %v1246_v21, %v1244_v6 }
 0x263   : > { %v1656_v33 = vpack.c.bf16 %v1247_v30, %v1245_v19  ;;  %v1203_v51 = vpop.f32.mrb[28].mxu1 }
 0x264   : > { %v1248_v57 = vmul.f32 %v1203_v51, %v2633_v27  ;;  %v1205_v3 = vpop.f32.mrb[29].mxu1 }
 0x265   : > { %v1249_v22 = vmul.f32 %v1205_v3, %v2644_v55  ;;  %1657 = vmatprep.subr.bf16.mxu0 %v1656_v33  ;;  %v370_v55 = vld [vmem:[%s2791_s4 + $0x10] sm:$0xff] }
 0x266   : > { %1659 = vmatpush1.bf16.msra.mxu0 %v1658_v48 }
 0x267   : > { %v1209_v59 = vpop.f32.mrb[30].mxu1 }
 0x268   : > { %v1250_v25 = vmul.f32 %v1209_v59, %v2636_v41  ;;  %v1211_v23 = vpop.f32.mrb[31].mxu1  ;;  %v368_v41 = vld [vmem:[%s2791_s4] sm:$0xff] }
 0x269   : > { %v1251_v53 = vmul.f32 %v1211_v23, %v2639_v47  ;;  %v371_v47 = vld [vmem:[%s2791_s4 + $0x18] sm:$0xff] }
 0x26a   : > { %v1662_v38 = vpack.c.bf16 %v1250_v25, %v1248_v57 }
 0x26b   : > { %v1660_v20 = vpack.c.bf16 %v1251_v53, %v1249_v22  ;;  %v1215_v50 = vpop.f32.mrb[32].mxu1 }
 0x26c   : > { %v1252_v45 = vmul.f32 %v1215_v50, %v2647_v36  ;;  %v1217_v40 = vpop.f32.mrb[33].mxu1  ;;  %v373_v36 = vld [vmem:[%s2791_s4 + $0x28] sm:$0x1] }
 0x26d   : > { %v1253_v27 = vmul.f32 %v1217_v40, %v2650_v24  ;;  %1661 = vmatprep.subr.bf16.mxu0 %v1660_v20  ;;  %v372_v24 = vld [vmem:[%s2791_s4 + $0x20] sm:$0x1] }
 0x26e   : > { %1663 = vmatpush1.bf16.msra.mxu0 %v1662_v38 }
 0x26f   : > { %1301 = vmatprep.subr.mxu0 %v1253_v27 }
 0x272   : > { %1302 = vmatpush1.msra.mxu0 %v1252_v45 }
 0x273   : > { %1334 = vmatmul.mubr.f32.vlgmr.msra.gmra.mrb[2].mxu0 %v368_v41 }
 0x274   : > { %1626 = vmatprep.mubr.msk.f32.mxu0 %vm1001_vm9, %v371_v47 }
 0x277   : > { %1340 = vmatmul.mubr.f32.gmra.mrb[4].mxu0 %v370_v55 }
 0x278   : > { %1627 = vmatprep.mubr.msk.f32.mxu0 %vm1001_vm9, %v373_v36 }
 0x27b   : > { %1346 = vmatmul.mubr.f32.gmra.mrb[6].mxu0 %v372_v24 }
 0x346   : > { %v1335_v63 = vpop.f32.mrb[2].mxu0 }
 0x347   : > { %v1352_v15 = vadd.f32 %v1335_v63, %v1254_v54  ;;  %v1337_v2 = vpop.f32.mrb[3].mxu0 }
 0x348   : > { %v1353_v5 = vadd.f32 %v1337_v2, %v1255_v58 }
 0x349   : > { %1358 = vst [vmem:[%s1960_s29] sm:$0xff] %v1352_v15 }
 0x34a   : > { %1359 = vst [vmem:[%s1960_s29 + $0x8] sm:$0xff] %v1353_v5  ;;  %v1341_v42 = vpop.f32.mrb[4].mxu0 }
 0x34b   : > { %v1354_v35 = vadd.f32 %v1341_v42, %v1256_v0  ;;  %v1343_v60 = vpop.f32.mrb[5].mxu0 }
 0x34c   : > { %v1355_v62 = vadd.f32 %v1343_v60, %v1257_v56  ;;  %1370 = sbr.rel (!%p1921_p5) target bundleno = 859 (0x35b), region = 48 }
 0x34d   : > { %1360 = vst [vmem:[%s1960_s29 + $0x10] sm:$0xff] %v1354_v35 }
 0x34e   : > { %1361 = vst [vmem:[%s1960_s29 + $0x18] sm:$0xff] %v1355_v62  ;;  %v1347_v1 = vpop.f32.mrb[6].mxu0 }
 0x34f   : > { %v1356_v32 = vadd.f32 %v1347_v1, %v1258_v29  ;;  %v1349_v11 = vpop.f32.mrb[7].mxu0 }
 0x350   : > { %v1357_v4 = vadd.f32 %v1349_v11, %v1259_v43  ;;  %v1388_v7 = vld [vmem:[%s1960_s29] sm:$0xff] (%p1921_p5) }
 0x351   : > { %1362 = vst [vmem:[%s1960_s29 + $0x20] sm:$0x1] %v1356_v32  ;;  %v1390_v10 = vld [vmem:[%s1960_s29 + $0x8] sm:$0xff] (%p1921_p5)  ;;  %1389 = vst [vmem:[%s1375_s11] sm:$0xff] (%p1921_p5), %v1388_v7 }
 0x352   : > { %1363 = vst [vmem:[%s1960_s29 + $0x28] sm:$0x1] %v1357_v4  ;;  %1391 = vst [vmem:[%s1375_s11 + $0x8] sm:$0xff] (%p1921_p5), %v1390_v10 }
 0x354   : > { %v1392_v9 = vld [vmem:[%s1960_s29 + $0x10] sm:$0xff] }
 0x355   : > { %v1394_v31 = vld [vmem:[%s1960_s29 + $0x18] sm:$0xff]  ;;  %1393 = vst [vmem:[%s1375_s11 + $0x20] sm:$0xff] %v1392_v9 }
 0x356   : > { %1395 = vst [vmem:[%s1375_s11 + $0x28] sm:$0xff] %v1394_v31 }
 0x358   : > { %v1396_v13 = vld [vmem:[%s1960_s29 + $0x20] sm:$0xff] }
 0x359   : > { %v1398_v39 = vld [vmem:[%s1960_s29 + $0x28] sm:$0xff]  ;;  %1397 = vst [vmem:[%s1375_s11 + $0x40] sm:$0xff] %v1396_v13 }
 0x35a   : > { %1399 = vst [vmem:[%s1375_s11 + $0x48] sm:$0xff] %v1398_v39 }
 0x35b PF: > { %s2876_s22 = sld [smem:[#allocation7_spill]]  ;;  %s2877_s18 = sld [smem:[#allocation3_spill]] }
 0x35c   : > { %s2878_s19 = sld [smem:[#allocation11_spill]]  ;;  %s2879_s20 = sld [smem:[#allocation4_spill]] }
 0x35d   : > { %s2880_s21 = sld [smem:[#allocation5_spill]]  ;;  %s2882_s23 = sld [smem:[#allocation8_spill]] }
 0x35e   : > { %s2883_s24 = sld [smem:[#allocation9_spill]]  ;;  %s2884_s25 = sld [smem:[#allocation10_spill]] }
 0x361   : > { %s15_s26 = sadd.s32 1, %s2876_s22   ;;  %s2881_s22 = sld [smem:[#allocation6_spill]] }
 0x362   : > { %p12_p0 = scmp.ge.s32.totalorder %s15_s26, 18  }
 0x364   :  { %14 = sbr.rel (!%p12_p0) target bundleno = 5 (0x5), region = 103 }

</bundles_post_ra>
